<compile_context>
chip_gen: v5e
topology: v5e:2x2
jax: 0.10.0
libtpu: 0.0.40
codegen_flags: <defaults>
</compile_context>

<pallas_src>
import math

import jax
import jax.numpy as jnp
from jax.experimental import pallas as pl
from jax.experimental.pallas import tpu as pltpu


def _gelu(x):
    # tanh-approximate GELU (runs on VPU/EUP).
    c = math.sqrt(2.0 / math.pi)
    return 0.5 * x * (1.0 + jnp.tanh(c * (x + 0.044715 * x * x * x)))


# ---------------------------------------------------------------------------
# Fused kernel: conv1 + GELU + BN1 + conv2 + GELU + BN2, one batch element per grid step.
# ---------------------------------------------------------------------------
def _conv_subsampling_kernel(x_ref, w1_ref, b1_ref, s1_ref, t1_ref,
                             w2_ref, b2_ref, s2_ref, t2_ref,
                             o_ref, mid_ref):
    # x_ref:   (H+2, W+2, Cin)   zero-padded NHWC input (batch dim squeezed by BlockSpec)
    # w*_ref:  (3, 3, Cin, Cout) conv weights in HWIO layout
    # b*/s*/t*: (1, Cout)        conv bias / folded BN scale / folded BN shift
    # o_ref:   (H, W, Cout)      NHWC output slice
    # mid_ref: (H+2, W+2, Cout)  VMEM scratch holding the padded intermediate activation
    H, W, Cout = o_ref.shape
    Cin = x_ref.shape[-1]

    def conv3x3(window, w_ref, cin):
        # 3x3 conv as 9 shifted MXU matmuls accumulated in f32.
        acc = jnp.zeros((H * W, w_ref.shape[3]), jnp.float32)
        for kh in range(3):
            for kw in range(3):
                win = window(kh, kw)                       # (H, W, cin)
                acc = acc + jnp.dot(win.reshape(H * W, cin),
                                    w_ref[kh, kw, :, :],
                                    preferred_element_type=jnp.float32)
        return acc

    # ---- stage 1: conv1 + bias + GELU + BN1 (folded scale/shift) ----
    acc1 = conv3x3(lambda kh, kw: x_ref[pl.ds(kh, H), pl.ds(kw, W), :], w1_ref, Cin)
    y1 = _gelu(acc1 + b1_ref[...]) * s1_ref[...] + t1_ref[...]        # (H*W, Cout)

    # Padded intermediate stays on-chip: zero the halo, write the interior.
    mid_ref[...] = jnp.zeros_like(mid_ref)
    mid_ref[pl.ds(1, H), pl.ds(1, W), :] = y1.reshape(H, W, Cout)

    # ---- stage 2: conv2 + bias + GELU + BN2 ----
    acc2 = conv3x3(lambda kh, kw: mid_ref[pl.ds(kh, H), pl.ds(kw, W), :], w2_ref, Cout)
    y2 = _gelu(acc2 + b2_ref[...]) * s2_ref[...] + t2_ref[...]

    o_ref[...] = y2.reshape(H, W, Cout)


def conv_subsampling_forward(x_nchw, params, transpose=False):
    """x_nchw: (B, Cin, H, W) float32. Returns (B, Cout*H, W) (or transposed)."""
    (w1, b1, s1, t1, w2, b2, s2, t2) = params
    B, Cin, H, W = x_nchw.shape
    Cout = w1.shape[-1]

    # NCHW -> NHWC once (channels on the lane dim inside the kernel), zero pad H/W by 1.
    x_nhwc = jnp.transpose(x_nchw, (0, 2, 3, 1))
    x_pad = jnp.pad(x_nhwc, ((0, 0), (1, 1), (1, 1), (0, 0)))

    out_nhwc = pl.pallas_call(
        _conv_subsampling_kernel,
        out_shape=jax.ShapeDtypeStruct((B, H, W, Cout), jnp.float32),
        grid=(B,),
        in_specs=[
            pl.BlockSpec((None, H + 2, W + 2, Cin), lambda b: (b, 0, 0, 0)),
            pl.BlockSpec((3, 3, Cin, Cout), lambda b: (0, 0, 0, 0)),
            pl.BlockSpec((1, Cout), lambda b: (0, 0)),
            pl.BlockSpec((1, Cout), lambda b: (0, 0)),
            pl.BlockSpec((1, Cout), lambda b: (0, 0)),
            pl.BlockSpec((3, 3, Cout, Cout), lambda b: (0, 0, 0, 0)),
            pl.BlockSpec((1, Cout), lambda b: (0, 0)),
            pl.BlockSpec((1, Cout), lambda b: (0, 0)),
            pl.BlockSpec((1, Cout), lambda b: (0, 0)),
        ],
        out_specs=pl.BlockSpec((None, H, W, Cout), lambda b: (b, 0, 0, 0)),
        scratch_shapes=[pltpu.VMEM((H + 2, W + 2, Cout), jnp.float32)],
        compiler_params=pltpu.CompilerParams(dimension_semantics=("parallel",)),
    )(x_pad, w1, b1, s1, t1, w2, b2, s2, t2)

    # NHWC -> NCHW -> (B, C*H, W), matching torch `x.view(B, C*H, W)`.
    out = jnp.transpose(out_nhwc, (0, 3, 1, 2)).reshape(B, Cout * H, W)
    if transpose:
        out = jnp.transpose(out, (0, 2, 1))
    return out


# ---------------------------------------------------------------------------
# Module wrapper (parameter container + BN folding)
# ---------------------------------------------------------------------------
class ConvSubSamplingPallas:
    def __init__(self, in_feat, out_feat, key, transpose=False):
        self.in_feat, self.out_feat, self.transpose = in_feat, out_feat, transpose
        ks = jax.random.split(key, 12)
        eps = 1e-5
        k1 = 1.0 / math.sqrt(in_feat * 9)
        k2 = 1.0 / math.sqrt(out_feat * 9)

        # conv weights stored HWIO (3,3,Cin,Cout); PyTorch layout is (Cout,Cin,3,3).
        w1 = jax.random.uniform(ks[0], (3, 3, in_feat, out_feat), jnp.float32, -k1, k1)
        b1 = jax.random.uniform(ks[1], (1, out_feat), jnp.float32, -k1, k1)
        w2 = jax.random.uniform(ks[2], (3, 3, out_feat, out_feat), jnp.float32, -k2, k2)
        b2 = jax.random.uniform(ks[3], (1, out_feat), jnp.float32, -k2, k2)

        # BatchNorm (eval semantics): fold gamma/beta/running stats to scale & shift.
        def fold_bn(kg, kb, km, kv):
            g = 1.0 + 0.1 * jax.random.normal(kg, (1, out_feat), jnp.float32)
            be = 0.1 * jax.random.normal(kb, (1, out_feat), jnp.float32)
            rm = 0.1 * jax.random.normal(km, (1, out_feat), jnp.float32)
            rv = jnp.abs(1.0 + 0.1 * jax.random.normal(kv, (1, out_feat), jnp.float32))
            s = g * jax.lax.rsqrt(rv + eps)
            t = be - rm * s
            return s, t

        s1, t1 = fold_bn(ks[4], ks[5], ks[6], ks[7])
        s2, t2 = fold_bn(ks[8], ks[9], ks[10], ks[11])
        self.params = (w1, b1, s1, t1, w2, b2, s2, t2)

    def __call__(self, x):
        return conv_subsampling_forward(x, self.params, self.transpose)


# ---------------------------------------------------------------------------
# Pure-XLA reference (same math) for in-script validation
# ---------------------------------------------------------------------------
def _reference_forward(x_nchw, params, transpose=False):
    (w1, b1, s1, t1, w2, b2, s2, t2) = params
    x = jnp.transpose(x_nchw, (0, 2, 3, 1))

    def block(xx, w, b, s, t):
        y = jax.lax.conv_general_dilated(
            xx, w, window_strides=(1, 1), padding="SAME",
            dimension_numbers=("NHWC", "HWIO", "NHWC"),
            precision=jax.lax.Precision.HIGHEST)
        return (_gelu(y + b.reshape(1, 1, 1, -1)) * s.reshape(1, 1, 1, -1)
                + t.reshape(1, 1, 1, -1))

    y = block(block(x, w1, b1, s1, t1), w2, b2, s2, t2)
    B, H, W, C = y.shape
    out = jnp.transpose(y, (0, 3, 1, 2)).reshape(B, C * H, W)
    if transpose:
        out = jnp.transpose(out, (0, 2, 1))
    return out


if __name__ == "__main__":
    B, Cin, H, W, Cout = 2, 4, 16, 16, 8
    key = jax.random.PRNGKey(0)
    kx, kp = jax.random.split(key)
    x = jax.random.normal(kx, (B, Cin, H, W), jnp.float32)

    mod = ConvSubSamplingPallas(Cin, Cout, kp, transpose=False)
    out = mod(x)
    jax.block_until_ready(out)

    assert out.shape == (B, Cout * H, W), out.shape
    assert bool(jnp.all(jnp.isfinite(out)))

    ref = _reference_forward(x, mod.params, transpose=False)
    err = float(jnp.max(jnp.abs(out - ref)))
    assert err < 5e-3, f"max abs err vs reference: {err}"

    print("KERNEL_OK")
</pallas_src>

<mosaic_0001>
module attributes {stable_mosaic.version = 11 : i64} {
  func.func @_conv_subsampling_kernel(%arg0: i32, %arg1: memref<1x18x18x4xf32, #tpu.memory_space<vmem>>, %arg2: memref<3x3x4x8xf32, #tpu.memory_space<vmem>>, %arg3: memref<1x8xf32, #tpu.memory_space<vmem>>, %arg4: memref<1x8xf32, #tpu.memory_space<vmem>>, %arg5: memref<1x8xf32, #tpu.memory_space<vmem>>, %arg6: memref<3x3x8x8xf32, #tpu.memory_space<vmem>>, %arg7: memref<1x8xf32, #tpu.memory_space<vmem>>, %arg8: memref<1x8xf32, #tpu.memory_space<vmem>>, %arg9: memref<1x8xf32, #tpu.memory_space<vmem>>, %arg10: memref<1x16x16x8xf32, #tpu.memory_space<vmem>>, %arg11: memref<18x18x8xf32, #tpu.memory_space<vmem>>) attributes {dimension_semantics = [#tpu.dimension_semantics<parallel>], iteration_bounds = array<i64: 2>, scalar_prefetch = 0 : i64, scratch_operands = 1 : i64, tpu.core_type = #tpu.core_type<tc>, window_params = [{transform_indices = @transform_0, window_bounds = array<i64: 1, 18, 18, 4>}, {pipeline_mode = #tpu.pipeline_mode<synchronous>, transform_indices = @transform_1, window_bounds = array<i64: 3, 3, 4, 8>}, {pipeline_mode = #tpu.pipeline_mode<synchronous>, transform_indices = @transform_2, window_bounds = array<i64: 1, 8>}, {pipeline_mode = #tpu.pipeline_mode<synchronous>, transform_indices = @transform_3, window_bounds = array<i64: 1, 8>}, {pipeline_mode = #tpu.pipeline_mode<synchronous>, transform_indices = @transform_4, window_bounds = array<i64: 1, 8>}, {pipeline_mode = #tpu.pipeline_mode<synchronous>, transform_indices = @transform_5, window_bounds = array<i64: 3, 3, 8, 8>}, {pipeline_mode = #tpu.pipeline_mode<synchronous>, transform_indices = @transform_6, window_bounds = array<i64: 1, 8>}, {pipeline_mode = #tpu.pipeline_mode<synchronous>, transform_indices = @transform_7, window_bounds = array<i64: 1, 8>}, {pipeline_mode = #tpu.pipeline_mode<synchronous>, transform_indices = @transform_8, window_bounds = array<i64: 1, 8>}, {transform_indices = @transform_9, window_bounds = array<i64: 1, 16, 16, 8>}]} {
    %cst = arith.constant 0.000000e+00 : f32
    %0 = vector.broadcast %cst : f32 to vector<256x8xf32>
    %c0 = arith.constant 0 : index
    %c0_0 = arith.constant 0 : index
    %c0_1 = arith.constant 0 : index
    %c0_2 = arith.constant 0 : index
    %1 = vector.load %arg1[%c0, %c0_0, %c0_1, %c0_2] : memref<1x18x18x4xf32, #tpu.memory_space<vmem>>, vector<1x16x16x4xf32>
    %2 = vector.shape_cast %1 : vector<1x16x16x4xf32> to vector<16x16x4xf32>
    %3 = vector.shape_cast %2 : vector<16x16x4xf32> to vector<256x4xf32>
    %c0_3 = arith.constant 0 : index
    %c0_4 = arith.constant 0 : index
    %c0_5 = arith.constant 0 : index
    %c0_6 = arith.constant 0 : index
    %4 = vector.load %arg2[%c0_3, %c0_4, %c0_5, %c0_6] : memref<3x3x4x8xf32, #tpu.memory_space<vmem>>, vector<1x1x4x8xf32>
    %5 = vector.shape_cast %4 : vector<1x1x4x8xf32> to vector<4x8xf32>
    %cst_7 = arith.constant dense<0.000000e+00> : vector<256x8xf32>
    %6 = tpu.matmul %3, %5, %cst_7 {dimension_numbers = #tpu.dot_dimension_numbers<[1], [0], [0], [1], [0, 0, 1, 1], [], []>} : vector<256x4xf32>, vector<4x8xf32>, vector<256x8xf32> -> vector<256x8xf32>
    %7 = arith.addf %0, %6 : vector<256x8xf32>
    %c0_8 = arith.constant 0 : index
    %c0_9 = arith.constant 0 : index
    %c1 = arith.constant 1 : index
    %c0_10 = arith.constant 0 : index
    %8 = vector.load %arg1[%c0_8, %c0_9, %c1, %c0_10] : memref<1x18x18x4xf32, #tpu.memory_space<vmem>>, vector<1x16x16x4xf32>
    %9 = vector.shape_cast %8 : vector<1x16x16x4xf32> to vector<16x16x4xf32>
    %10 = vector.shape_cast %9 : vector<16x16x4xf32> to vector<256x4xf32>
    %c0_11 = arith.constant 0 : index
    %c1_12 = arith.constant 1 : index
    %c0_13 = arith.constant 0 : index
    %c0_14 = arith.constant 0 : index
    %11 = vector.load %arg2[%c0_11, %c1_12, %c0_13, %c0_14] : memref<3x3x4x8xf32, #tpu.memory_space<vmem>>, vector<1x1x4x8xf32>
    %12 = vector.shape_cast %11 : vector<1x1x4x8xf32> to vector<4x8xf32>
    %cst_15 = arith.constant dense<0.000000e+00> : vector<256x8xf32>
    %13 = tpu.matmul %10, %12, %cst_15 {dimension_numbers = #tpu.dot_dimension_numbers<[1], [0], [0], [1], [0, 0, 1, 1], [], []>} : vector<256x4xf32>, vector<4x8xf32>, vector<256x8xf32> -> vector<256x8xf32>
    %14 = arith.addf %7, %13 : vector<256x8xf32>
    %c0_16 = arith.constant 0 : index
    %c0_17 = arith.constant 0 : index
    %c2 = arith.constant 2 : index
    %c0_18 = arith.constant 0 : index
    %15 = vector.load %arg1[%c0_16, %c0_17, %c2, %c0_18] : memref<1x18x18x4xf32, #tpu.memory_space<vmem>>, vector<1x16x16x4xf32>
    %16 = vector.shape_cast %15 : vector<1x16x16x4xf32> to vector<16x16x4xf32>
    %17 = vector.shape_cast %16 : vector<16x16x4xf32> to vector<256x4xf32>
    %c0_19 = arith.constant 0 : index
    %c2_20 = arith.constant 2 : index
    %c0_21 = arith.constant 0 : index
    %c0_22 = arith.constant 0 : index
    %18 = vector.load %arg2[%c0_19, %c2_20, %c0_21, %c0_22] : memref<3x3x4x8xf32, #tpu.memory_space<vmem>>, vector<1x1x4x8xf32>
    %19 = vector.shape_cast %18 : vector<1x1x4x8xf32> to vector<4x8xf32>
    %cst_23 = arith.constant dense<0.000000e+00> : vector<256x8xf32>
    %20 = tpu.matmul %17, %19, %cst_23 {dimension_numbers = #tpu.dot_dimension_numbers<[1], [0], [0], [1], [0, 0, 1, 1], [], []>} : vector<256x4xf32>, vector<4x8xf32>, vector<256x8xf32> -> vector<256x8xf32>
    %21 = arith.addf %14, %20 : vector<256x8xf32>
    %c0_24 = arith.constant 0 : index
    %c1_25 = arith.constant 1 : index
    %c0_26 = arith.constant 0 : index
    %c0_27 = arith.constant 0 : index
    %22 = vector.load %arg1[%c0_24, %c1_25, %c0_26, %c0_27] : memref<1x18x18x4xf32, #tpu.memory_space<vmem>>, vector<1x16x16x4xf32>
    %23 = vector.shape_cast %22 : vector<1x16x16x4xf32> to vector<16x16x4xf32>
    %24 = vector.shape_cast %23 : vector<16x16x4xf32> to vector<256x4xf32>
    %c1_28 = arith.constant 1 : index
    %c0_29 = arith.constant 0 : index
    %c0_30 = arith.constant 0 : index
    %c0_31 = arith.constant 0 : index
    %25 = vector.load %arg2[%c1_28, %c0_29, %c0_30, %c0_31] : memref<3x3x4x8xf32, #tpu.memory_space<vmem>>, vector<1x1x4x8xf32>
    %26 = vector.shape_cast %25 : vector<1x1x4x8xf32> to vector<4x8xf32>
    %cst_32 = arith.constant dense<0.000000e+00> : vector<256x8xf32>
    %27 = tpu.matmul %24, %26, %cst_32 {dimension_numbers = #tpu.dot_dimension_numbers<[1], [0], [0], [1], [0, 0, 1, 1], [], []>} : vector<256x4xf32>, vector<4x8xf32>, vector<256x8xf32> -> vector<256x8xf32>
    %28 = arith.addf %21, %27 : vector<256x8xf32>
    %c0_33 = arith.constant 0 : index
    %c1_34 = arith.constant 1 : index
    %c1_35 = arith.constant 1 : index
    %c0_36 = arith.constant 0 : index
    %29 = vector.load %arg1[%c0_33, %c1_34, %c1_35, %c0_36] : memref<1x18x18x4xf32, #tpu.memory_space<vmem>>, vector<1x16x16x4xf32>
    %30 = vector.shape_cast %29 : vector<1x16x16x4xf32> to vector<16x16x4xf32>
    %31 = vector.shape_cast %30 : vector<16x16x4xf32> to vector<256x4xf32>
    %c1_37 = arith.constant 1 : index
    %c1_38 = arith.constant 1 : index
    %c0_39 = arith.constant 0 : index
    %c0_40 = arith.constant 0 : index
    %32 = vector.load %arg2[%c1_37, %c1_38, %c0_39, %c0_40] : memref<3x3x4x8xf32, #tpu.memory_space<vmem>>, vector<1x1x4x8xf32>
    %33 = vector.shape_cast %32 : vector<1x1x4x8xf32> to vector<4x8xf32>
    %cst_41 = arith.constant dense<0.000000e+00> : vector<256x8xf32>
    %34 = tpu.matmul %31, %33, %cst_41 {dimension_numbers = #tpu.dot_dimension_numbers<[1], [0], [0], [1], [0, 0, 1, 1], [], []>} : vector<256x4xf32>, vector<4x8xf32>, vector<256x8xf32> -> vector<256x8xf32>
    %35 = arith.addf %28, %34 : vector<256x8xf32>
    %c0_42 = arith.constant 0 : index
    %c1_43 = arith.constant 1 : index
    %c2_44 = arith.constant 2 : index
    %c0_45 = arith.constant 0 : index
    %36 = vector.load %arg1[%c0_42, %c1_43, %c2_44, %c0_45] : memref<1x18x18x4xf32, #tpu.memory_space<vmem>>, vector<1x16x16x4xf32>
    %37 = vector.shape_cast %36 : vector<1x16x16x4xf32> to vector<16x16x4xf32>
    %38 = vector.shape_cast %37 : vector<16x16x4xf32> to vector<256x4xf32>
    %c1_46 = arith.constant 1 : index
    %c2_47 = arith.constant 2 : index
    %c0_48 = arith.constant 0 : index
    %c0_49 = arith.constant 0 : index
    %39 = vector.load %arg2[%c1_46, %c2_47, %c0_48, %c0_49] : memref<3x3x4x8xf32, #tpu.memory_space<vmem>>, vector<1x1x4x8xf32>
    %40 = vector.shape_cast %39 : vector<1x1x4x8xf32> to vector<4x8xf32>
    %cst_50 = arith.constant dense<0.000000e+00> : vector<256x8xf32>
    %41 = tpu.matmul %38, %40, %cst_50 {dimension_numbers = #tpu.dot_dimension_numbers<[1], [0], [0], [1], [0, 0, 1, 1], [], []>} : vector<256x4xf32>, vector<4x8xf32>, vector<256x8xf32> -> vector<256x8xf32>
    %42 = arith.addf %35, %41 : vector<256x8xf32>
    %c0_51 = arith.constant 0 : index
    %c2_52 = arith.constant 2 : index
    %c0_53 = arith.constant 0 : index
    %c0_54 = arith.constant 0 : index
    %43 = vector.load %arg1[%c0_51, %c2_52, %c0_53, %c0_54] : memref<1x18x18x4xf32, #tpu.memory_space<vmem>>, vector<1x16x16x4xf32>
    %44 = vector.shape_cast %43 : vector<1x16x16x4xf32> to vector<16x16x4xf32>
    %45 = vector.shape_cast %44 : vector<16x16x4xf32> to vector<256x4xf32>
    %c2_55 = arith.constant 2 : index
    %c0_56 = arith.constant 0 : index
    %c0_57 = arith.constant 0 : index
    %c0_58 = arith.constant 0 : index
    %46 = vector.load %arg2[%c2_55, %c0_56, %c0_57, %c0_58] : memref<3x3x4x8xf32, #tpu.memory_space<vmem>>, vector<1x1x4x8xf32>
    %47 = vector.shape_cast %46 : vector<1x1x4x8xf32> to vector<4x8xf32>
    %cst_59 = arith.constant dense<0.000000e+00> : vector<256x8xf32>
    %48 = tpu.matmul %45, %47, %cst_59 {dimension_numbers = #tpu.dot_dimension_numbers<[1], [0], [0], [1], [0, 0, 1, 1], [], []>} : vector<256x4xf32>, vector<4x8xf32>, vector<256x8xf32> -> vector<256x8xf32>
    %49 = arith.addf %42, %48 : vector<256x8xf32>
    %c0_60 = arith.constant 0 : index
    %c2_61 = arith.constant 2 : index
    %c1_62 = arith.constant 1 : index
    %c0_63 = arith.constant 0 : index
    %50 = vector.load %arg1[%c0_60, %c2_61, %c1_62, %c0_63] : memref<1x18x18x4xf32, #tpu.memory_space<vmem>>, vector<1x16x16x4xf32>
    %51 = vector.shape_cast %50 : vector<1x16x16x4xf32> to vector<16x16x4xf32>
    %52 = vector.shape_cast %51 : vector<16x16x4xf32> to vector<256x4xf32>
    %c2_64 = arith.constant 2 : index
    %c1_65 = arith.constant 1 : index
    %c0_66 = arith.constant 0 : index
    %c0_67 = arith.constant 0 : index
    %53 = vector.load %arg2[%c2_64, %c1_65, %c0_66, %c0_67] : memref<3x3x4x8xf32, #tpu.memory_space<vmem>>, vector<1x1x4x8xf32>
    %54 = vector.shape_cast %53 : vector<1x1x4x8xf32> to vector<4x8xf32>
    %cst_68 = arith.constant dense<0.000000e+00> : vector<256x8xf32>
    %55 = tpu.matmul %52, %54, %cst_68 {dimension_numbers = #tpu.dot_dimension_numbers<[1], [0], [0], [1], [0, 0, 1, 1], [], []>} : vector<256x4xf32>, vector<4x8xf32>, vector<256x8xf32> -> vector<256x8xf32>
    %56 = arith.addf %49, %55 : vector<256x8xf32>
    %c0_69 = arith.constant 0 : index
    %c2_70 = arith.constant 2 : index
    %c2_71 = arith.constant 2 : index
    %c0_72 = arith.constant 0 : index
    %57 = vector.load %arg1[%c0_69, %c2_70, %c2_71, %c0_72] : memref<1x18x18x4xf32, #tpu.memory_space<vmem>>, vector<1x16x16x4xf32>
    %58 = vector.shape_cast %57 : vector<1x16x16x4xf32> to vector<16x16x4xf32>
    %59 = vector.shape_cast %58 : vector<16x16x4xf32> to vector<256x4xf32>
    %c2_73 = arith.constant 2 : index
    %c2_74 = arith.constant 2 : index
    %c0_75 = arith.constant 0 : index
    %c0_76 = arith.constant 0 : index
    %60 = vector.load %arg2[%c2_73, %c2_74, %c0_75, %c0_76] : memref<3x3x4x8xf32, #tpu.memory_space<vmem>>, vector<1x1x4x8xf32>
    %61 = vector.shape_cast %60 : vector<1x1x4x8xf32> to vector<4x8xf32>
    %cst_77 = arith.constant dense<0.000000e+00> : vector<256x8xf32>
    %62 = tpu.matmul %59, %61, %cst_77 {dimension_numbers = #tpu.dot_dimension_numbers<[1], [0], [0], [1], [0, 0, 1, 1], [], []>} : vector<256x4xf32>, vector<4x8xf32>, vector<256x8xf32> -> vector<256x8xf32>
    %63 = arith.addf %56, %62 : vector<256x8xf32>
    %c0_78 = arith.constant 0 : index
    %c0_79 = arith.constant 0 : index
    %64 = vector.load %arg3[%c0_78, %c0_79] : memref<1x8xf32, #tpu.memory_space<vmem>>, vector<1x8xf32>
    %65 = vector.broadcast %64 : vector<1x8xf32> to vector<256x8xf32>
    %66 = arith.addf %63, %65 : vector<256x8xf32>
    %cst_80 = arith.constant 5.000000e-01 : f32
    %67 = vector.broadcast %cst_80 : f32 to vector<256x8xf32>
    %68 = arith.mulf %67, %66 : vector<256x8xf32>
    %cst_81 = arith.constant 4.471500e-02 : f32
    %69 = vector.broadcast %cst_81 : f32 to vector<256x8xf32>
    %70 = arith.mulf %69, %66 : vector<256x8xf32>
    %71 = arith.mulf %70, %66 : vector<256x8xf32>
    %72 = arith.mulf %71, %66 : vector<256x8xf32>
    %73 = arith.addf %66, %72 : vector<256x8xf32>
    %cst_82 = arith.constant 0.797884583 : f32
    %74 = vector.broadcast %cst_82 : f32 to vector<256x8xf32>
    %75 = arith.mulf %74, %73 : vector<256x8xf32>
    %76 = math.tanh %75 : vector<256x8xf32>
    %cst_83 = arith.constant 1.000000e+00 : f32
    %77 = vector.broadcast %cst_83 : f32 to vector<256x8xf32>
    %78 = arith.addf %77, %76 : vector<256x8xf32>
    %79 = arith.mulf %68, %78 : vector<256x8xf32>
    %c0_84 = arith.constant 0 : index
    %c0_85 = arith.constant 0 : index
    %80 = vector.load %arg4[%c0_84, %c0_85] : memref<1x8xf32, #tpu.memory_space<vmem>>, vector<1x8xf32>
    %81 = vector.broadcast %80 : vector<1x8xf32> to vector<256x8xf32>
    %82 = arith.mulf %79, %81 : vector<256x8xf32>
    %c0_86 = arith.constant 0 : index
    %c0_87 = arith.constant 0 : index
    %83 = vector.load %arg5[%c0_86, %c0_87] : memref<1x8xf32, #tpu.memory_space<vmem>>, vector<1x8xf32>
    %84 = vector.broadcast %83 : vector<1x8xf32> to vector<256x8xf32>
    %85 = arith.addf %82, %84 : vector<256x8xf32>
    %cst_88 = arith.constant 0.000000e+00 : f32
    %86 = vector.broadcast %cst_88 : f32 to vector<18x18x8xf32>
    %c0_89 = arith.constant 0 : index
    %c0_90 = arith.constant 0 : index
    %c0_91 = arith.constant 0 : index
    %87 = vector.load %arg11[%c0_89, %c0_90, %c0_91] : memref<18x18x8xf32, #tpu.memory_space<vmem>>, vector<18x18x8xf32>
    tpu.vector_store %arg11[%c0_89, %c0_90, %c0_91], %86 {strides = array<i32>} : memref<18x18x8xf32, #tpu.memory_space<vmem>>, vector<18x18x8xf32>,
    %88 = vector.shape_cast %85 : vector<256x8xf32> to vector<16x16x8xf32>
    %c1_92 = arith.constant 1 : index
    %c1_93 = arith.constant 1 : index
    %c0_94 = arith.constant 0 : index
    %89 = vector.load %arg11[%c1_92, %c1_93, %c0_94] : memref<18x18x8xf32, #tpu.memory_space<vmem>>, vector<16x16x8xf32>
    tpu.vector_store %arg11[%c1_92, %c1_93, %c0_94], %88 {strides = array<i32>} : memref<18x18x8xf32, #tpu.memory_space<vmem>>, vector<16x16x8xf32>,
    %cst_95 = arith.constant 0.000000e+00 : f32
    %90 = vector.broadcast %cst_95 : f32 to vector<256x8xf32>
    %c0_96 = arith.constant 0 : index
    %c0_97 = arith.constant 0 : index
    %c0_98 = arith.constant 0 : index
    %91 = vector.load %arg11[%c0_96, %c0_97, %c0_98] : memref<18x18x8xf32, #tpu.memory_space<vmem>>, vector<16x16x8xf32>
    %92 = vector.shape_cast %91 : vector<16x16x8xf32> to vector<256x8xf32>
    %c0_99 = arith.constant 0 : index
    %c0_100 = arith.constant 0 : index
    %c0_101 = arith.constant 0 : index
    %c0_102 = arith.constant 0 : index
    %93 = vector.load %arg6[%c0_99, %c0_100, %c0_101, %c0_102] : memref<3x3x8x8xf32, #tpu.memory_space<vmem>>, vector<1x1x8x8xf32>
    %94 = vector.shape_cast %93 : vector<1x1x8x8xf32> to vector<8x8xf32>
    %cst_103 = arith.constant dense<0.000000e+00> : vector<256x8xf32>
    %95 = tpu.matmul %92, %94, %cst_103 {dimension_numbers = #tpu.dot_dimension_numbers<[1], [0], [0], [1], [0, 0, 1, 1], [], []>} : vector<256x8xf32>, vector<8x8xf32>, vector<256x8xf32> -> vector<256x8xf32>
    %96 = arith.addf %90, %95 : vector<256x8xf32>
    %c0_104 = arith.constant 0 : index
    %c1_105 = arith.constant 1 : index
    %c0_106 = arith.constant 0 : index
    %97 = vector.load %arg11[%c0_104, %c1_105, %c0_106] : memref<18x18x8xf32, #tpu.memory_space<vmem>>, vector<16x16x8xf32>
    %98 = vector.shape_cast %97 : vector<16x16x8xf32> to vector<256x8xf32>
    %c0_107 = arith.constant 0 : index
    %c1_108 = arith.constant 1 : index
    %c0_109 = arith.constant 0 : index
    %c0_110 = arith.constant 0 : index
    %99 = vector.load %arg6[%c0_107, %c1_108, %c0_109, %c0_110] : memref<3x3x8x8xf32, #tpu.memory_space<vmem>>, vector<1x1x8x8xf32>
    %100 = vector.shape_cast %99 : vector<1x1x8x8xf32> to vector<8x8xf32>
    %cst_111 = arith.constant dense<0.000000e+00> : vector<256x8xf32>
    %101 = tpu.matmul %98, %100, %cst_111 {dimension_numbers = #tpu.dot_dimension_numbers<[1], [0], [0], [1], [0, 0, 1, 1], [], []>} : vector<256x8xf32>, vector<8x8xf32>, vector<256x8xf32> -> vector<256x8xf32>
    %102 = arith.addf %96, %101 : vector<256x8xf32>
    %c0_112 = arith.constant 0 : index
    %c2_113 = arith.constant 2 : index
    %c0_114 = arith.constant 0 : index
    %103 = vector.load %arg11[%c0_112, %c2_113, %c0_114] : memref<18x18x8xf32, #tpu.memory_space<vmem>>, vector<16x16x8xf32>
    %104 = vector.shape_cast %103 : vector<16x16x8xf32> to vector<256x8xf32>
    %c0_115 = arith.constant 0 : index
    %c2_116 = arith.constant 2 : index
    %c0_117 = arith.constant 0 : index
    %c0_118 = arith.constant 0 : index
    %105 = vector.load %arg6[%c0_115, %c2_116, %c0_117, %c0_118] : memref<3x3x8x8xf32, #tpu.memory_space<vmem>>, vector<1x1x8x8xf32>
    %106 = vector.shape_cast %105 : vector<1x1x8x8xf32> to vector<8x8xf32>
    %cst_119 = arith.constant dense<0.000000e+00> : vector<256x8xf32>
    %107 = tpu.matmul %104, %106, %cst_119 {dimension_numbers = #tpu.dot_dimension_numbers<[1], [0], [0], [1], [0, 0, 1, 1], [], []>} : vector<256x8xf32>, vector<8x8xf32>, vector<256x8xf32> -> vector<256x8xf32>
    %108 = arith.addf %102, %107 : vector<256x8xf32>
    %c1_120 = arith.constant 1 : index
    %c0_121 = arith.constant 0 : index
    %c0_122 = arith.constant 0 : index
    %109 = vector.load %arg11[%c1_120, %c0_121, %c0_122] : memref<18x18x8xf32, #tpu.memory_space<vmem>>, vector<16x16x8xf32>
    %110 = vector.shape_cast %109 : vector<16x16x8xf32> to vector<256x8xf32>
    %c1_123 = arith.constant 1 : index
    %c0_124 = arith.constant 0 : index
    %c0_125 = arith.constant 0 : index
    %c0_126 = arith.constant 0 : index
    %111 = vector.load %arg6[%c1_123, %c0_124, %c0_125, %c0_126] : memref<3x3x8x8xf32, #tpu.memory_space<vmem>>, vector<1x1x8x8xf32>
    %112 = vector.shape_cast %111 : vector<1x1x8x8xf32> to vector<8x8xf32>
    %cst_127 = arith.constant dense<0.000000e+00> : vector<256x8xf32>
    %113 = tpu.matmul %110, %112, %cst_127 {dimension_numbers = #tpu.dot_dimension_numbers<[1], [0], [0], [1], [0, 0, 1, 1], [], []>} : vector<256x8xf32>, vector<8x8xf32>, vector<256x8xf32> -> vector<256x8xf32>
    %114 = arith.addf %108, %113 : vector<256x8xf32>
    %c1_128 = arith.constant 1 : index
    %c1_129 = arith.constant 1 : index
    %c0_130 = arith.constant 0 : index
    %115 = vector.load %arg11[%c1_128, %c1_129, %c0_130] : memref<18x18x8xf32, #tpu.memory_space<vmem>>, vector<16x16x8xf32>
    %116 = vector.shape_cast %115 : vector<16x16x8xf32> to vector<256x8xf32>
    %c1_131 = arith.constant 1 : index
    %c1_132 = arith.constant 1 : index
    %c0_133 = arith.constant 0 : index
    %c0_134 = arith.constant 0 : index
    %117 = vector.load %arg6[%c1_131, %c1_132, %c0_133, %c0_134] : memref<3x3x8x8xf32, #tpu.memory_space<vmem>>, vector<1x1x8x8xf32>
    %118 = vector.shape_cast %117 : vector<1x1x8x8xf32> to vector<8x8xf32>
    %cst_135 = arith.constant dense<0.000000e+00> : vector<256x8xf32>
    %119 = tpu.matmul %116, %118, %cst_135 {dimension_numbers = #tpu.dot_dimension_numbers<[1], [0], [0], [1], [0, 0, 1, 1], [], []>} : vector<256x8xf32>, vector<8x8xf32>, vector<256x8xf32> -> vector<256x8xf32>
    %120 = arith.addf %114, %119 : vector<256x8xf32>
    %c1_136 = arith.constant 1 : index
    %c2_137 = arith.constant 2 : index
    %c0_138 = arith.constant 0 : index
    %121 = vector.load %arg11[%c1_136, %c2_137, %c0_138] : memref<18x18x8xf32, #tpu.memory_space<vmem>>, vector<16x16x8xf32>
    %122 = vector.shape_cast %121 : vector<16x16x8xf32> to vector<256x8xf32>
    %c1_139 = arith.constant 1 : index
    %c2_140 = arith.constant 2 : index
    %c0_141 = arith.constant 0 : index
    %c0_142 = arith.constant 0 : index
    %123 = vector.load %arg6[%c1_139, %c2_140, %c0_141, %c0_142] : memref<3x3x8x8xf32, #tpu.memory_space<vmem>>, vector<1x1x8x8xf32>
    %124 = vector.shape_cast %123 : vector<1x1x8x8xf32> to vector<8x8xf32>
    %cst_143 = arith.constant dense<0.000000e+00> : vector<256x8xf32>
    %125 = tpu.matmul %122, %124, %cst_143 {dimension_numbers = #tpu.dot_dimension_numbers<[1], [0], [0], [1], [0, 0, 1, 1], [], []>} : vector<256x8xf32>, vector<8x8xf32>, vector<256x8xf32> -> vector<256x8xf32>
    %126 = arith.addf %120, %125 : vector<256x8xf32>
    %c2_144 = arith.constant 2 : index
    %c0_145 = arith.constant 0 : index
    %c0_146 = arith.constant 0 : index
    %127 = vector.load %arg11[%c2_144, %c0_145, %c0_146] : memref<18x18x8xf32, #tpu.memory_space<vmem>>, vector<16x16x8xf32>
    %128 = vector.shape_cast %127 : vector<16x16x8xf32> to vector<256x8xf32>
    %c2_147 = arith.constant 2 : index
    %c0_148 = arith.constant 0 : index
    %c0_149 = arith.constant 0 : index
    %c0_150 = arith.constant 0 : index
    %129 = vector.load %arg6[%c2_147, %c0_148, %c0_149, %c0_150] : memref<3x3x8x8xf32, #tpu.memory_space<vmem>>, vector<1x1x8x8xf32>
    %130 = vector.shape_cast %129 : vector<1x1x8x8xf32> to vector<8x8xf32>
    %cst_151 = arith.constant dense<0.000000e+00> : vector<256x8xf32>
    %131 = tpu.matmul %128, %130, %cst_151 {dimension_numbers = #tpu.dot_dimension_numbers<[1], [0], [0], [1], [0, 0, 1, 1], [], []>} : vector<256x8xf32>, vector<8x8xf32>, vector<256x8xf32> -> vector<256x8xf32>
    %132 = arith.addf %126, %131 : vector<256x8xf32>
    %c2_152 = arith.constant 2 : index
    %c1_153 = arith.constant 1 : index
    %c0_154 = arith.constant 0 : index
    %133 = vector.load %arg11[%c2_152, %c1_153, %c0_154] : memref<18x18x8xf32, #tpu.memory_space<vmem>>, vector<16x16x8xf32>
    %134 = vector.shape_cast %133 : vector<16x16x8xf32> to vector<256x8xf32>
    %c2_155 = arith.constant 2 : index
    %c1_156 = arith.constant 1 : index
    %c0_157 = arith.constant 0 : index
    %c0_158 = arith.constant 0 : index
    %135 = vector.load %arg6[%c2_155, %c1_156, %c0_157, %c0_158] : memref<3x3x8x8xf32, #tpu.memory_space<vmem>>, vector<1x1x8x8xf32>
    %136 = vector.shape_cast %135 : vector<1x1x8x8xf32> to vector<8x8xf32>
    %cst_159 = arith.constant dense<0.000000e+00> : vector<256x8xf32>
    %137 = tpu.matmul %134, %136, %cst_159 {dimension_numbers = #tpu.dot_dimension_numbers<[1], [0], [0], [1], [0, 0, 1, 1], [], []>} : vector<256x8xf32>, vector<8x8xf32>, vector<256x8xf32> -> vector<256x8xf32>
    %138 = arith.addf %132, %137 : vector<256x8xf32>
    %c2_160 = arith.constant 2 : index
    %c2_161 = arith.constant 2 : index
    %c0_162 = arith.constant 0 : index
    %139 = vector.load %arg11[%c2_160, %c2_161, %c0_162] : memref<18x18x8xf32, #tpu.memory_space<vmem>>, vector<16x16x8xf32>
    %140 = vector.shape_cast %139 : vector<16x16x8xf32> to vector<256x8xf32>
    %c2_163 = arith.constant 2 : index
    %c2_164 = arith.constant 2 : index
    %c0_165 = arith.constant 0 : index
    %c0_166 = arith.constant 0 : index
    %141 = vector.load %arg6[%c2_163, %c2_164, %c0_165, %c0_166] : memref<3x3x8x8xf32, #tpu.memory_space<vmem>>, vector<1x1x8x8xf32>
    %142 = vector.shape_cast %141 : vector<1x1x8x8xf32> to vector<8x8xf32>
    %cst_167 = arith.constant dense<0.000000e+00> : vector<256x8xf32>
    %143 = tpu.matmul %140, %142, %cst_167 {dimension_numbers = #tpu.dot_dimension_numbers<[1], [0], [0], [1], [0, 0, 1, 1], [], []>} : vector<256x8xf32>, vector<8x8xf32>, vector<256x8xf32> -> vector<256x8xf32>
    %144 = arith.addf %138, %143 : vector<256x8xf32>
    %c0_168 = arith.constant 0 : index
    %c0_169 = arith.constant 0 : index
    %145 = vector.load %arg7[%c0_168, %c0_169] : memref<1x8xf32, #tpu.memory_space<vmem>>, vector<1x8xf32>
    %146 = vector.broadcast %145 : vector<1x8xf32> to vector<256x8xf32>
    %147 = arith.addf %144, %146 : vector<256x8xf32>
    %cst_170 = arith.constant 5.000000e-01 : f32
    %148 = vector.broadcast %cst_170 : f32 to vector<256x8xf32>
    %149 = arith.mulf %148, %147 : vector<256x8xf32>
    %cst_171 = arith.constant 4.471500e-02 : f32
    %150 = vector.broadcast %cst_171 : f32 to vector<256x8xf32>
    %151 = arith.mulf %150, %147 : vector<256x8xf32>
    %152 = arith.mulf %151, %147 : vector<256x8xf32>
    %153 = arith.mulf %152, %147 : vector<256x8xf32>
    %154 = arith.addf %147, %153 : vector<256x8xf32>
    %cst_172 = arith.constant 0.797884583 : f32
    %155 = vector.broadcast %cst_172 : f32 to vector<256x8xf32>
    %156 = arith.mulf %155, %154 : vector<256x8xf32>
    %157 = math.tanh %156 : vector<256x8xf32>
    %cst_173 = arith.constant 1.000000e+00 : f32
    %158 = vector.broadcast %cst_173 : f32 to vector<256x8xf32>
    %159 = arith.addf %158, %157 : vector<256x8xf32>
    %160 = arith.mulf %149, %159 : vector<256x8xf32>
    %c0_174 = arith.constant 0 : index
    %c0_175 = arith.constant 0 : index
    %161 = vector.load %arg8[%c0_174, %c0_175] : memref<1x8xf32, #tpu.memory_space<vmem>>, vector<1x8xf32>
    %162 = vector.broadcast %161 : vector<1x8xf32> to vector<256x8xf32>
    %163 = arith.mulf %160, %162 : vector<256x8xf32>
    %c0_176 = arith.constant 0 : index
    %c0_177 = arith.constant 0 : index
    %164 = vector.load %arg9[%c0_176, %c0_177] : memref<1x8xf32, #tpu.memory_space<vmem>>, vector<1x8xf32>
    %165 = vector.broadcast %164 : vector<1x8xf32> to vector<256x8xf32>
    %166 = arith.addf %163, %165 : vector<256x8xf32>
    %167 = vector.shape_cast %166 : vector<256x8xf32> to vector<16x16x8xf32>
    %c0_178 = arith.constant 0 : index
    %c0_179 = arith.constant 0 : index
    %c0_180 = arith.constant 0 : index
    %c0_181 = arith.constant 0 : index
    %168 = vector.load %arg10[%c0_178, %c0_179, %c0_180, %c0_181] : memref<1x16x16x8xf32, #tpu.memory_space<vmem>>, vector<1x16x16x8xf32>
    %169 = vector.shape_cast %168 : vector<1x16x16x8xf32> to vector<16x16x8xf32>
    %170 = vector.shape_cast %167 : vector<16x16x8xf32> to vector<1x16x16x8xf32>
    tpu.vector_store %arg10[%c0_178, %c0_179, %c0_180, %c0_181], %170 {strides = array<i32>} : memref<1x16x16x8xf32, #tpu.memory_space<vmem>>, vector<1x16x16x8xf32>,
    return
  }
  func.func @transform_0(%arg0: i32) -> (i32, i32, i32, i32) {
    %c0_i32 = arith.constant 0 : i32
    %c0_i32_0 = arith.constant 0 : i32
    %c0_i32_1 = arith.constant 0 : i32
    %c0_i32_2 = arith.constant 0 : i32
    return %arg0, %c0_i32, %c0_i32_0, %c0_i32_1 : i32, i32, i32, i32
  }
  func.func @transform_1(%arg0: i32) -> (i32, i32, i32, i32) {
    %c0_i32 = arith.constant 0 : i32
    %c0_i32_0 = arith.constant 0 : i32
    %c0_i32_1 = arith.constant 0 : i32
    %c0_i32_2 = arith.constant 0 : i32
    %c0_i32_3 = arith.constant 0 : i32
    return %c0_i32, %c0_i32_0, %c0_i32_1, %c0_i32_2 : i32, i32, i32, i32
  }
  func.func @transform_2(%arg0: i32) -> (i32, i32) {
    %c0_i32 = arith.constant 0 : i32
    %c0_i32_0 = arith.constant 0 : i32
    %c0_i32_1 = arith.constant 0 : i32
    return %c0_i32, %c0_i32_0 : i32, i32
  }
  func.func @transform_3(%arg0: i32) -> (i32, i32) {
    %c0_i32 = arith.constant 0 : i32
    %c0_i32_0 = arith.constant 0 : i32
    %c0_i32_1 = arith.constant 0 : i32
    return %c0_i32, %c0_i32_0 : i32, i32
  }
  func.func @transform_4(%arg0: i32) -> (i32, i32) {
    %c0_i32 = arith.constant 0 : i32
    %c0_i32_0 = arith.constant 0 : i32
    %c0_i32_1 = arith.constant 0 : i32
    return %c0_i32, %c0_i32_0 : i32, i32
  }
  func.func @transform_5(%arg0: i32) -> (i32, i32, i32, i32) {
    %c0_i32 = arith.constant 0 : i32
    %c0_i32_0 = arith.constant 0 : i32
    %c0_i32_1 = arith.constant 0 : i32
    %c0_i32_2 = arith.constant 0 : i32
    %c0_i32_3 = arith.constant 0 : i32
    return %c0_i32, %c0_i32_0, %c0_i32_1, %c0_i32_2 : i32, i32, i32, i32
  }
  func.func @transform_6(%arg0: i32) -> (i32, i32) {
    %c0_i32 = arith.constant 0 : i32
    %c0_i32_0 = arith.constant 0 : i32
    %c0_i32_1 = arith.constant 0 : i32
    return %c0_i32, %c0_i32_0 : i32, i32
  }
  func.func @transform_7(%arg0: i32) -> (i32, i32) {
    %c0_i32 = arith.constant 0 : i32
    %c0_i32_0 = arith.constant 0 : i32
    %c0_i32_1 = arith.constant 0 : i32
    return %c0_i32, %c0_i32_0 : i32, i32
  }
  func.func @transform_8(%arg0: i32) -> (i32, i32) {
    %c0_i32 = arith.constant 0 : i32
    %c0_i32_0 = arith.constant 0 : i32
    %c0_i32_1 = arith.constant 0 : i32
    return %c0_i32, %c0_i32_0 : i32, i32
  }
  func.func @transform_9(%arg0: i32) -> (i32, i32, i32, i32) {
    %c0_i32 = arith.constant 0 : i32
    %c0_i32_0 = arith.constant 0 : i32
    %c0_i32_1 = arith.constant 0 : i32
    %c0_i32_2 = arith.constant 0 : i32
    return %arg0, %c0_i32, %c0_i32_0, %c0_i32_1 : i32, i32, i32, i32
  }
}

</mosaic_0001>

<bundles_post_ra>
// kernel: tpu_custom_call.1
= control target key start
LH: loop header
LB: loop body
LE: loop exit
PB: predicated region body
PF: predicated region fallthrough
CT: control target
= control target key end

     0   :  { %s7174_s30 = smov 0   ;;  %s10095_s0 = inlined_call_operand.vmem [shape: f32[2,18,18,4], index: 0, kind: input, shape index: {}]   ;;  %s10096_s1 = inlined_call_operand.vmem [shape: f32[3,3,4,8], index: 1, kind: input, shape index: {}]   ;;  %s10097_s2 = inlined_call_operand.vmem [shape: f32[1,8], index: 2, kind: input, shape index: {}]   ;;  %s10098_s3 = inlined_call_operand.vmem [shape: f32[1,8], index: 3, kind: input, shape index: {}]   ;;  %s10099_s4 = inlined_call_operand.vmem [shape: f32[1,8], index: 4, kind: input, shape index: {}]   ;;  %s10100_s5 = inlined_call_operand.vmem [shape: f32[3,3,8,8], index: 5, kind: input, shape index: {}]   ;;  %s10101_s6 = inlined_call_operand.vmem [shape: f32[1,8], index: 6, kind: input, shape index: {}]   ;;  %s10102_s7 = inlined_call_operand.vmem [shape: f32[1,8], index: 7, kind: input, shape index: {}]   ;;  %s10103_s8 = inlined_call_operand.vmem [shape: f32[1,8], index: 8, kind: input, shape index: {}]   ;;  %s10104_s9 = inlined_call_operand.vmem [shape: f32[2,16,16,8], index: 9, kind: output, shape index: {}]  }
   0x1 LB: > { %s6153_s10 = sadd.s32 4294967295, %s7121_s30   ;;  %p6157_p0 = scmp.ge.s32.totalorder %s7121_s30, 1  ;;  %s7121_s30 = sphi %s7174_s30, %s19_s30  }
   0x2   : > { %p287_p1 = scmp.lt.s32.totalorder %s7121_s30, 3 }
   0x4   : > { %p288_p2 = pnand %p6157_p0, %p287_p1 }
   0x6   : > { %291 = sbr.rel (%p288_p2) target bundleno = 1476 (0x5c4), region = 56 }
   0xb   : > { %v6161_v0 = vld [vmem:[%s10096_s1 + $0x4] sm:$0xf]  ;;  %vm497_vm0 = vcmask 1043456   ;;  %v365_v1 = vld [vmem:[%s10096_s1] sm:$0xf]  ;;  %p323_p3 = scmp.lt.s32.totalorder %s6153_s10, 1 }
   0xc   : > { %6162 = vmatpush.msk.msra.mxu0 %vm497_vm0, %v6161_v0  ;;  %6957 = vmatpush.msk.msra.mxu2 %vm497_vm0, %v6161_v0  ;;  %v6228_v2 = vld [vmem:[%s10096_s1 + $0x8] sm:$0xf]  ;;  %v6294_v3 = vld [vmem:[%s10096_s1 + $0xc] sm:$0xf]  ;;  %v6360_v4 = vld [vmem:[%s10096_s1 + $0x10] sm:$0xf] }
   0xd   : > { %6958 = vmatpush.msk.msra.mxu3 %vm497_vm0, %v365_v1  ;;  %s10347_s10 = smov (!%p323_p3, %s6153_s10), 1  ;;  %6195 = vmatpush.msk.msra.mxu1 %vm497_vm0, %v365_v1  ;;  %vm400_vm1 = vcmask 31744   ;;  %v6492_v57 = vld [vmem:[%s10096_s1 + $0x18] sm:$0xf]  ;;  %v6558_v58 = vld [vmem:[%s10096_s1 + $0x1c] sm:$0xf] }
   0xe   : > { %6229 = vmatpush.msk.msrb.mxu2 %vm497_vm0, %v6228_v2  ;;  %s6959_s21 = smul.u32 432, %s10347_s10  ;;  %6361 = vmatpush.msk.msrb.mxu0 %vm497_vm0, %v6360_v4  ;;  %v6624_v63 = vld [vmem:[%s10096_s1 + $0x20] sm:$0xf]  ;;  %v6426_v0 = vld [vmem:[%s10096_s1 + $0x14] sm:$0xf]  ;;  %vm3170_vm2 = vcmask 64512  }
   0xf   : > { %6295 = vmatpush.msk.msrb.mxu3 %vm497_vm0, %v6294_v3  ;;  %6427 = vmatpush.msk.msrb.mxu1 %vm497_vm0, %v6426_v0  ;;  %vm3173_vm3 = vcmask 58368   ;;  %s6956_s11 = sshll.u32 %s10347_s10, 8 }
  0x10   : > { %s7210_s24 = scalar_lea.vmem %s10095_s0, %s6959_s21  ;;  %s9743_s10 = scalar_lea.vmem %s10104_s9, %s6956_s11 }
  0x11   : > { %v366_v5 = vld [vmem:[%s7210_s24 + $0x1] sm:$0xff]  ;;  %v367_v9 = vld [vmem:[%s7210_s24 + $0x9] sm:$0xff]  ;;  %v7241_v13 = vld [vmem:[%s7210_s24 + $0x19] sm:$0xff] }
  0x12   : > { %v7214_v6 = vld [vmem:[%s7210_s24 + $0xc1] sm:$0xff]  ;;  %6163 = vmatmul.msk.f32.vlgmr.msra.gmra.mxu0 %vm400_vm1, %v366_v5  ;;  %v7228_v10 = vld [vmem:[%s7210_s24 + $0xc9] sm:$0xff]  ;;  %v7244_v14 = vld [vmem:[%s7210_s24 + $0xd9] sm:$0xff] }
  0x13   : > { %v7217_v7 = vld [vmem:[%s7210_s24 + $0xc0] sm:$0xff]  ;;  %6179 = vmatmul.msk.f32.vlgmr.msra.gmra.mxu2 %vm400_vm1, %v7214_v6  ;;  %v7231_v11 = vld [vmem:[%s7210_s24 + $0xc8] sm:$0xff]  ;;  %v7247_v15 = vld [vmem:[%s7210_s24 + $0xd8] sm:$0xff]  ;;  %6625 = vmatpush.msk.msra.mxu0 %vm497_vm0, %v6624_v63 }
  0x14   : > { %6212 = vmatmul.msk.f32.vlgmr.msra.gmra.mxu3 %vm400_vm1, %v7217_v7  ;;  %v333_v8 = vld [vmem:[%s7210_s24] sm:$0xff]  ;;  %v334_v12 = vld [vmem:[%s7210_s24 + $0x8] sm:$0xff]  ;;  %v7250_v16 = vld [vmem:[%s7210_s24 + $0x18] sm:$0xff]  ;;  %6493 = vmatpush.msk.msra.mxu2 %vm497_vm0, %v6492_v57 }
  0x15   : > { %6196 = vmatmul.msk.f32.vlgmr.msra.gmra.mxu1 %vm400_vm1, %v333_v8  ;;  %v7261_v17 = vld [vmem:[%s7210_s24 + $0x21] sm:$0xff]  ;;  %v7281_v21 = vld [vmem:[%s7210_s24 + $0x31] sm:$0xff]  ;;  %v7301_v25 = vld [vmem:[%s7210_s24 + $0x39] sm:$0xff]  ;;  %6559 = vmatpush.msk.msra.mxu3 %vm497_vm0, %v6558_v58 }
  0x16   : > { %v7264_v18 = vld [vmem:[%s7210_s24 + $0xe1] sm:$0xff]  ;;  %v7284_v22 = vld [vmem:[%s7210_s24 + $0xf1] sm:$0xff]  ;;  %v7304_v26 = vld [vmem:[%s7210_s24 + $0xf9] sm:$0xff] }
  0x17   : > { %v7267_v19 = vld [vmem:[%s7210_s24 + $0xe0] sm:$0xff]  ;;  %v7287_v23 = vld [vmem:[%s7210_s24 + $0xf0] sm:$0xff]  ;;  %v7307_v27 = vld [vmem:[%s7210_s24 + $0xf8] sm:$0xff] }
  0x18   : > { %v7270_v20 = vld [vmem:[%s7210_s24 + $0x20] sm:$0xff]  ;;  %v7290_v24 = vld [vmem:[%s7210_s24 + $0x30] sm:$0xff]  ;;  %v7310_v28 = vld [vmem:[%s7210_s24 + $0x38] sm:$0xff] }
  0x19   : > { %v7321_v29 = vld [vmem:[%s7210_s24 + $0x49] sm:$0xff]  ;;  %v7341_v33 = vld [vmem:[%s7210_s24 + $0x51] sm:$0xff]  ;;  %v7361_v37 = vld [vmem:[%s7210_s24 + $0x61] sm:$0xff] }
  0x1a   : > { %6164 = vmatmul.msk.f32.gmra.mxu0 %vm400_vm1, %v367_v9  ;;  %v7324_v30 = vld [vmem:[%s7210_s24 + $0x109] sm:$0xff]  ;;  %v7344_v34 = vld [vmem:[%s7210_s24 + $0x111] sm:$0xff]  ;;  %v7364_v38 = vld [vmem:[%s7210_s24 + $0x121] sm:$0xff] }
  0x1b   : > { %6180 = vmatmul.msk.f32.gmra.mxu2 %vm400_vm1, %v7228_v10  ;;  %v7327_v31 = vld [vmem:[%s7210_s24 + $0x108] sm:$0xff]  ;;  %v7347_v35 = vld [vmem:[%s7210_s24 + $0x110] sm:$0xff]  ;;  %v7367_v39 = vld [vmem:[%s7210_s24 + $0x120] sm:$0xff] }
  0x1c   : > { %6213 = vmatmul.msk.f32.gmra.mxu3 %vm400_vm1, %v7231_v11  ;;  %v7330_v32 = vld [vmem:[%s7210_s24 + $0x48] sm:$0xff]  ;;  %v7350_v36 = vld [vmem:[%s7210_s24 + $0x50] sm:$0xff]  ;;  %v7370_v40 = vld [vmem:[%s7210_s24 + $0x60] sm:$0xff] }
  0x1d   : > { %6197 = vmatmul.msk.f32.gmra.mxu1 %vm400_vm1, %v334_v12  ;;  %v7381_v41 = vld [vmem:[%s7210_s24 + $0x69] sm:$0xff]  ;;  %v7401_v45 = vld [vmem:[%s7210_s24 + $0x79] sm:$0xff]  ;;  %v7421_v49 = vld [vmem:[%s7210_s24 + $0x81] sm:$0xff] }
  0x1e   : > { %v7384_v42 = vld [vmem:[%s7210_s24 + $0x129] sm:$0xff]  ;;  %v7404_v46 = vld [vmem:[%s7210_s24 + $0x139] sm:$0xff]  ;;  %v7424_v50 = vld [vmem:[%s7210_s24 + $0x141] sm:$0xff] }
  0x1f   : > { %v7387_v43 = vld [vmem:[%s7210_s24 + $0x128] sm:$0xff]  ;;  %v7407_v47 = vld [vmem:[%s7210_s24 + $0x138] sm:$0xff]  ;;  %v7427_v51 = vld [vmem:[%s7210_s24 + $0x140] sm:$0xff] }
  0x20   : > { %v7390_v44 = vld [vmem:[%s7210_s24 + $0x68] sm:$0xff]  ;;  %v7410_v48 = vld [vmem:[%s7210_s24 + $0x78] sm:$0xff]  ;;  %v7430_v52 = vld [vmem:[%s7210_s24 + $0x80] sm:$0xff] }
  0x21   : > { %v7441_v53 = vld [vmem:[%s7210_s24 + $0x91] sm:$0xff]  ;;  %v7469_v59 = vld [vmem:[%s7210_s24 + $0x99] sm:$0xff]  ;;  %v7497_v1 = vld [vmem:[%s7210_s24 + $0xa9] sm:$0xff] }
  0x22   : > { %6165 = vmatmul.msk.f32.gmra.mxu0 %vm400_vm1, %v7241_v13  ;;  %v7444_v54 = vld [vmem:[%s7210_s24 + $0x151] sm:$0xff]  ;;  %v7472_v60 = vld [vmem:[%s7210_s24 + $0x159] sm:$0xff]  ;;  %v7500_v2 = vld [vmem:[%s7210_s24 + $0x169] sm:$0xff] }
  0x23   : > { %6181 = vmatmul.msk.f32.gmra.mxu2 %vm400_vm1, %v7244_v14  ;;  %v7447_v55 = vld [vmem:[%s7210_s24 + $0x150] sm:$0xff]  ;;  %10155 = vst [vmem:[#allocation4_spill] sm:$0xff] %v7472_v60  ;;  %v7475_v61 = vld [vmem:[%s7210_s24 + $0x158] sm:$0xff]  ;;  %v7503_v3 = vld [vmem:[%s7210_s24 + $0x168] sm:$0xff] }
  0x24   : > { %6214 = vmatmul.msk.f32.gmra.mxu3 %vm400_vm1, %v7247_v15  ;;  %10154 = vst [vmem:[#allocation3_spill] sm:$0xff] %v7447_v55  ;;  %v7450_v56 = vld [vmem:[%s7210_s24 + $0x90] sm:$0xff]  ;;  %v7478_v62 = vld [vmem:[%s7210_s24 + $0x98] sm:$0xff]  ;;  %v7506_v4 = vld [vmem:[%s7210_s24 + $0xa8] sm:$0xff] }
  0x25   : > { %6198 = vmatmul.msk.f32.gmra.mxu1 %vm400_vm1, %v7250_v16  ;;  %10156 = vst [vmem:[#allocation5_spill] sm:$0xff] %v7475_v61  ;;  %v7517_v5 = vld [vmem:[%s7210_s24 + $0xb1] sm:$0xff]  ;;  %v826_v58 = vld [vmem:[%s7210_s24 + $0x2] sm:$0xff]  ;;  %v6394_v0 = vld [vmem:[%s7210_s24 + $0x1a] sm:$0xff] }
  0x26   : > { %10157 = vst [vmem:[#allocation6_spill] sm:$0xff] %v7500_v2  ;;  %v7520_v8 = vld [vmem:[%s7210_s24 + $0x171] sm:$0xff] }
  0x27   : > { %10158 = vst [vmem:[#allocation7_spill] sm:$0xff] %v7503_v3  ;;  %v7523_v9 = vld [vmem:[%s7210_s24 + $0x170] sm:$0xff] }
  0x28   : > { %10159 = vst [vmem:[#allocation8_spill] sm:$0xff] %v7520_v8  ;;  %v7526_v12 = vld [vmem:[%s7210_s24 + $0xb0] sm:$0xff] }
  0x29   : > { %10160 = vst [vmem:[#allocation9_spill] sm:$0xff] %v7523_v9 }
  0x2a   : > { %6166 = vmatmul.msk.f32.gmra.mxu0 %vm400_vm1, %v7261_v17 }
  0x2b   : > { %6182 = vmatmul.msk.f32.gmra.mxu2 %vm400_vm1, %v7264_v18 }
  0x2c   : > { %6215 = vmatmul.msk.f32.gmra.mxu3 %vm400_vm1, %v7267_v19 }
  0x2d   : > { %6199 = vmatmul.msk.f32.gmra.mxu1 %vm400_vm1, %v7270_v20 }
  0x32   : > { %6167 = vmatmul.msk.f32.gmra.mxu0 %vm400_vm1, %v7281_v21 }
  0x33   : > { %6183 = vmatmul.msk.f32.gmra.mxu2 %vm400_vm1, %v7284_v22 }
  0x34   : > { %6216 = vmatmul.msk.f32.gmra.mxu3 %vm400_vm1, %v7287_v23 }
  0x35   : > { %6200 = vmatmul.msk.f32.gmra.mxu1 %vm400_vm1, %v7290_v24 }
  0x3a   : > { %6168 = vmatmul.msk.f32.gmra.mxu0 %vm400_vm1, %v7301_v25 }
  0x3b   : > { %6184 = vmatmul.msk.f32.gmra.mxu2 %vm400_vm1, %v7304_v26 }
  0x3c   : > { %6217 = vmatmul.msk.f32.gmra.mxu3 %vm400_vm1, %v7307_v27 }
  0x3d   : > { %6201 = vmatmul.msk.f32.gmra.mxu1 %vm400_vm1, %v7310_v28 }
  0x42   : > { %6169 = vmatmul.msk.f32.gmra.mxu0 %vm400_vm1, %v7321_v29 }
  0x43   : > { %6185 = vmatmul.msk.f32.gmra.mxu2 %vm400_vm1, %v7324_v30 }
  0x44   : > { %6218 = vmatmul.msk.f32.gmra.mxu3 %vm400_vm1, %v7327_v31 }
  0x45   : > { %6202 = vmatmul.msk.f32.gmra.mxu1 %vm400_vm1, %v7330_v32 }
  0x4a   : > { %6170 = vmatmul.msk.f32.gmra.mxu0 %vm400_vm1, %v7341_v33 }
  0x4b   : > { %6186 = vmatmul.msk.f32.gmra.mxu2 %vm400_vm1, %v7344_v34 }
  0x4c   : > { %6219 = vmatmul.msk.f32.gmra.mxu3 %vm400_vm1, %v7347_v35 }
  0x4d   : > { %6203 = vmatmul.msk.f32.gmra.mxu1 %vm400_vm1, %v7350_v36 }
  0x52   : > { %6171 = vmatmul.msk.f32.gmra.mxu0 %vm400_vm1, %v7361_v37 }
  0x53   : > { %6187 = vmatmul.msk.f32.gmra.mxu2 %vm400_vm1, %v7364_v38 }
  0x54   : > { %6220 = vmatmul.msk.f32.gmra.mxu3 %vm400_vm1, %v7367_v39 }
  0x55   : > { %6204 = vmatmul.msk.f32.gmra.mxu1 %vm400_vm1, %v7370_v40 }
  0x5a   : > { %6172 = vmatmul.msk.f32.gmra.mxu0 %vm400_vm1, %v7381_v41 }
  0x5b   : > { %6188 = vmatmul.msk.f32.gmra.mxu2 %vm400_vm1, %v7384_v42 }
  0x5c   : > { %6221 = vmatmul.msk.f32.gmra.mxu3 %vm400_vm1, %v7387_v43 }
  0x5d   : > { %6205 = vmatmul.msk.f32.gmra.mxu1 %vm400_vm1, %v7390_v44 }
  0x62   : > { %6173 = vmatmul.msk.f32.gmra.mxu0 %vm400_vm1, %v7401_v45 }
  0x63   : > { %6189 = vmatmul.msk.f32.gmra.mxu2 %vm400_vm1, %v7404_v46 }
  0x64   : > { %6222 = vmatmul.msk.f32.gmra.mxu3 %vm400_vm1, %v7407_v47 }
  0x65   : > { %6206 = vmatmul.msk.f32.gmra.mxu1 %vm400_vm1, %v7410_v48 }
  0x6a   : > { %6174 = vmatmul.msk.f32.gmra.mxu0 %vm400_vm1, %v7421_v49 }
  0x6b   : > { %6190 = vmatmul.msk.f32.gmra.mxu2 %vm400_vm1, %v7424_v50 }
  0x6c   : > { %6223 = vmatmul.msk.f32.gmra.mxu3 %vm400_vm1, %v7427_v51 }
  0x6d   : > { %6207 = vmatmul.msk.f32.gmra.mxu1 %vm400_vm1, %v7430_v52 }
  0x72   : > { %6175 = vmatmul.msk.f32.gmra.mxu0 %vm400_vm1, %v7441_v53 }
  0x73   : > { %6191 = vmatmul.msk.f32.gmra.mxu2 %vm400_vm1, %v7444_v54 }
  0x74   : > { %6224 = vmatmul.msk.f32.gmra.mxu3 %vm400_vm1, %v7447_v55  ;;  %v6395_v55 = vld [vmem:[%s7210_s24 + $0x22] sm:$0xff] }
  0x75   : > { %6208 = vmatmul.msk.f32.gmra.mxu1 %vm400_vm1, %v7450_v56 }
  0x7a   : > { %6176 = vmatmul.msk.f32.gmra.mxu0 %vm400_vm1, %v7469_v59 }
  0x7b   : > { %6192 = vmatmul.msk.f32.gmra.mxu2 %vm400_vm1, %v7472_v60 }
  0x7c   : > { %6225 = vmatmul.msk.f32.gmra.mxu3 %vm400_vm1, %v7475_v61  ;;  %v827_v61 = vld [vmem:[%s7210_s24 + $0xa] sm:$0xff] }
  0x7d   : > { %6209 = vmatmul.msk.f32.gmra.mxu1 %vm400_vm1, %v7478_v62 }
  0x82   : > { %6177 = vmatmul.msk.f32.gmra.mxu0 %vm400_vm1, %v7497_v1 }
  0x83   : > { %6193 = vmatmul.msk.f32.gmra.mxu2 %vm400_vm1, %v7500_v2 }
  0x84   : > { %6226 = vmatmul.msk.f32.gmra.mxu3 %vm400_vm1, %v7503_v3 }
  0x85   : > { %6210 = vmatmul.msk.f32.gmra.mxu1 %vm400_vm1, %v7506_v4 }
  0x8a   : > { %6178 = vmatmul.msk.f32.gmra.mxu0 %vm400_vm1, %v7517_v5 }
  0x8b   : > { %6194 = vmatmul.msk.f32.gmra.mxu2 %vm400_vm1, %v7520_v8 }
  0x8c   : > { %6227 = vmatmul.msk.f32.gmra.mxu3 %vm400_vm1, %v7523_v9 }
  0x8d   : > { %6211 = vmatmul.msk.f32.gmra.mxu1 %vm400_vm1, %v7526_v12 }
  0x8f   : > { %v7536_v57 = vpop.f32.mrf.mxu0 }
  0x92   : > { %v7539_v63 = vpop.f32.mrf.mxu1  ;;  %6362 = vmatmul.msk.f32.vlgmr.msrb.gmra.mxu0 %vm400_vm1, %v7241_v13 }
  0x93   : > { %6230 = vmatmul.msk.f32.vlgmr.msrb.gmra.mxu2 %vm400_vm1, %v826_v58 }
  0x94   : > { %6296 = vmatmul.msk.f32.vlgmr.msrb.gmra.mxu3 %vm400_vm1, %v7250_v16 }
  0x95   : > { %6428 = vmatmul.msk.f32.vlgmr.msrb.gmra.mxu1 %vm400_vm1, %v6394_v0 }
  0x96   : > { %v566_v9 = vpop.f32.mrf.mxu2 }
  0x97   : > { %v778_v8 = vpop.f32.mrf.mxu3  ;;  %v7550_v2 = vpop.f32.mrf.mxu0 }
  0x98   : > { %v7548_v3 = vadd.f32 %v778_v8, %v566_v9 }
  0x9a   : > { %10161 = vst [vmem:[#allocation10_spill] sm:$0xff] %v7548_v3  ;;  %v7553_v60 = vpop.f32.mrf.mxu1  ;;  %6363 = vmatmul.msk.f32.gmra.mxu0 %vm400_vm1, %v7261_v17  ;;  %v7569_v3 = vld [vmem:[%s7210_s24 + $0x32] sm:$0xff] }
  0x9b   : > { %6231 = vmatmul.msk.f32.gmra.mxu2 %vm400_vm1, %v827_v61  ;;  %10163 = vst [vmem:[#allocation12_spill] sm:$0xff] %v7569_v3 }
  0x9c   : > { %6297 = vmatmul.msk.f32.gmra.mxu3 %vm400_vm1, %v7270_v20 }
  0x9d   : > { %6429 = vmatmul.msk.f32.gmra.mxu1 %vm400_vm1, %v6395_v55 }
  0x9e   : > { %v569_v13 = vpop.f32.mrf.mxu2 }
  0x9f   : > { %v781_v16 = vpop.f32.mrf.mxu3  ;;  %v7564_v9 = vpop.f32.mrf.mxu0 }
  0xa0   : > { %v7562_v8 = vadd.f32 %v781_v16, %v569_v13 }
  0xa2   : > { %10162 = vst [vmem:[#allocation11_spill] sm:$0xff] %v7562_v8  ;;  %v7566_v58 = vpop.f32.mrf.mxu1  ;;  %6364 = vmatmul.msk.f32.gmra.mxu0 %vm400_vm1, %v7281_v21  ;;  %v7585_v8 = vld [vmem:[%s7210_s24 + $0x3a] sm:$0xff] }
  0xa3   : > { %6232 = vmatmul.msk.f32.gmra.mxu2 %vm400_vm1, %v6394_v0  ;;  %10165 = vst [vmem:[#allocation14_spill] sm:$0xff] %v7585_v8 }
  0xa4   : > { %6298 = vmatmul.msk.f32.gmra.mxu3 %vm400_vm1, %v7290_v24 }
  0xa5   : > { %6430 = vmatmul.msk.f32.gmra.mxu1 %vm400_vm1, %v7569_v3 }
  0xa6   : > { %v572_v17 = vpop.f32.mrf.mxu2 }
  0xa7   : > { %v784_v20 = vpop.f32.mrf.mxu3  ;;  %v7580_v13 = vpop.f32.mrf.mxu0 }
  0xa8   : > { %v7578_v61 = vadd.f32 %v784_v20, %v572_v17 }
  0xaa   : > { %10164 = vst [vmem:[#allocation13_spill] sm:$0xff] %v7578_v61  ;;  %v7582_v16 = vpop.f32.mrf.mxu1  ;;  %6365 = vmatmul.msk.f32.gmra.mxu0 %vm400_vm1, %v7301_v25  ;;  %v7601_v61 = vld [vmem:[%s7210_s24 + $0x4a] sm:$0xff] }
  0xab   : > { %6233 = vmatmul.msk.f32.gmra.mxu2 %vm400_vm1, %v6395_v55  ;;  %10167 = vst [vmem:[#allocation16_spill] sm:$0xff] %v7601_v61 }
  0xac   : > { %6299 = vmatmul.msk.f32.gmra.mxu3 %vm400_vm1, %v7310_v28 }
  0xad   : > { %6431 = vmatmul.msk.f32.gmra.mxu1 %vm400_vm1, %v7585_v8 }
  0xae   : > { %v575_v21 = vpop.f32.mrf.mxu2 }
  0xaf   : > { %v787_v24 = vpop.f32.mrf.mxu3  ;;  %v7596_v17 = vpop.f32.mrf.mxu0 }
  0xb0   : > { %v7594_v0 = vadd.f32 %v787_v24, %v575_v21 }
  0xb2   : > { %10166 = vst [vmem:[#allocation15_spill] sm:$0xff] %v7594_v0  ;;  %v7598_v20 = vpop.f32.mrf.mxu1  ;;  %6366 = vmatmul.msk.f32.gmra.mxu0 %vm400_vm1, %v7321_v29  ;;  %v7618_v0 = vld [vmem:[%s7210_s24 + $0x52] sm:$0xff] }
  0xb3   : > { %6234 = vmatmul.msk.f32.gmra.mxu2 %vm400_vm1, %v7569_v3  ;;  %10169 = vst [vmem:[#allocation18_spill] sm:$0xff] %v7618_v0  ;;  %v7635_v3 = vld [vmem:[%s7210_s24 + $0x62] sm:$0xff] }
  0xb4   : > { %6300 = vmatmul.msk.f32.gmra.mxu3 %vm400_vm1, %v7330_v32  ;;  %10171 = vst [vmem:[#allocation20_spill] sm:$0xff] %v7635_v3 }
  0xb5   : > { %6432 = vmatmul.msk.f32.gmra.mxu1 %vm400_vm1, %v7601_v61 }
  0xb6   : > { %v578_v25 = vpop.f32.mrf.mxu2 }
  0xb7   : > { %v790_v28 = vpop.f32.mrf.mxu3  ;;  %v7613_v21 = vpop.f32.mrf.mxu0 }
  0xb8   : > { %v7611_v55 = vadd.f32 %v790_v28, %v578_v25 }
  0xba   : > { %10168 = vst [vmem:[#allocation17_spill] sm:$0xff] %v7611_v55  ;;  %v7615_v24 = vpop.f32.mrf.mxu1  ;;  %6367 = vmatmul.msk.f32.gmra.mxu0 %vm400_vm1, %v7341_v33 }
  0xbb   : > { %6235 = vmatmul.msk.f32.gmra.mxu2 %vm400_vm1, %v7585_v8  ;;  %v7652_v8 = vld [vmem:[%s7210_s24 + $0x6a] sm:$0xff] }
  0xbc   : > { %6301 = vmatmul.msk.f32.gmra.mxu3 %vm400_vm1, %v7350_v36  ;;  %10173 = vst [vmem:[#allocation22_spill] sm:$0xff] %v7652_v8 }
  0xbd   : > { %6433 = vmatmul.msk.f32.gmra.mxu1 %vm400_vm1, %v7618_v0 }
  0xbe   : > { %v581_v29 = vpop.f32.mrf.mxu2 }
  0xbf   : > { %v793_v32 = vpop.f32.mrf.mxu3  ;;  %v7630_v28 = vpop.f32.mrf.mxu0 }
  0xc0   : > { %v7628_v25 = vadd.f32 %v793_v32, %v581_v29 }
  0xc2   : > { %10170 = vst [vmem:[#allocation19_spill] sm:$0xff] %v7628_v25  ;;  %v7632_v55 = vpop.f32.mrf.mxu1  ;;  %6368 = vmatmul.msk.f32.gmra.mxu0 %vm400_vm1, %v7361_v37 }
  0xc3   : > { %6236 = vmatmul.msk.f32.gmra.mxu2 %vm400_vm1, %v7601_v61  ;;  %v7669_v61 = vld [vmem:[%s7210_s24 + $0x7a] sm:$0xff] }
  0xc4   : > { %6302 = vmatmul.msk.f32.gmra.mxu3 %vm400_vm1, %v7370_v40  ;;  %10175 = vst [vmem:[#allocation24_spill] sm:$0xff] %v7669_v61 }
  0xc5   : > { %6434 = vmatmul.msk.f32.gmra.mxu1 %vm400_vm1, %v7635_v3 }
  0xc6   : > { %v584_v33 = vpop.f32.mrf.mxu2 }
  0xc7   : > { %v796_v36 = vpop.f32.mrf.mxu3  ;;  %v7647_v32 = vpop.f32.mrf.mxu0 }
  0xc8   : > { %v7645_v29 = vadd.f32 %v796_v36, %v584_v33 }
  0xca   : > { %10172 = vst [vmem:[#allocation21_spill] sm:$0xff] %v7645_v29  ;;  %v7649_v25 = vpop.f32.mrf.mxu1  ;;  %6369 = vmatmul.msk.f32.gmra.mxu0 %vm400_vm1, %v7381_v41 }
  0xcb   : > { %6237 = vmatmul.msk.f32.gmra.mxu2 %vm400_vm1, %v7618_v0  ;;  %v7686_v0 = vld [vmem:[%s7210_s24 + $0x82] sm:$0xff] }
  0xcc   : > { %6303 = vmatmul.msk.f32.gmra.mxu3 %vm400_vm1, %v7390_v44  ;;  %10177 = vst [vmem:[#allocation26_spill] sm:$0xff] %v7686_v0 }
  0xcd   : > { %6435 = vmatmul.msk.f32.gmra.mxu1 %vm400_vm1, %v7652_v8 }
  0xce   : > { %v587_v37 = vpop.f32.mrf.mxu2 }
  0xcf   : > { %v799_v40 = vpop.f32.mrf.mxu3  ;;  %v7664_v36 = vpop.f32.mrf.mxu0 }
  0xd0   : > { %v7662_v33 = vadd.f32 %v799_v40, %v587_v37 }
  0xd2   : > { %10174 = vst [vmem:[#allocation23_spill] sm:$0xff] %v7662_v33  ;;  %v7666_v29 = vpop.f32.mrf.mxu1  ;;  %6370 = vmatmul.msk.f32.gmra.mxu0 %vm400_vm1, %v7401_v45 }
  0xd3   : > { %6238 = vmatmul.msk.f32.gmra.mxu2 %vm400_vm1, %v7635_v3  ;;  %v7703_v3 = vld [vmem:[%s7210_s24 + $0x92] sm:$0xff] }
  0xd4   : > { %6304 = vmatmul.msk.f32.gmra.mxu3 %vm400_vm1, %v7410_v48  ;;  %10179 = vst [vmem:[#allocation28_spill] sm:$0xff] %v7703_v3 }
  0xd5   : > { %6436 = vmatmul.msk.f32.gmra.mxu1 %vm400_vm1, %v7669_v61 }
  0xd6   : > { %v590_v41 = vpop.f32.mrf.mxu2 }
  0xd7   : > { %v802_v44 = vpop.f32.mrf.mxu3  ;;  %v7681_v40 = vpop.f32.mrf.mxu0 }
  0xd8   : > { %v7679_v37 = vadd.f32 %v802_v44, %v590_v41 }
  0xda   : > { %10176 = vst [vmem:[#allocation25_spill] sm:$0xff] %v7679_v37  ;;  %v7683_v33 = vpop.f32.mrf.mxu1  ;;  %6371 = vmatmul.msk.f32.gmra.mxu0 %vm400_vm1, %v7421_v49 }
  0xdb   : > { %6239 = vmatmul.msk.f32.gmra.mxu2 %vm400_vm1, %v7652_v8  ;;  %v7720_v8 = vld [vmem:[%s7210_s24 + $0x9a] sm:$0xff] }
  0xdc   : > { %6305 = vmatmul.msk.f32.gmra.mxu3 %vm400_vm1, %v7430_v52  ;;  %10181 = vst [vmem:[#allocation30_spill] sm:$0xff] %v7720_v8 }
  0xdd   : > { %6437 = vmatmul.msk.f32.gmra.mxu1 %vm400_vm1, %v7686_v0 }
  0xde   : > { %v593_v45 = vpop.f32.mrf.mxu2 }
  0xdf   : > { %v805_v48 = vpop.f32.mrf.mxu3  ;;  %v7698_v44 = vpop.f32.mrf.mxu0 }
  0xe0   : > { %v7696_v41 = vadd.f32 %v805_v48, %v593_v45 }
  0xe2   : > { %10178 = vst [vmem:[#allocation27_spill] sm:$0xff] %v7696_v41  ;;  %v7700_v37 = vpop.f32.mrf.mxu1  ;;  %6372 = vmatmul.msk.f32.gmra.mxu0 %vm400_vm1, %v7441_v53 }
  0xe3   : > { %6240 = vmatmul.msk.f32.gmra.mxu2 %vm400_vm1, %v7669_v61  ;;  %v7737_v61 = vld [vmem:[%s7210_s24 + $0xaa] sm:$0xff] }
  0xe4   : > { %6306 = vmatmul.msk.f32.gmra.mxu3 %vm400_vm1, %v7450_v56  ;;  %10183 = vst [vmem:[#allocation32_spill] sm:$0xff] %v7737_v61 }
  0xe5   : > { %6438 = vmatmul.msk.f32.gmra.mxu1 %vm400_vm1, %v7703_v3 }
  0xe6   : > { %v596_v49 = vpop.f32.mrf.mxu2 }
  0xe7   : > { %v808_v52 = vpop.f32.mrf.mxu3  ;;  %v7715_v48 = vpop.f32.mrf.mxu0 }
  0xe8   : > { %v7713_v45 = vadd.f32 %v808_v52, %v596_v49 }
  0xea   : > { %10180 = vst [vmem:[#allocation29_spill] sm:$0xff] %v7713_v45  ;;  %v7717_v41 = vpop.f32.mrf.mxu1  ;;  %6373 = vmatmul.msk.f32.gmra.mxu0 %vm400_vm1, %v7469_v59 }
  0xeb   : > { %6241 = vmatmul.msk.f32.gmra.mxu2 %vm400_vm1, %v7686_v0  ;;  %v7754_v0 = vld [vmem:[%s7210_s24 + $0xb2] sm:$0xff] }
  0xec   : > { %6307 = vmatmul.msk.f32.gmra.mxu3 %vm400_vm1, %v7478_v62  ;;  %10185 = vst [vmem:[#allocation34_spill] sm:$0xff] %v7754_v0 }
  0xed   : > { %6439 = vmatmul.msk.f32.gmra.mxu1 %vm400_vm1, %v7720_v8 }
  0xee   : > { %v599_v53 = vpop.f32.mrf.mxu2 }
  0xef   : > { %v811_v56 = vpop.f32.mrf.mxu3  ;;  %v7732_v52 = vpop.f32.mrf.mxu0 }
  0xf0   : > { %v7730_v49 = vadd.f32 %v811_v56, %v599_v53 }
  0xf2   : > { %10182 = vst [vmem:[#allocation31_spill] sm:$0xff] %v7730_v49  ;;  %v7734_v45 = vpop.f32.mrf.mxu1  ;;  %6374 = vmatmul.msk.f32.gmra.mxu0 %vm400_vm1, %v7497_v1 }
  0xf3   : > { %6242 = vmatmul.msk.f32.gmra.mxu2 %vm400_vm1, %v7703_v3  ;;  %v7771_v3 = vld [vmem:[%s7210_s24 + $0xc2] sm:$0xff] }
  0xf4   : > { %6308 = vmatmul.msk.f32.gmra.mxu3 %vm400_vm1, %v7506_v4  ;;  %10187 = vst [vmem:[#allocation36_spill] sm:$0xff] %v7771_v3 }
  0xf5   : > { %6440 = vmatmul.msk.f32.gmra.mxu1 %vm400_vm1, %v7737_v61 }
  0xf6   : > { %v602_v59 = vpop.f32.mrf.mxu2 }
  0xf7   : > { %v814_v62 = vpop.f32.mrf.mxu3  ;;  %v7749_v56 = vpop.f32.mrf.mxu0 }
  0xf8   : > { %v7747_v53 = vadd.f32 %v814_v62, %v602_v59 }
  0xfa   : > { %10184 = vst [vmem:[#allocation33_spill] sm:$0xff] %v7747_v53  ;;  %v7751_v49 = vpop.f32.mrf.mxu1  ;;  %6375 = vmatmul.msk.f32.gmra.mxu0 %vm400_vm1, %v7517_v5 }
  0xfb   : > { %6243 = vmatmul.msk.f32.gmra.mxu2 %vm400_vm1, %v7720_v8  ;;  %v7788_v8 = vld [vmem:[%s7210_s24 + $0xca] sm:$0xff] }
  0xfc   : > { %6309 = vmatmul.msk.f32.gmra.mxu3 %vm400_vm1, %v7526_v12  ;;  %10190 = vst [vmem:[#allocation39_spill] sm:$0xff] %v7788_v8 }
  0xfd   : > { %6441 = vmatmul.msk.f32.gmra.mxu1 %vm400_vm1, %v7754_v0 }
  0xfe   : > { %v605_v1 = vpop.f32.mrf.mxu2 }
  0xff   : > { %v817_v4 = vpop.f32.mrf.mxu3  ;;  %v7766_v62 = vpop.f32.mrf.mxu0 }
 0x100   : > { %v7764_v59 = vadd.f32 %v817_v4, %v605_v1 }
 0x102   : > { %10186 = vst [vmem:[#allocation35_spill] sm:$0xff] %v7764_v59  ;;  %v7768_v53 = vpop.f32.mrf.mxu1  ;;  %6376 = vmatmul.msk.f32.gmra.mxu0 %vm400_vm1, %v7214_v6 }
 0x103   : > { %6244 = vmatmul.msk.f32.gmra.mxu2 %vm400_vm1, %v7737_v61  ;;  %v7804_v61 = vld [vmem:[%s7210_s24 + $0xda] sm:$0xff] }
 0x104   : > { %6310 = vmatmul.msk.f32.gmra.mxu3 %vm400_vm1, %v7217_v7 }
 0x105   : > { %6442 = vmatmul.msk.f32.gmra.mxu1 %vm400_vm1, %v7771_v3 }
 0x106   : > { %v608_v5 = vpop.f32.mrf.mxu2 }
 0x107   : > { %v820_v12 = vpop.f32.mrf.mxu3  ;;  %v7783_v4 = vpop.f32.mrf.mxu0 }
 0x108   : > { %v7781_v1 = vadd.f32 %v820_v12, %v608_v5 }
 0x10a   : > { %10188 = vst [vmem:[#allocation37_spill] sm:$0xff] %v7781_v1  ;;  %v7785_v59 = vpop.f32.mrf.mxu1  ;;  %6377 = vmatmul.msk.f32.gmra.mxu0 %vm400_vm1, %v7228_v10  ;;  %v6658_v1 = vld [vmem:[%s10100_s5 + $0x8] sm:$0xff]  ;;  %v731_v10 = vadd.f32 %v7539_v63, %v7536_v57 }
 0x10b   : > { %10189 = vst [vmem:[#allocation38_spill] sm:$0xff] %v7785_v59  ;;  %6245 = vmatmul.msk.f32.gmra.mxu2 %vm400_vm1, %v7754_v0  ;;  %3437 = vmatpush.msra.mxu1 %v6658_v1 }
 0x10c   : > { %6311 = vmatmul.msk.f32.gmra.mxu3 %vm400_vm1, %v7231_v11 }
 0x10d   : > { %6443 = vmatmul.msk.f32.gmra.mxu1 %vm400_vm1, %v7788_v8 }
 0x10e   : > { %v611_v6 = vpop.f32.mrf.mxu2 }
 0x10f   : > { %v823_v7 = vpop.f32.mrf.mxu3  ;;  %v1533_v12 = vpop.f32.mrf.mxu0 }
 0x110   : > { %v7798_v5 = vadd.f32 %v823_v7, %v611_v6 }
 0x112   : > { %10191 = vst [vmem:[#allocation40_spill] sm:$0xff] %v7798_v5  ;;  %v1811_v0 = vpop.f32.mrf.mxu1  ;;  %6378 = vmatmul.msk.f32.gmra.mxu0 %vm400_vm1, %v7244_v14 }
 0x113   : > { %6246 = vmatmul.msk.f32.gmra.mxu2 %vm400_vm1, %v7771_v3  ;;  %v7817_v3 = vld [vmem:[%s7210_s24 + $0xe2] sm:$0xff] }
 0x114   : > { %6312 = vmatmul.msk.f32.gmra.mxu3 %vm400_vm1, %v7247_v15  ;;  %v734_v15 = vadd.f32 %v7553_v60, %v7550_v2  ;;  %v737_v60 = vadd.f32 %v7566_v58, %v7564_v9  ;;  %v740_v9 = vadd.f32 %v7582_v16, %v7580_v13 }
 0x115   : > { %6444 = vmatmul.msk.f32.gmra.mxu1 %vm400_vm1, %v7804_v61 }
 0x116   : > { %v976_v11 = vpop.f32.mrf.mxu2 }
 0x117   : > { %v1072_v6 = vadd.f32 %v976_v11, %v731_v10  ;;  %v1255_v7 = vpop.f32.mrf.mxu3  ;;  %v1536_v5 = vpop.f32.mrf.mxu0 }
 0x119   : > { %v1351_v1 = vadd.f32 %v1255_v7, %v1072_v6 }
 0x11a   : > { %v1814_v59 = vpop.f32.mrf.mxu1  ;;  %6379 = vmatmul.msk.f32.gmra.mxu0 %vm400_vm1, %v7264_v18  ;;  %v7832_v18 = vld [vmem:[%s7210_s24 + $0xf2] sm:$0xff] }
 0x11b   : > { %6247 = vmatmul.msk.f32.gmra.mxu2 %vm400_vm1, %v7788_v8  ;;  %v1629_v14 = vadd.f32 %v1533_v12, %v1351_v1 }
 0x11c   : > { %6313 = vmatmul.msk.f32.gmra.mxu3 %vm400_vm1, %v7267_v19 }
 0x11d   : > { %v7827_v57 = vadd.f32 %v1811_v0, %v1629_v14  ;;  %6445 = vmatmul.msk.f32.gmra.mxu1 %vm400_vm1, %v7817_v3 }
 0x11e   : > { %v979_v63 = vpop.f32.mrf.mxu2 }
 0x11f   : > { %v1073_v10 = vadd.f32 %v979_v63, %v734_v15  ;;  %v1258_v11 = vpop.f32.mrf.mxu3  ;;  %v1539_v6 = vpop.f32.mrf.mxu0 }
 0x121   : > { %v1352_v7 = vadd.f32 %v1258_v11, %v1073_v10 }
 0x122   : > { %v1817_v8 = vpop.f32.mrf.mxu1  ;;  %6380 = vmatmul.msk.f32.gmra.mxu0 %vm400_vm1, %v7284_v22  ;;  %v7847_v22 = vld [vmem:[%s7210_s24 + $0xfa] sm:$0xff] }
 0x123   : > { %6248 = vmatmul.msk.f32.gmra.mxu2 %vm400_vm1, %v7804_v61  ;;  %v1630_v19 = vadd.f32 %v1536_v5, %v1352_v7 }
 0x124   : > { %6314 = vmatmul.msk.f32.gmra.mxu3 %vm400_vm1, %v7287_v23 }
 0x125   : > { %v7842_v2 = vadd.f32 %v1814_v59, %v1630_v19  ;;  %6446 = vmatmul.msk.f32.gmra.mxu1 %vm400_vm1, %v7832_v18  ;;  %v7862_v19 = vld [vmem:[%s7210_s24 + $0x10a] sm:$0xff] }
 0x126   : > { %v982_v0 = vpop.f32.mrf.mxu2 }
 0x127   : > { %v1074_v12 = vadd.f32 %v982_v0, %v737_v60  ;;  %v1261_v1 = vpop.f32.mrf.mxu3  ;;  %v1542_v14 = vpop.f32.mrf.mxu0 }
 0x129   : > { %v1353_v15 = vadd.f32 %v1261_v1, %v1074_v12 }
 0x12a   : > { %v1820_v63 = vpop.f32.mrf.mxu1  ;;  %6381 = vmatmul.msk.f32.gmra.mxu0 %vm400_vm1, %v7304_v26 }
 0x12b   : > { %6249 = vmatmul.msk.f32.gmra.mxu2 %vm400_vm1, %v7817_v3  ;;  %v1631_v23 = vadd.f32 %v1539_v6, %v1353_v15 }
 0x12c   : > { %6315 = vmatmul.msk.f32.gmra.mxu3 %vm400_vm1, %v7307_v27 }
 0x12d   : > { %v7857_v58 = vadd.f32 %v1817_v8, %v1631_v23  ;;  %6447 = vmatmul.msk.f32.gmra.mxu1 %vm400_vm1, %v7847_v22  ;;  %v743_v8 = vadd.f32 %v7598_v20, %v7596_v17  ;;  %v746_v17 = vadd.f32 %v7615_v24, %v7613_v21 }
 0x12e   : > { %v985_v59 = vpop.f32.mrf.mxu2 }
 0x12f   : > { %v1075_v5 = vadd.f32 %v985_v59, %v740_v9  ;;  %v1264_v10 = vpop.f32.mrf.mxu3  ;;  %v1545_v11 = vpop.f32.mrf.mxu0  ;;  %v6416_v59 = vld [vmem:[%s7210_s24 + $0x122] sm:$0xff] }
 0x131   : > { %v1354_v7 = vadd.f32 %v1264_v10, %v1075_v5 }
 0x132   : > { %6382 = vmatmul.msk.f32.gmra.mxu0 %vm400_vm1, %v7324_v30  ;;  %v1823_v27 = vpop.f32.mrf.mxu1  ;;  %v6415_v30 = vld [vmem:[%s7210_s24 + $0x112] sm:$0xff] }
 0x133   : > { %6250 = vmatmul.msk.f32.gmra.mxu2 %vm400_vm1, %v7832_v18  ;;  %v1632_v26 = vadd.f32 %v1542_v14, %v1354_v7 }
 0x134   : > { %6316 = vmatmul.msk.f32.gmra.mxu3 %vm400_vm1, %v7327_v31 }
 0x135   : > { %v7872_v13 = vadd.f32 %v1820_v63, %v1632_v26  ;;  %6448 = vmatmul.msk.f32.gmra.mxu1 %vm400_vm1, %v7862_v19 }
 0x136   : > { %v988_v16 = vpop.f32.mrf.mxu2 }
 0x137   : > { %v1076_v6 = vadd.f32 %v988_v16, %v743_v8  ;;  %v1267_v60 = vpop.f32.mrf.mxu3  ;;  %v1548_v0 = vpop.f32.mrf.mxu0 }
 0x139   : > { %v1355_v12 = vadd.f32 %v1267_v60, %v1076_v6 }
 0x13a   : > { %6383 = vmatmul.msk.f32.gmra.mxu0 %vm400_vm1, %v7344_v34  ;;  %v1826_v14 = vpop.f32.mrf.mxu1 }
 0x13b   : > { %6251 = vmatmul.msk.f32.gmra.mxu2 %vm400_vm1, %v7847_v22  ;;  %v1633_v31 = vadd.f32 %v1545_v11, %v1355_v12  ;;  %v6418_v12 = vld [vmem:[%s7210_s24 + $0x13a] sm:$0xff] }
 0x13c   : > { %6317 = vmatmul.msk.f32.gmra.mxu3 %vm400_vm1, %v7347_v35  ;;  %v749_v35 = vadd.f32 %v7632_v55, %v7630_v28 }
 0x13d   : > { %v7885_v20 = vadd.f32 %v1823_v27, %v1633_v31  ;;  %6449 = vmatmul.msk.f32.gmra.mxu1 %vm400_vm1, %v6415_v30  ;;  %v6417_v27 = vld [vmem:[%s7210_s24 + $0x12a] sm:$0xff] }
 0x13e   : > { %v991_v1 = vpop.f32.mrf.mxu2 }
 0x13f   : > { %v1077_v15 = vadd.f32 %v991_v1, %v746_v17  ;;  %v1270_v63 = vpop.f32.mrf.mxu3  ;;  %v1551_v23 = vpop.f32.mrf.mxu0 }
 0x141   : > { %v1356_v9 = vadd.f32 %v1270_v63, %v1077_v15 }
 0x142   : > { %6384 = vmatmul.msk.f32.gmra.mxu0 %vm400_vm1, %v7364_v38  ;;  %v1829_v7 = vpop.f32.mrf.mxu1 }
 0x143   : > { %6252 = vmatmul.msk.f32.gmra.mxu2 %vm400_vm1, %v7862_v19  ;;  %v1634_v34 = vadd.f32 %v1548_v0, %v1356_v9  ;;  %v6420_v9 = vld [vmem:[%s7210_s24 + $0x152] sm:$0xff] }
 0x144   : > { %6318 = vmatmul.msk.f32.gmra.mxu3 %vm400_vm1, %v7367_v39  ;;  %v752_v39 = vadd.f32 %v7649_v25, %v7647_v32 }
 0x145   : > { %v7897_v21 = vadd.f32 %v1826_v14, %v1634_v34  ;;  %6450 = vmatmul.msk.f32.gmra.mxu1 %vm400_vm1, %v6416_v59  ;;  %v6419_v14 = vld [vmem:[%s7210_s24 + $0x142] sm:$0xff] }
 0x146   : > { %v994_v24 = vpop.f32.mrf.mxu2 }
 0x147   : > { %v1078_v5 = vadd.f32 %v994_v24, %v749_v35  ;;  %v1273_v10 = vpop.f32.mrf.mxu3  ;;  %v1554_v11 = vpop.f32.mrf.mxu0 }
 0x149   : > { %v1357_v26 = vadd.f32 %v1273_v10, %v1078_v5  ;;  %v6421_v5 = vld [vmem:[%s7210_s24 + $0x15a] sm:$0xff] }
 0x14a   : > { %6385 = vmatmul.msk.f32.gmra.mxu0 %vm400_vm1, %v7384_v42  ;;  %v1832_v0 = vpop.f32.mrf.mxu1 }
 0x14b   : > { %6253 = vmatmul.msk.f32.gmra.mxu2 %vm400_vm1, %v6415_v30  ;;  %v1635_v38 = vadd.f32 %v1551_v23, %v1357_v26 }
 0x14c   : > { %6319 = vmatmul.msk.f32.gmra.mxu3 %vm400_vm1, %v7387_v43  ;;  %v755_v43 = vadd.f32 %v7666_v29, %v7664_v36 }
 0x14d   : > { %v7908_v55 = vadd.f32 %v1829_v7, %v1635_v38  ;;  %6451 = vmatmul.msk.f32.gmra.mxu1 %vm400_vm1, %v6417_v27 }
 0x14e   : > { %v997_v28 = vpop.f32.mrf.mxu2 }
 0x14f   : > { %v1079_v8 = vadd.f32 %v997_v28, %v752_v39  ;;  %v1276_v16 = vpop.f32.mrf.mxu3  ;;  %v1557_v6 = vpop.f32.mrf.mxu0  ;;  %v6422_v39 = vld [vmem:[%s7210_s24 + $0x16a] sm:$0xff] }
 0x150   : > { %v10195_v28 = vld [vmem:[#allocation6_spill] sm:$0xff] }
 0x151   : > { %v1358_v60 = vadd.f32 %v1276_v16, %v1079_v8  ;;  %v10196_v16 = vld [vmem:[#allocation7_spill] sm:$0xff] }
 0x152   : > { %6386 = vmatmul.msk.f32.gmra.mxu0 %vm400_vm1, %v7404_v46 }
 0x153   : > { %6254 = vmatmul.msk.f32.gmra.mxu2 %vm400_vm1, %v6416_v59  ;;  %v1636_v42 = vadd.f32 %v1554_v11, %v1358_v60  ;;  %v10194_v11 = vld [vmem:[#allocation5_spill] sm:$0xff] }
 0x154   : > { %6320 = vmatmul.msk.f32.gmra.mxu3 %vm400_vm1, %v7407_v47  ;;  %v758_v47 = vadd.f32 %v7683_v33, %v7681_v40  ;;  %v761_v33 = vadd.f32 %v7700_v37, %v7698_v44  ;;  %v764_v37 = vadd.f32 %v7717_v41, %v7715_v48  ;;  %v767_v41 = vadd.f32 %v7734_v45, %v7732_v52 }
 0x155   : > { %v7919_v25 = vadd.f32 %v1832_v0, %v1636_v42  ;;  %6452 = vmatmul.msk.f32.gmra.mxu1 %vm400_vm1, %v6418_v12  ;;  %v6423_v42 = vld [vmem:[%s7210_s24 + $0x172] sm:$0xff]  ;;  %v770_v45 = vadd.f32 %v7751_v49, %v7749_v56  ;;  %v773_v49 = vadd.f32 %v7768_v53, %v7766_v62  ;;  %v10199_v53 = vld [vmem:[#allocation38_spill] sm:$0xff] }
 0x156   : > { %v1000_v32 = vpop.f32.mrf.mxu2  ;;  %v776_v62 = vadd.f32 %v10199_v53, %v7783_v4 }
 0x157   : > { %v1080_v30 = vadd.f32 %v1000_v32, %v755_v43  ;;  %v1279_v31 = vpop.f32.mrf.mxu3  ;;  %v1560_v17 = vpop.f32.mrf.mxu0  ;;  %v10197_v43 = vld [vmem:[#allocation8_spill] sm:$0xff] }
 0x159   : > { %v1359_v1 = vadd.f32 %v1279_v31, %v1080_v30  ;;  %v10198_v30 = vld [vmem:[#allocation9_spill] sm:$0xff] }
 0x15a   : > { %6387 = vmatmul.msk.f32.gmra.mxu0 %vm400_vm1, %v7424_v50 }
 0x15b   : > { %6255 = vmatmul.msk.f32.gmra.mxu2 %vm400_vm1, %v6417_v27  ;;  %v7926_v46 = vadd.f32 %v1557_v6, %v1359_v1 }
 0x15c   : > { %6321 = vmatmul.msk.f32.gmra.mxu3 %vm400_vm1, %v7427_v51  ;;  %v10192_v51 = vld [vmem:[#allocation3_spill] sm:$0xff] }
 0x15d   : > { %6453 = vmatmul.msk.f32.gmra.mxu1 %vm400_vm1, %v6419_v14 }
 0x15e   : > { %v1003_v29 = vpop.f32.mrf.mxu2 }
 0x15f   : > { %v1081_v36 = vadd.f32 %v1003_v29, %v758_v47  ;;  %v1282_v15 = vpop.f32.mrf.mxu3  ;;  %v1563_v63 = vpop.f32.mrf.mxu0  ;;  %v6292_v29 = vld [vmem:[%s7210_s24 + $0x180] sm:$0xff] }
 0x161   : > { %v1360_v23 = vadd.f32 %v1282_v15, %v1081_v36  ;;  %v6424_v36 = vld [vmem:[%s7210_s24 + $0x182] sm:$0xff] }
 0x162   : > { %6388 = vmatmul.msk.f32.gmra.mxu0 %vm400_vm1, %v7444_v54  ;;  %v10193_v54 = vld [vmem:[#allocation4_spill] sm:$0xff] }
 0x163   : > { %6256 = vmatmul.msk.f32.gmra.mxu2 %vm400_vm1, %v6418_v12  ;;  %v7937_v50 = vadd.f32 %v1560_v17, %v1360_v23 }
 0x164   : > { %6322 = vmatmul.msk.f32.gmra.mxu3 %vm400_vm1, %v10192_v51  ;;  %v6359_v51 = vld [vmem:[%s7210_s24 + $0x189] sm:$0xff] }
 0x165   : > { %6454 = vmatmul.msk.f32.gmra.mxu1 %vm400_vm1, %v6420_v9 }
 0x166   : > { %v1006_v40 = vpop.f32.mrf.mxu2 }
 0x167   : > { %v1082_v59 = vadd.f32 %v1006_v40, %v761_v33  ;;  %v1285_v34 = vpop.f32.mrf.mxu3  ;;  %v1566_v35 = vpop.f32.mrf.mxu0  ;;  %v6293_v40 = vld [vmem:[%s7210_s24 + $0x188] sm:$0xff] }
 0x169   : > { %v1361_v24 = vadd.f32 %v1285_v34, %v1082_v59  ;;  %v6425_v59 = vld [vmem:[%s7210_s24 + $0x18a] sm:$0xff] }
 0x16a   : > { %6389 = vmatmul.msk.f32.gmra.mxu0 %vm400_vm1, %v10193_v54 }
 0x16b   : > { %6257 = vmatmul.msk.f32.gmra.mxu2 %vm400_vm1, %v6419_v14  ;;  %v7948_v10 = vadd.f32 %v1563_v63, %v1361_v24  ;;  %v6358_v14 = vld [vmem:[%s7210_s24 + $0x181] sm:$0xff] }
 0x16c   : > { %6323 = vmatmul.msk.f32.gmra.mxu3 %vm400_vm1, %v10194_v11  ;;  %v6460_v11 = vld [vmem:[%s7210_s24 + $0x30] sm:$0xff] }
 0x16d   : > { %6455 = vmatmul.msk.f32.gmra.mxu1 %vm400_vm1, %v6421_v5 }
 0x16e   : > { %v1009_v44 = vpop.f32.mrf.mxu2 }
 0x16f   : > { %v1083_v7 = vadd.f32 %v1009_v44, %v764_v37  ;;  %v1288_v26 = vpop.f32.mrf.mxu3  ;;  %v1569_v27 = vpop.f32.mrf.mxu0  ;;  %v6526_v44 = vld [vmem:[%s7210_s24 + $0x31] sm:$0xff] }
 0x171   : > { %v1362_v38 = vadd.f32 %v1288_v26, %v1083_v7  ;;  %v10200_v7 = vld [vmem:[#allocation12_spill] sm:$0xff] }
 0x172   : > { %6390 = vmatmul.msk.f32.gmra.mxu0 %vm400_vm1, %v10195_v28 }
 0x173   : > { %6258 = vmatmul.msk.f32.gmra.mxu2 %vm400_vm1, %v6420_v9  ;;  %v7959_v8 = vadd.f32 %v1566_v35, %v1362_v38 }
 0x174   : > { %6324 = vmatmul.msk.f32.gmra.mxu3 %vm400_vm1, %v10196_v16  ;;  %v6461_v16 = vld [vmem:[%s7210_s24 + $0x38] sm:$0xff] }
 0x175   : > { %6456 = vmatmul.msk.f32.gmra.mxu1 %vm400_vm1, %v6422_v39 }
 0x176   : > { %v1012_v48 = vpop.f32.mrf.mxu2 }
 0x177   : > { %v1084_v6 = vadd.f32 %v1012_v48, %v767_v41  ;;  %v1291_v60 = vpop.f32.mrf.mxu3  ;;  %v1572_v0 = vpop.f32.mrf.mxu0  ;;  %v6527_v48 = vld [vmem:[%s7210_s24 + $0x39] sm:$0xff] }
 0x179   : > { %v1363_v12 = vadd.f32 %v1291_v60, %v1084_v6  ;;  %v10202_v6 = vld [vmem:[#allocation14_spill] sm:$0xff] }
 0x17a   : > { %6391 = vmatmul.msk.f32.gmra.mxu0 %vm400_vm1, %v10197_v43 }
 0x17b   : > { %6259 = vmatmul.msk.f32.gmra.mxu2 %vm400_vm1, %v6421_v5  ;;  %v7970_v32 = vadd.f32 %v1569_v27, %v1363_v12  ;;  %v10201_v27 = vld [vmem:[#allocation10_spill] sm:$0xff]  ;;  %v10203_v12 = vld [vmem:[#allocation11_spill] sm:$0xff] }
 0x17c   : > { %6325 = vmatmul.msk.f32.gmra.mxu3 %vm400_vm1, %v10198_v30 }
 0x17d   : > { %6457 = vmatmul.msk.f32.gmra.mxu1 %vm400_vm1, %v6423_v42 }
 0x17e   : > { %v1015_v52 = vpop.f32.mrf.mxu2 }
 0x17f   : > { %v1085_v31 = vadd.f32 %v1015_v52, %v770_v45  ;;  %v1294_v17 = vpop.f32.mrf.mxu3  ;;  %v1575_v1 = vpop.f32.mrf.mxu0  ;;  %v6462_v45 = vld [vmem:[%s7210_s24 + $0x48] sm:$0xff] }
 0x181   : > { %v1364_v47 = vadd.f32 %v1294_v17, %v1085_v31  ;;  %v6528_v31 = vld [vmem:[%s7210_s24 + $0x49] sm:$0xff]  ;;  %v10204_v17 = vld [vmem:[#allocation16_spill] sm:$0xff] }
 0x182   : > { %6392 = vmatmul.msk.f32.gmra.mxu0 %vm400_vm1, %v6358_v14 }
 0x183   : > { %6260 = vmatmul.msk.f32.gmra.mxu2 %vm400_vm1, %v6422_v39  ;;  %v7982_v15 = vadd.f32 %v1572_v0, %v1364_v47  ;;  %v10205_v47 = vld [vmem:[#allocation13_spill] sm:$0xff] }
 0x184   : > { %6326 = vmatmul.msk.f32.gmra.mxu3 %vm400_vm1, %v6292_v29 }
 0x185   : > { %6458 = vmatmul.msk.f32.gmra.mxu1 %vm400_vm1, %v6424_v36 }
 0x186   : > { %v1018_v56 = vpop.f32.mrf.mxu2 }
 0x187   : > { %v1086_v63 = vadd.f32 %v1018_v56, %v773_v49  ;;  %v1297_v23 = vpop.f32.mrf.mxu3  ;;  %v1578_v9 = vpop.f32.mrf.mxu0  ;;  %v6463_v56 = vld [vmem:[%s7210_s24 + $0x50] sm:$0xff] }
 0x189   : > { %v1365_v33 = vadd.f32 %v1297_v23, %v1086_v63  ;;  %v6529_v23 = vld [vmem:[%s7210_s24 + $0x51] sm:$0xff] }
 0x18a   : > { %6393 = vmatmul.msk.f32.gmra.mxu0 %vm400_vm1, %v6359_v51 }
 0x18b   : > { %6261 = vmatmul.msk.f32.gmra.mxu2 %vm400_vm1, %v6423_v42  ;;  %v7993_v34 = vadd.f32 %v1575_v1, %v1365_v33 }
 0x18c   : > { %6327 = vmatmul.msk.f32.gmra.mxu3 %vm400_vm1, %v6293_v40  ;;  %v10207_v40 = vld [vmem:[#allocation15_spill] sm:$0xff] }
 0x18d   : > { %6459 = vmatmul.msk.f32.gmra.mxu1 %vm400_vm1, %v6425_v59 }
 0x18e   : > { %v1021_v35 = vpop.f32.mrf.mxu2 }
 0x18f   : > { %v1087_v24 = vadd.f32 %v1021_v35, %v776_v62  ;;  %v1300_v5 = vpop.f32.mrf.mxu3  ;;  %v1581_v54 = vpop.f32.mrf.mxu0  ;;  %v6464_v35 = vld [vmem:[%s7210_s24 + $0x60] sm:$0xff] }
 0x191   : > { %v1366_v37 = vadd.f32 %v1300_v5, %v1087_v24  ;;  %v6530_v5 = vld [vmem:[%s7210_s24 + $0x61] sm:$0xff] }
 0x192   : > { %6626 = vmatmul.msk.f32.vlgmr.msra.gmra.mxu0 %vm400_vm1, %v10200_v7 }
 0x193   : > { %6494 = vmatmul.msk.f32.vlgmr.msra.gmra.mxu2 %vm400_vm1, %v6460_v11  ;;  %v8004_v26 = vadd.f32 %v1578_v9, %v1366_v37  ;;  %v10206_v9 = vld [vmem:[#allocation18_spill] sm:$0xff] }
 0x194   : > { %6560 = vmatmul.msk.f32.vlgmr.msra.gmra.mxu3 %vm400_vm1, %v6526_v44  ;;  %v10209_v44 = vld [vmem:[#allocation17_spill] sm:$0xff] }
 0x196   : > { %v1024_v4 = vpop.f32.mrf.mxu2 }
 0x197   : > { %v1088_v38 = vadd.f32 %v1024_v4, %v10201_v27  ;;  %v1303_v39 = vpop.f32.mrf.mxu3  ;;  %v1584_v28 = vpop.f32.mrf.mxu0 }
 0x199   : > { %v1367_v41 = vadd.f32 %v1303_v39, %v1088_v38  ;;  %v6465_v38 = vld [vmem:[%s7210_s24 + $0x68] sm:$0xff] }
 0x19a   : > { %6627 = vmatmul.msk.f32.gmra.mxu0 %vm400_vm1, %v10202_v6 }
 0x19b   : > { %6495 = vmatmul.msk.f32.gmra.mxu2 %vm400_vm1, %v6461_v16  ;;  %v8013_v60 = vadd.f32 %v1581_v54, %v1367_v41  ;;  %v10208_v54 = vld [vmem:[#allocation20_spill] sm:$0xff]  ;;  %v8046_v16 = vpop.f32.mrf.mxu1  ;;  %v10210_v41 = vld [vmem:[#allocation22_spill] sm:$0xff] }
 0x19c   : > { %6561 = vmatmul.msk.f32.gmra.mxu3 %vm400_vm1, %v6527_v48 }
 0x19e   : > { %v1027_v0 = vpop.f32.mrf.mxu2 }
 0x19f   : > { %v1089_v42 = vadd.f32 %v1027_v0, %v10203_v12  ;;  %v1306_v43 = vpop.f32.mrf.mxu3  ;;  %v1587_v30 = vpop.f32.mrf.mxu0  ;;  %v10211_v0 = vld [vmem:[#allocation19_spill] sm:$0xff] }
 0x1a1   : > { %v1368_v52 = vadd.f32 %v1306_v43, %v1089_v42 }
 0x1a2   : > { %6628 = vmatmul.msk.f32.gmra.mxu0 %vm400_vm1, %v10204_v17 }
 0x1a3   : > { %6496 = vmatmul.msk.f32.gmra.mxu2 %vm400_vm1, %v6462_v45  ;;  %v8022_v1 = vadd.f32 %v1584_v28, %v1368_v52  ;;  %v6531_v28 = vld [vmem:[%s7210_s24 + $0x69] sm:$0xff]  ;;  %v6532_v52 = vld [vmem:[%s7210_s24 + $0x79] sm:$0xff] }
 0x1a4   : > { %6562 = vmatmul.msk.f32.gmra.mxu3 %vm400_vm1, %v6528_v31  ;;  %v10212_v31 = vld [vmem:[#allocation24_spill] sm:$0xff] }
 0x1a6   : > { %v1030_v14 = vpop.f32.mrf.mxu2 }
 0x1a7   : > { %v1090_v29 = vadd.f32 %v1030_v14, %v10205_v47  ;;  %v1309_v36 = vpop.f32.mrf.mxu3  ;;  %v1590_v49 = vpop.f32.mrf.mxu0 }
 0x1a8   : > { %v8063_v14 = vpop.f32.mrf.mxu1 }
 0x1a9   : > { %v1369_v63 = vadd.f32 %v1309_v36, %v1090_v29  ;;  %v10213_v29 = vld [vmem:[#allocation21_spill] sm:$0xff] }
 0x1aa   : > { %6629 = vmatmul.msk.f32.gmra.mxu0 %vm400_vm1, %v10206_v9  ;;  %v6533_v9 = vld [vmem:[%s7210_s24 + $0x81] sm:$0xff] }
 0x1ab   : > { %6497 = vmatmul.msk.f32.gmra.mxu2 %vm400_vm1, %v6463_v56  ;;  %v8031_v51 = vadd.f32 %v1587_v30, %v1369_v63  ;;  %v6466_v30 = vld [vmem:[%s7210_s24 + $0x78] sm:$0xff]  ;;  %v6467_v63 = vld [vmem:[%s7210_s24 + $0x80] sm:$0xff] }
 0x1ac   : > { %6563 = vmatmul.msk.f32.gmra.mxu3 %vm400_vm1, %v6529_v23 }
 0x1ae   : > { %v1033_v33 = vpop.f32.mrf.mxu2 }
 0x1af   : > { %v1091_v59 = vadd.f32 %v1033_v33, %v10207_v40  ;;  %v1312_v53 = vpop.f32.mrf.mxu3  ;;  %v1593_v62 = vpop.f32.mrf.mxu0  ;;  %v10214_v33 = vld [vmem:[#allocation26_spill] sm:$0xff] }
 0x1b1   : > { %v1370_v24 = vadd.f32 %v1312_v53, %v1091_v59  ;;  %v8074_v53 = vpop.f32.mrf.mxu1 }
 0x1b2   : > { %6630 = vmatmul.msk.f32.gmra.mxu0 %vm400_vm1, %v10208_v54  ;;  %v6468_v54 = vld [vmem:[%s7210_s24 + $0x90] sm:$0xff] }
 0x1b3   : > { %6498 = vmatmul.msk.f32.gmra.mxu2 %vm400_vm1, %v6464_v35  ;;  %v8040_v11 = vadd.f32 %v1590_v49, %v1370_v24 }
 0x1b4   : > { %6564 = vmatmul.msk.f32.gmra.mxu3 %vm400_vm1, %v6530_v5 }
 0x1b6   : > { %v1036_v37 = vpop.f32.mrf.mxu2 }
 0x1b7   : > { %v1092_v7 = vadd.f32 %v1036_v37, %v10209_v44  ;;  %v1315_v4 = vpop.f32.mrf.mxu3  ;;  %v1596_v27 = vpop.f32.mrf.mxu0  ;;  %v6534_v44 = vld [vmem:[%s7210_s24 + $0x91] sm:$0xff] }
 0x1b9   : > { %v1371_v39 = vadd.f32 %v1315_v4, %v1092_v7  ;;  %v10216_v7 = vld [vmem:[#allocation28_spill] sm:$0xff] }
 0x1ba   : > { %6631 = vmatmul.msk.f32.gmra.mxu0 %vm400_vm1, %v10210_v41 }
 0x1bb   : > { %6499 = vmatmul.msk.f32.gmra.mxu2 %vm400_vm1, %v6465_v38  ;;  %v8051_v48 = vadd.f32 %v1593_v62, %v1371_v39  ;;  %v10215_v62 = vld [vmem:[#allocation23_spill] sm:$0xff]  ;;  %v10217_v38 = vld [vmem:[#allocation25_spill] sm:$0xff] }
 0x1bc   : > { %6565 = vmatmul.msk.f32.gmra.mxu3 %vm400_vm1, %v6531_v28 }
 0x1be   : > { %v1039_v6 = vpop.f32.mrf.mxu2 }
 0x1bf   : > { %v1093_v12 = vadd.f32 %v1039_v6, %v10211_v0  ;;  %v1318_v42 = vpop.f32.mrf.mxu3  ;;  %v1599_v43 = vpop.f32.mrf.mxu0  ;;  %v6469_v6 = vld [vmem:[%s7210_s24 + $0x98] sm:$0xff] }
 0x1c0   : > { %v8087_v0 = vpop.f32.mrf.mxu1 }
 0x1c1   : > { %v1372_v45 = vadd.f32 %v1318_v42, %v1093_v12  ;;  %v6535_v42 = vld [vmem:[%s7210_s24 + $0x99] sm:$0xff] }
 0x1c2   : > { %6632 = vmatmul.msk.f32.gmra.mxu0 %vm400_vm1, %v10212_v31 }
 0x1c3   : > { %6500 = vmatmul.msk.f32.gmra.mxu2 %vm400_vm1, %v6466_v30  ;;  %v8060_v17 = vadd.f32 %v1596_v27, %v1372_v45 }
 0x1c4   : > { %6566 = vmatmul.msk.f32.gmra.mxu3 %vm400_vm1, %v6532_v52  ;;  %v10219_v52 = vld [vmem:[#allocation27_spill] sm:$0xff] }
 0x1c6   : > { %v1042_v47 = vpop.f32.mrf.mxu2 }
 0x1c7   : > { %v1094_v36 = vadd.f32 %v1042_v47, %v10213_v29  ;;  %v1321_v49 = vpop.f32.mrf.mxu3  ;;  %v1602_v56 = vpop.f32.mrf.mxu0 }
 0x1c9   : > { %v1373_v23 = vadd.f32 %v1321_v49, %v1094_v36  ;;  %v6470_v36 = vld [vmem:[%s7210_s24 + $0xa8] sm:$0xff] }
 0x1ca   : > { %6633 = vmatmul.msk.f32.gmra.mxu0 %vm400_vm1, %v10214_v33 }
 0x1cb   : > { %6501 = vmatmul.msk.f32.gmra.mxu2 %vm400_vm1, %v6467_v63  ;;  %v8071_v40 = vadd.f32 %v1599_v43, %v1373_v23  ;;  %v10218_v43 = vld [vmem:[#allocation30_spill] sm:$0xff]  ;;  %v8099_v63 = vpop.f32.mrf.mxu1  ;;  %v10220_v23 = vld [vmem:[#allocation32_spill] sm:$0xff] }
 0x1cc   : > { %6567 = vmatmul.msk.f32.gmra.mxu3 %vm400_vm1, %v6533_v9 }
 0x1ce   : > { %v1045_v59 = vpop.f32.mrf.mxu2 }
 0x1cf   : > { %v1095_v35 = vadd.f32 %v1045_v59, %v10215_v62  ;;  %v1324_v24 = vpop.f32.mrf.mxu3  ;;  %v1605_v5 = vpop.f32.mrf.mxu0  ;;  %v10221_v59 = vld [vmem:[#allocation29_spill] sm:$0xff] }
 0x1d1   : > { %v1374_v37 = vadd.f32 %v1324_v24, %v1095_v35 }
 0x1d2   : > { %6634 = vmatmul.msk.f32.gmra.mxu0 %vm400_vm1, %v10216_v7 }
 0x1d3   : > { %6502 = vmatmul.msk.f32.gmra.mxu2 %vm400_vm1, %v6468_v54  ;;  %v8082_v4 = vadd.f32 %v1602_v56, %v1374_v37  ;;  %v6536_v56 = vld [vmem:[%s7210_s24 + $0xa9] sm:$0xff]  ;;  %v6537_v37 = vld [vmem:[%s7210_s24 + $0xb1] sm:$0xff] }
 0x1d4   : > { %6568 = vmatmul.msk.f32.gmra.mxu3 %vm400_vm1, %v6534_v44  ;;  %v10222_v44 = vld [vmem:[#allocation34_spill] sm:$0xff] }
 0x1d6   : > { %v1048_v27 = vpop.f32.mrf.mxu2 }
 0x1d7   : > { %v1096_v39 = vadd.f32 %v1048_v27, %v10217_v38  ;;  %v1327_v28 = vpop.f32.mrf.mxu3  ;;  %v1608_v41 = vpop.f32.mrf.mxu0 }
 0x1d8   : > { %v8116_v27 = vpop.f32.mrf.mxu1 }
 0x1d9   : > { %v1375_v12 = vadd.f32 %v1327_v28, %v1096_v39  ;;  %v10223_v39 = vld [vmem:[#allocation31_spill] sm:$0xff] }
 0x1da   : > { %6635 = vmatmul.msk.f32.gmra.mxu0 %vm400_vm1, %v10218_v43  ;;  %v6538_v43 = vld [vmem:[%s7210_s24 + $0xc1] sm:$0xff] }
 0x1db   : > { %6503 = vmatmul.msk.f32.gmra.mxu2 %vm400_vm1, %v6469_v6  ;;  %v8093_v30 = vadd.f32 %v1605_v5, %v1375_v12  ;;  %v6471_v5 = vld [vmem:[%s7210_s24 + $0xb0] sm:$0xff]  ;;  %v6472_v12 = vld [vmem:[%s7210_s24 + $0xc0] sm:$0xff] }
 0x1dc   : > { %6569 = vmatmul.msk.f32.gmra.mxu3 %vm400_vm1, %v6535_v42 }
 0x1de   : > { %v1051_v45 = vpop.f32.mrf.mxu2 }
 0x1df   : > { %v1097_v31 = vadd.f32 %v1051_v45, %v10219_v52  ;;  %v1330_v47 = vpop.f32.mrf.mxu3  ;;  %v1611_v29 = vpop.f32.mrf.mxu0  ;;  %v10224_v45 = vld [vmem:[#allocation36_spill] sm:$0xff] }
 0x1e1   : > { %v1376_v49 = vadd.f32 %v1330_v47, %v1097_v31  ;;  %v8127_v47 = vpop.f32.mrf.mxu1 }
 0x1e2   : > { %6636 = vmatmul.msk.f32.gmra.mxu0 %vm400_vm1, %v10220_v23  ;;  %v6473_v23 = vld [vmem:[%s7210_s24 + $0xc8] sm:$0xff] }
 0x1e3   : > { %6504 = vmatmul.msk.f32.gmra.mxu2 %vm400_vm1, %v6470_v36  ;;  %v8104_v9 = vadd.f32 %v1608_v41, %v1376_v49 }
 0x1e4   : > { %6570 = vmatmul.msk.f32.gmra.mxu3 %vm400_vm1, %v6536_v56 }
 0x1e6   : > { %v1054_v33 = vpop.f32.mrf.mxu2 }
 0x1e7   : > { %v1098_v62 = vadd.f32 %v1054_v33, %v10221_v59  ;;  %v1333_v35 = vpop.f32.mrf.mxu3  ;;  %v1614_v24 = vpop.f32.mrf.mxu0  ;;  %v6539_v59 = vld [vmem:[%s7210_s24 + $0xc9] sm:$0xff] }
 0x1e9   : > { %v1377_v54 = vadd.f32 %v1333_v35, %v1098_v62  ;;  %v10226_v62 = vld [vmem:[#allocation39_spill] sm:$0xff] }
 0x1ea   : > { %6637 = vmatmul.msk.f32.gmra.mxu0 %vm400_vm1, %v10222_v44 }
 0x1eb   : > { %6505 = vmatmul.msk.f32.gmra.mxu2 %vm400_vm1, %v6471_v5  ;;  %v8113_v7 = vadd.f32 %v1611_v29, %v1377_v54  ;;  %v10225_v29 = vld [vmem:[#allocation33_spill] sm:$0xff]  ;;  %v10227_v5 = vld [vmem:[#allocation35_spill] sm:$0xff] }
 0x1ec   : > { %6571 = vmatmul.msk.f32.gmra.mxu3 %vm400_vm1, %v6537_v37 }
 0x1ee   : > { %v1057_v38 = vpop.f32.mrf.mxu2 }
 0x1ef   : > { %v1099_v28 = vadd.f32 %v1057_v38, %v10223_v39  ;;  %v1336_v41 = vpop.f32.mrf.mxu3  ;;  %v1617_v6 = vpop.f32.mrf.mxu0  ;;  %v6474_v38 = vld [vmem:[%s7210_s24 + $0xd8] sm:$0xff] }
 0x1f0   : > { %v8140_v39 = vpop.f32.mrf.mxu1 }
 0x1f1   : > { %v1378_v42 = vadd.f32 %v1336_v41, %v1099_v28  ;;  %v6540_v41 = vld [vmem:[%s7210_s24 + $0xd9] sm:$0xff] }
 0x1f2   : > { %6638 = vmatmul.msk.f32.gmra.mxu0 %vm400_vm1, %v10224_v45 }
 0x1f3   : > { %6506 = vmatmul.msk.f32.gmra.mxu2 %vm400_vm1, %v6472_v12  ;;  %v8124_v52 = vadd.f32 %v1614_v24, %v1378_v42  ;;  %v10228_v42 = vld [vmem:[#allocation37_spill] sm:$0xff] }
 0x1f4   : > { %6572 = vmatmul.msk.f32.gmra.mxu3 %vm400_vm1, %v6538_v43 }
 0x1f6   : > { %v1060_v31 = vpop.f32.mrf.mxu2 }
 0x1f7   : > { %v1100_v36 = vadd.f32 %v1060_v31, %v10225_v29  ;;  %v1339_v49 = vpop.f32.mrf.mxu3  ;;  %v1620_v56 = vpop.f32.mrf.mxu0  ;;  %v6475_v29 = vld [vmem:[%s7210_s24 + $0xe0] sm:$0xff] }
 0x1f9   : > { %v1379_v33 = vadd.f32 %v1339_v49, %v1100_v36  ;;  %v6541_v49 = vld [vmem:[%s7210_s24 + $0xe1] sm:$0xff] }
 0x1fa   : > { %6639 = vmatmul.msk.f32.gmra.mxu0 %vm400_vm1, %v10226_v62 }
 0x1fb   : > { %6507 = vmatmul.msk.f32.gmra.mxu2 %vm400_vm1, %v6473_v23  ;;  %v8135_v35 = vadd.f32 %v1617_v6, %v1379_v33  ;;  %v7123_v23 = vmov 0.0  }
 0x1fc   : > { %6573 = vmatmul.msk.f32.gmra.mxu3 %vm400_vm1, %v6539_v59  ;;  %3175 = vst.msk [vmem:[#allocation2 + $0x18] sm:$0xff] %vm3170_vm2, %v7123_v23  ;;  %v10230_v59 = vld [vmem:[#allocation40_spill] sm:$0xff] }
 0x1fd   : > { %3176 = vst.msk [vmem:[#allocation2 + $0x20] sm:$0xff] %vm3170_vm2, %v7123_v23 }
 0x1fe   : > { %v1063_v24 = vpop.f32.mrf.mxu2  ;;  %3171 = vst.msk [vmem:[#allocation2] sm:$0xff] %vm3170_vm2, %v7123_v23 }
 0x1ff   : > { %v1101_v54 = vadd.f32 %v1063_v24, %v10227_v5  ;;  %v1342_v37 = vpop.f32.mrf.mxu3  ;;  %v1623_v44 = vpop.f32.mrf.mxu0  ;;  %3172 = vst.msk [vmem:[#allocation2 + $0x8] sm:$0xff] %vm3170_vm2, %v7123_v23  ;;  %v6476_v5 = vld [vmem:[%s7210_s24 + $0xf0] sm:$0xff] }
 0x200   : > { %3178 = vst.msk [vmem:[#allocation2 + $0x30] sm:$0xff] %vm3170_vm2, %v7123_v23 }
 0x201   : > { %v1380_v28 = vadd.f32 %v1342_v37, %v1101_v54  ;;  %3179 = vst.msk [vmem:[#allocation2 + $0x38] sm:$0xff] %vm3170_vm2, %v7123_v23  ;;  %v6542_v37 = vld [vmem:[%s7210_s24 + $0xf1] sm:$0xff] }
 0x202   : > { %6640 = vmatmul.msk.f32.gmra.mxu0 %vm400_vm1, %v7804_v61  ;;  %v8156_v61 = vpop.f32.mrf.mxu1  ;;  %3181 = vst.msk [vmem:[#allocation2 + $0x48] sm:$0xff] %vm3170_vm2, %v7123_v23 }
 0x203   : > { %6508 = vmatmul.msk.f32.gmra.mxu2 %vm400_vm1, %v6474_v38  ;;  %v8146_v6 = vadd.f32 %v1620_v56, %v1380_v28  ;;  %3182 = vst.msk [vmem:[#allocation2 + $0x50] sm:$0xff] %vm3170_vm2, %v7123_v23 }
 0x204   : > { %6574 = vmatmul.msk.f32.gmra.mxu3 %vm400_vm1, %v6540_v41  ;;  %3184 = vst.msk [vmem:[#allocation2 + $0x60] sm:$0xff] %vm3170_vm2, %v7123_v23 }
 0x205   : > { %3185 = vst.msk [vmem:[#allocation2 + $0x68] sm:$0xff] %vm3170_vm2, %v7123_v23 }
 0x206   : > { %v1066_v12 = vpop.f32.mrf.mxu2  ;;  %3187 = vst.msk [vmem:[#allocation2 + $0x78] sm:$0xff] %vm3170_vm2, %v7123_v23  ;;  %v3292_v38 = vld [vmem:[#allocation2 + $0x1] sm:$0xff] }
 0x207   : > { %v1102_v43 = vadd.f32 %v1066_v12, %v10228_v42  ;;  %v1345_v45 = vpop.f32.mrf.mxu3  ;;  %v1626_v31 = vpop.f32.mrf.mxu0  ;;  %3188 = vst.msk [vmem:[#allocation2 + $0x80] sm:$0xff] %vm3170_vm2, %v7123_v23  ;;  %6659 = vmatmul.msk.f32.vlgmr.msra.gmra.mxu1 %vm3170_vm2, %v3292_v38  ;;  %v6544_v38 = vld [vmem:[%s7210_s24 + $0x109] sm:$0xff] }
 0x208   : > { %3190 = vst.msk [vmem:[#allocation2 + $0x90] sm:$0xff] %vm3170_vm2, %v7123_v23 }
 0x209   : > { %v1381_v36 = vadd.f32 %v1345_v45, %v1102_v43  ;;  %3191 = vst.msk [vmem:[#allocation2 + $0x98] sm:$0xff] %vm3170_vm2, %v7123_v23  ;;  %v6477_v43 = vld [vmem:[%s7210_s24 + $0xf8] sm:$0xff] }
 0x20a   : > { %6641 = vmatmul.msk.f32.gmra.mxu0 %vm400_vm1, %v7817_v3  ;;  %v8194_v28 = vpop.f32.mrf.mxu1  ;;  %3193 = vst.msk [vmem:[#allocation2 + $0xa8] sm:$0xff] %vm3170_vm2, %v7123_v23 }
 0x20b   : > { %6509 = vmatmul.msk.f32.gmra.mxu2 %vm400_vm1, %v6475_v29  ;;  %v8161_v56 = vadd.f32 %v1623_v44, %v1381_v36  ;;  %3194 = vst.msk [vmem:[#allocation2 + $0xb0] sm:$0xff] %vm3170_vm2, %v7123_v23  ;;  %v6543_v29 = vld [vmem:[%s7210_s24 + $0xf9] sm:$0xff] }
 0x20c   : > { %6575 = vmatmul.msk.f32.gmra.mxu3 %vm400_vm1, %v6541_v49  ;;  %3196 = vst.msk [vmem:[#allocation2 + $0xc0] sm:$0xff] %vm3170_vm2, %v7123_v23 }
 0x20d   : > { %10229 = vst [vmem:[#allocation3_spill] sm:$0xff] %v8161_v56 }
 0x20e   : > { %v1069_v33 = vpop.f32.mrf.mxu2  ;;  %3197 = vst.msk [vmem:[#allocation2 + $0xc8] sm:$0xff] %vm3170_vm2, %v7123_v23 }
 0x20f   : > { %v1103_v62 = vadd.f32 %v1069_v33, %v10230_v59  ;;  %v1348_v3 = vpop.f32.mrf.mxu3  ;;  %v2646_v24 = vpop.f32.mrf.mxu0  ;;  %3199 = vst.msk [vmem:[#allocation2 + $0xd8] sm:$0xff] %vm3170_vm2, %v7123_v23 }
 0x210   : > { %3200 = vst.msk [vmem:[#allocation2 + $0xe0] sm:$0xff] %vm3170_vm2, %v7123_v23 }
 0x211   : > { %v1382_v54 = vadd.f32 %v1348_v3, %v1103_v62  ;;  %3202 = vst.msk [vmem:[#allocation2 + $0xf0] sm:$0xff] %vm3170_vm2, %v7123_v23 }
 0x212   : > { %6642 = vmatmul.msk.f32.gmra.mxu0 %vm400_vm1, %v7832_v18  ;;  %3203 = vst.msk [vmem:[#allocation2 + $0xf8] sm:$0xff] %vm3170_vm2, %v7123_v23  ;;  %v8231_v33 = vpop.f32.mrf.mxu1 }
 0x213   : > { %6510 = vmatmul.msk.f32.gmra.mxu2 %vm400_vm1, %v6476_v5  ;;  %v8186_v44 = vadd.f32 %v1626_v31, %v1382_v54  ;;  %v8209_v31 = vld [vmem:[%s10097_s2] ss:$0 sm:$0xff]  ;;  %3205 = vst.msk [vmem:[#allocation2 + $0x108] sm:$0xff] %vm3170_vm2, %v7123_v23 }
 0x214   : > { %6576 = vmatmul.msk.f32.gmra.mxu3 %vm400_vm1, %v6542_v37  ;;  %3206 = vst.msk [vmem:[#allocation2 + $0x110] sm:$0xff] %vm3170_vm2, %v7123_v23  ;;  %v3291_v5 = vld [vmem:[%s10100_s5] sm:$0xff] }
 0x215   : > { %10231 = vst [vmem:[#allocation4_spill] sm:$0xff] %v8186_v44  ;;  %3646 = vmatpush.msrb.mxu2 %v3291_v5  ;;  %v6545_v5 = vld [vmem:[%s7210_s24 + $0x111] sm:$0xff]  ;;  %v6547_v44 = vld [vmem:[%s7210_s24 + $0x129] sm:$0xff] }
 0x216   : > { %v2090_v18 = vpop.f32.mrf.mxu2  ;;  %3208 = vst.msk [vmem:[#allocation2 + $0x120] sm:$0xff] %vm3170_vm2, %v7123_v23 }
 0x217   : > { %v2186_v41 = vadd.f32 %v2090_v18, %v7827_v57  ;;  %v2368_v12 = vpop.f32.mrf.mxu3  ;;  %v2649_v42 = vpop.f32.mrf.mxu0  ;;  %3209 = vst.msk [vmem:[#allocation2 + $0x128] sm:$0xff] %vm3170_vm2, %v7123_v23 }
 0x218   : > { %3211 = vst.msk [vmem:[#allocation2 + $0x138] sm:$0xff] %vm3170_vm2, %v7123_v23 }
 0x219   : > { %v2464_v45 = vadd.f32 %v2368_v12, %v2186_v41  ;;  %3212 = vst.msk [vmem:[#allocation2 + $0x140] sm:$0xff] %vm3170_vm2, %v7123_v23 }
 0x21a   : > { %6643 = vmatmul.msk.f32.gmra.mxu0 %vm400_vm1, %v7847_v22  ;;  %3214 = vst.msk [vmem:[#allocation2 + $0x150] sm:$0xff] %vm3170_vm2, %v7123_v23 }
 0x21b   : > { %v2742_v57 = vadd.f32 %v2646_v24, %v2464_v45  ;;  %6511 = vmatmul.msk.f32.gmra.mxu2 %vm400_vm1, %v6477_v43  ;;  %v6478_v24 = vld [vmem:[%s7210_s24 + $0x108] sm:$0xff]  ;;  %3215 = vst.msk [vmem:[#allocation2 + $0x158] sm:$0xff] %vm3170_vm2, %v7123_v23 }
 0x21c   : > { %6577 = vmatmul.msk.f32.gmra.mxu3 %vm400_vm1, %v6543_v29  ;;  %3217 = vst.msk [vmem:[#allocation2 + $0x168] sm:$0xff] %vm3170_vm2, %v7123_v23 }
 0x21d   : > { %v8225_v36 = vadd.f32 %v8209_v31, %v2742_v57  ;;  %3218 = vst.msk [vmem:[#allocation2 + $0x170] sm:$0xff] %vm3170_vm2, %v7123_v23 }
 0x21e   : > { %v2093_v49 = vpop.f32.mrf.mxu2  ;;  %3220 = vst.msk [vmem:[#allocation2 + $0x180] sm:$0xff] %vm3170_vm2, %v7123_v23 }
 0x21f   : > { %v2842_v22 = vmul.f32 0.044715, %v8225_v36  ;;  %v2187_v59 = vadd.f32 %v2093_v49, %v7842_v2  ;;  %v2371_v62 = vpop.f32.mrf.mxu3  ;;  %v2652_v3 = vpop.f32.mrf.mxu0  ;;  %v6479_v49 = vld [vmem:[%s7210_s24 + $0x110] sm:$0xff]  ;;  %3221 = vst.msk [vmem:[#allocation2 + $0x188] sm:$0xff] %vm3170_vm2, %v7123_v23 }
 0x220   : > { %3223 = vst.msk [vmem:[#allocation2 + $0x198] sm:$0xff] %vm3170_vm2, %v7123_v23 }
 0x221   : > { %v2874_v54 = vmul.f32 %v2842_v22, %v8225_v36  ;;  %v2465_v37 = vadd.f32 %v2371_v62, %v2187_v59  ;;  %v6611_v22 = vld [vmem:[%s7210_s24 + $0x112] sm:$0xff]  ;;  %v8274_v59 = vpop.f32.mrf.mxu1  ;;  %3224 = vst.msk [vmem:[#allocation2 + $0x1a0] sm:$0xff] %vm3170_vm2, %v7123_v23 }
 0x222   : > { %6644 = vmatmul.msk.f32.gmra.mxu0 %vm400_vm1, %v7862_v19  ;;  %3177 = vst.msk [vmem:[#allocation2 + $0x28] sm:$0x3] %vm3173_vm3, %v7123_v23 }
 0x223   : > { %v2906_v2 = vmul.f32 %v2874_v54, %v8225_v36  ;;  %v2743_v18 = vadd.f32 %v2649_v42, %v2465_v37  ;;  %6512 = vmatmul.msk.f32.gmra.mxu2 %vm400_vm1, %v6478_v24  ;;  %3174 = vst.msk [vmem:[#allocation2 + $0x10] sm:$0x3] %vm3173_vm3, %v7123_v23 }
 0x224   : > { %6578 = vmatmul.msk.f32.gmra.mxu3 %vm400_vm1, %v6544_v38  ;;  %3180 = vst.msk [vmem:[#allocation2 + $0x40] sm:$0x3] %vm3173_vm3, %v7123_v23 }
 0x225   : > { %v2938_v41 = vadd.f32 %v2906_v2, %v8225_v36  ;;  %v8262_v12 = vadd.f32 %v8209_v31, %v2743_v18  ;;  %3183 = vst.msk [vmem:[#allocation2 + $0x58] sm:$0x3] %vm3173_vm3, %v7123_v23 }
 0x226   : > { %v2096_v42 = vpop.f32.mrf.mxu2  ;;  %3186 = vst.msk [vmem:[#allocation2 + $0x70] sm:$0x3] %vm3173_vm3, %v7123_v23 }
 0x227   : > { %v2970_v19 = vmul.f32 0.7978846, %v2938_v41  ;;  %v2843_v43 = vmul.f32 0.044715, %v8262_v12  ;;  %v2188_v45 = vadd.f32 %v2096_v42, %v7857_v58  ;;  %v2374_v29 = vpop.f32.mrf.mxu3  ;;  %v2655_v57 = vpop.f32.mrf.mxu0  ;;  %v6723_v58 = vld [vmem:[%s10100_s5 + $0x10] sm:$0xff]  ;;  %v6480_v41 = vld [vmem:[%s7210_s24 + $0x120] sm:$0xff] }
 0x228   : > { %3889 = vmatpush.msrb.mxu3 %v6723_v58  ;;  %3189 = vst.msk [vmem:[#allocation2 + $0x88] sm:$0x3] %vm3173_vm3, %v7123_v23 }
 0x229   : > { %6975 = vtanh.f32 %v2970_v19  ;;  %v2875_v62 = vmul.f32 %v2843_v43, %v8262_v12  ;;  %v2466_v24 = vadd.f32 %v2374_v29, %v2188_v45  ;;  %v2810_v19 = vmul.f32 0.5, %v8225_v36  ;;  %3192 = vst.msk [vmem:[#allocation2 + $0xa0] sm:$0x3] %vm3173_vm3, %v7123_v23 }
 0x22a   : > { %6645 = vmatmul.msk.f32.gmra.mxu0 %vm400_vm1, %v6611_v22  ;;  %3195 = vst.msk [vmem:[#allocation2 + $0xb8] sm:$0x3] %vm3173_vm3, %v7123_v23 }
 0x22b   : > { %v2907_v54 = vmul.f32 %v2875_v62, %v8262_v12  ;;  %v2744_v37 = vadd.f32 %v2652_v3, %v2466_v24  ;;  %6513 = vmatmul.msk.f32.gmra.mxu2 %vm400_vm1, %v6479_v49  ;;  %v8302_v3 = vld [vmem:[%s10098_s3] ss:$0 sm:$0xff]  ;;  %v6612_v49 = vld [vmem:[%s7210_s24 + $0x122] sm:$0xff]  ;;  %v6756_v24 = vld [vmem:[%s10100_s5 + $0x18] sm:$0xff]  ;;  %3198 = vst.msk [vmem:[#allocation2 + $0xd0] sm:$0x3] %vm3173_vm3, %v7123_v23 }
 0x22c   : > { %6579 = vmatmul.msk.f32.gmra.mxu3 %vm400_vm1, %v6545_v5  ;;  %4164 = vmatpush.msrb.mxu0 %v6756_v24  ;;  %v6546_v5 = vld [vmem:[%s7210_s24 + $0x121] sm:$0xff]  ;;  %3201 = vst.msk [vmem:[#allocation2 + $0xe8] sm:$0x3] %vm3173_vm3, %v7123_v23 }
 0x22d   : > { %v2939_v38 = vadd.f32 %v2907_v54, %v8262_v12  ;;  %v8297_v2 = vadd.f32 %v8209_v31, %v2744_v37  ;;  %v8327_v37 = vld [vmem:[%s10099_s4] ss:$0 sm:$0xff]  ;;  %3204 = vst.msk [vmem:[#allocation2 + $0x100] sm:$0x3] %vm3173_vm3, %v7123_v23 }
 0x22e   : > { %v2099_v18 = vpop.f32.mrf.mxu2  ;;  %3207 = vst.msk [vmem:[#allocation2 + $0x118] sm:$0x3] %vm3173_vm3, %v7123_v23 }
 0x22f   : > { %v6976_v42 = vpop.eup %6975  ;;  %v2971_v43 = vmul.f32 0.7978846, %v2939_v38  ;;  %v2189_v45 = vadd.f32 %v2099_v18, %v7872_v13  ;;  %v2377_v29 = vpop.f32.mrf.mxu3  ;;  %v2844_v62 = vmul.f32 0.044715, %v8297_v2  ;;  %v6789_v13 = vld [vmem:[%s10100_s5 + $0x20] sm:$0xff] }
 0x230   : > { %v3034_v22 = vadd.f32 1.0, %v6976_v42  ;;  %v2658_v36 = vpop.f32.mrf.mxu0  ;;  %4439 = vmatpush.msrb.mxu1 %v6789_v13  ;;  %v8332_v18 = vpop.f32.mrf.mxu1  ;;  %v6481_v13 = vld [vmem:[%s7210_s24 + $0x128] sm:$0xff]  ;;  %3210 = vst.msk [vmem:[#allocation2 + $0x130] sm:$0x3] %vm3173_vm3, %v7123_v23 }
 0x231   : > { %6977 = vtanh.f32 %v2971_v43  ;;  %v2467_v58 = vadd.f32 %v2377_v29, %v2189_v45  ;;  %v2876_v38 = vmul.f32 %v2844_v62, %v8297_v2  ;;  %3213 = vst.msk [vmem:[#allocation2 + $0x148] sm:$0x3] %vm3173_vm3, %v7123_v23 }
 0x232   : > { %v3066_v54 = vmul.f32 %v3034_v22, %v2810_v19  ;;  %6646 = vmatmul.msk.f32.gmra.mxu0 %vm400_vm1, %v6612_v49  ;;  %3216 = vst.msk [vmem:[#allocation2 + $0x160] sm:$0x3] %vm3173_vm3, %v7123_v23 }
 0x233   : > { %v2745_v42 = vadd.f32 %v2655_v57, %v2467_v58  ;;  %6514 = vmatmul.msk.f32.gmra.mxu2 %vm400_vm1, %v6480_v41  ;;  %v2908_v43 = vmul.f32 %v2876_v38, %v8297_v2  ;;  %v3293_v57 = vld [vmem:[#allocation2 + $0x9] sm:$0xff]  ;;  %3219 = vst.msk [vmem:[#allocation2 + $0x178] sm:$0x3] %vm3173_vm3, %v7123_v23 }
 0x234   : > { %v3102_v19 = vmul.f32 %v8302_v3, %v3066_v54  ;;  %6580 = vmatmul.msk.f32.gmra.mxu3 %vm400_vm1, %v6546_v5  ;;  %6660 = vmatmul.msk.f32.gmra.mxu1 %vm3170_vm2, %v3293_v57  ;;  %v2811_v5 = vmul.f32 0.5, %v8262_v12  ;;  %3222 = vst.msk [vmem:[#allocation2 + $0x190] sm:$0x3] %vm3173_vm3, %v7123_v23 }
 0x235   : > { %v8346_v45 = vadd.f32 %v8209_v31, %v2745_v42  ;;  %v2940_v29 = vadd.f32 %v2908_v43, %v8297_v2  ;;  %3225 = vst.msk [vmem:[#allocation2 + $0x1a8] sm:$0x3] %vm3173_vm3, %v7123_v23 }
 0x236   : > { %v3138_v41 = vadd.f32 %v8327_v37, %v3102_v19  ;;  %v2102_v49 = vpop.f32.mrf.mxu2  ;;  %v6613_v19 = vld [vmem:[%s7210_s24 + $0x12a] sm:$0xff] }
 0x237   : > { %v6978_v22 = vpop.eup %6977  ;;  %v2845_v62 = vmul.f32 0.044715, %v8346_v45  ;;  %v2190_v24 = vadd.f32 %v2102_v49, %v7885_v20  ;;  %v2380_v58 = vpop.f32.mrf.mxu3  ;;  %v2972_v38 = vmul.f32 0.7978846, %v2940_v29 }
 0x238   : > { %3227 = vst.msk [vmem:[#allocation2 + $0x19] sm:$0xff] %vm3170_vm2, %v3138_v41  ;;  %v3035_v54 = vadd.f32 1.0, %v6978_v22  ;;  %v2661_v42 = vpop.f32.mrf.mxu0  ;;  %v8376_v29 = vpop.f32.mrf.mxu1 }
 0x239   : > { %v2877_v43 = vmul.f32 %v2845_v62, %v8346_v45  ;;  %v2468_v57 = vadd.f32 %v2380_v58, %v2190_v24  ;;  %6979 = vtanh.f32 %v2972_v38  ;;  %v6482_v38 = vld [vmem:[%s7210_s24 + $0x138] sm:$0xff] }
 0x23a   : > { %v3067_v56 = vmul.f32 %v3035_v54, %v2811_v5  ;;  %6647 = vmatmul.msk.f32.gmra.mxu0 %vm400_vm1, %v6613_v19  ;;  %v6614_v19 = vld [vmem:[%s7210_s24 + $0x13a] sm:$0xff] }
 0x23b   : > { %v2909_v20 = vmul.f32 %v2877_v43, %v8346_v45  ;;  %v2746_v12 = vadd.f32 %v2658_v36, %v2468_v57  ;;  %6515 = vmatmul.msk.f32.gmra.mxu2 %vm400_vm1, %v6481_v13  ;;  %v2812_v43 = vmul.f32 0.5, %v8297_v2 }
 0x23c   : > { %v3103_v41 = vmul.f32 %v8302_v3, %v3067_v56  ;;  %6581 = vmatmul.msk.f32.gmra.mxu3 %vm400_vm1, %v6547_v44 }
 0x23d   : > { %v2941_v49 = vadd.f32 %v2909_v20, %v8346_v45  ;;  %v8382_v36 = vadd.f32 %v8209_v31, %v2746_v12  ;;  %v6548_v20 = vld [vmem:[%s7210_s24 + $0x139] sm:$0xff] }
 0x23e   : > { %v3139_v22 = vadd.f32 %v8327_v37, %v3103_v41  ;;  %v2105_v56 = vpop.f32.mrf.mxu2 }
 0x23f   : > { %v2973_v44 = vmul.f32 0.7978846, %v2941_v49  ;;  %v2191_v62 = vadd.f32 %v2105_v56, %v7897_v21  ;;  %v2383_v24 = vpop.f32.mrf.mxu3  ;;  %v3294_v58 = vld [vmem:[#allocation2 + $0x19] sm:$0xff]  ;;  %v6980_v13 = vpop.eup %6979  ;;  %v2846_v5 = vmul.f32 0.044715, %v8382_v36 }
 0x240   : > { %3228 = vst.msk [vmem:[#allocation2 + $0x21] sm:$0xff] %vm3170_vm2, %v3139_v22  ;;  %v2664_v54 = vpop.f32.mrf.mxu0  ;;  %6661 = vmatmul.msk.f32.gmra.mxu1 %vm3170_vm2, %v3294_v58  ;;  %v3036_v57 = vadd.f32 1.0, %v6980_v13 }
 0x241   : > { %6981 = vtanh.f32 %v2973_v44  ;;  %v2469_v23 = vadd.f32 %v2383_v24, %v2191_v62  ;;  %v2878_v21 = vmul.f32 %v2846_v5, %v8382_v36 }
 0x242   : > { %v3068_v12 = vmul.f32 %v3036_v57, %v2812_v43  ;;  %6648 = vmatmul.msk.f32.gmra.mxu0 %vm400_vm1, %v6614_v19  ;;  %v2813_v19 = vmul.f32 0.5, %v8346_v45 }
 0x243   : > { %v2747_v41 = vadd.f32 %v2661_v42, %v2469_v23  ;;  %6516 = vmatmul.msk.f32.gmra.mxu2 %vm400_vm1, %v6482_v38  ;;  %v2910_v49 = vmul.f32 %v2878_v21, %v8382_v36  ;;  %v8407_v42 = vpop.f32.mrf.mxu1  ;;  %v6615_v21 = vld [vmem:[%s7210_s24 + $0x142] sm:$0xff] }
 0x244   : > { %6582 = vmatmul.msk.f32.gmra.mxu3 %vm400_vm1, %v6548_v20  ;;  %v3104_v22 = vmul.f32 %v8302_v3, %v3068_v12  ;;  %v6483_v20 = vld [vmem:[%s7210_s24 + $0x140] sm:$0xff] }
 0x245   : > { %v8404_v2 = vadd.f32 %v8209_v31, %v2747_v41  ;;  %v2942_v56 = vadd.f32 %v2910_v49, %v8382_v36  ;;  %v6549_v49 = vld [vmem:[%s7210_s24 + $0x141] sm:$0xff] }
 0x246   : > { %v2108_v44 = vpop.f32.mrf.mxu2  ;;  %v3140_v24 = vadd.f32 %v8327_v37, %v3104_v22 }
 0x247   : > { %v6982_v62 = vpop.eup %6981  ;;  %v2847_v58 = vmul.f32 0.044715, %v8404_v2  ;;  %v2192_v13 = vadd.f32 %v2108_v44, %v7908_v55  ;;  %v2386_v5 = vpop.f32.mrf.mxu3  ;;  %v3295_v38 = vld [vmem:[#allocation2 + $0x21] sm:$0xff]  ;;  %v2974_v57 = vmul.f32 0.7978846, %v2942_v56 }
 0x248   : > { %v3037_v43 = vadd.f32 1.0, %v6982_v62  ;;  %v2667_v23 = vpop.f32.mrf.mxu0  ;;  %6662 = vmatmul.msk.f32.gmra.mxu1 %vm3170_vm2, %v3295_v38  ;;  %3229 = vst.msk [vmem:[#allocation2 + $0x31] sm:$0xff] %vm3170_vm2, %v3140_v24 }
 0x249   : > { %v2879_v12 = vmul.f32 %v2847_v58, %v8404_v2  ;;  %v2470_v41 = vadd.f32 %v2386_v5, %v2192_v13  ;;  %6983 = vtanh.f32 %v2974_v57 }
 0x24a   : > { %v3069_v22 = vmul.f32 %v3037_v43, %v2813_v19  ;;  %6649 = vmatmul.msk.f32.gmra.mxu0 %vm400_vm1, %v6615_v21  ;;  %v2814_v43 = vmul.f32 0.5, %v8382_v36  ;;  %v6484_v21 = vld [vmem:[%s7210_s24 + $0x150] sm:$0xff] }
 0x24b   : > { %v2911_v55 = vmul.f32 %v2879_v12, %v8404_v2  ;;  %v2748_v44 = vadd.f32 %v2664_v54, %v2470_v41  ;;  %6517 = vmatmul.msk.f32.gmra.mxu2 %vm400_vm1, %v6483_v20  ;;  %v6616_v12 = vld [vmem:[%s7210_s24 + $0x152] sm:$0xff]  ;;  %v8435_v41 = vpop.f32.mrf.mxu1 }
 0x24c   : > { %v3105_v45 = vmul.f32 %v8302_v3, %v3069_v22  ;;  %6583 = vmatmul.msk.f32.gmra.mxu3 %vm400_vm1, %v6549_v49 }
 0x24d   : > { %v2943_v56 = vadd.f32 %v2911_v55, %v8404_v2  ;;  %v8426_v62 = vadd.f32 %v8209_v31, %v2748_v44 }
 0x24e   : > { %v3141_v24 = vadd.f32 %v8327_v37, %v3105_v45  ;;  %v2111_v58 = vpop.f32.mrf.mxu2 }
 0x24f   : > { %v2975_v13 = vmul.f32 0.7978846, %v2943_v56  ;;  %v2848_v54 = vmul.f32 0.044715, %v8426_v62  ;;  %v2193_v5 = vadd.f32 %v2111_v58, %v7919_v25  ;;  %v2389_v38 = vpop.f32.mrf.mxu3  ;;  %v6984_v19 = vpop.eup %6983  ;;  %v3296_v20 = vld [vmem:[#allocation2 + $0x31] sm:$0xff] }
 0x250   : > { %3230 = vst.msk [vmem:[#allocation2 + $0x39] sm:$0xff] %vm3170_vm2, %v3141_v24  ;;  %v2670_v57 = vpop.f32.mrf.mxu0  ;;  %v3038_v49 = vadd.f32 1.0, %v6984_v19  ;;  %6663 = vmatmul.msk.f32.gmra.mxu1 %vm3170_vm2, %v3296_v20  ;;  %v6550_v25 = vld [vmem:[%s7210_s24 + $0x151] sm:$0xff] }
 0x251   : > { %6985 = vtanh.f32 %v2975_v13  ;;  %v2880_v22 = vmul.f32 %v2848_v54, %v8426_v62  ;;  %v2471_v55 = vadd.f32 %v2389_v38, %v2193_v5  ;;  %v1915_v13 = vadd.f32 %v8046_v16, %v7926_v46  ;;  %v6551_v16 = vld [vmem:[%s7210_s24 + $0x159] sm:$0xff] }
 0x252   : > { %v3070_v44 = vmul.f32 %v3038_v49, %v2814_v43  ;;  %6650 = vmatmul.msk.f32.gmra.mxu0 %vm400_vm1, %v6616_v12 }
 0x253   : > { %v2912_v45 = vmul.f32 %v2880_v22, %v8426_v62  ;;  %v2749_v56 = vadd.f32 %v2667_v23, %v2471_v55  ;;  %6518 = vmatmul.msk.f32.gmra.mxu2 %vm400_vm1, %v6484_v21  ;;  %v2815_v21 = vmul.f32 0.5, %v8404_v2  ;;  %v6485_v55 = vld [vmem:[%s7210_s24 + $0x158] sm:$0xff] }
 0x254   : > { %6584 = vmatmul.msk.f32.gmra.mxu3 %vm400_vm1, %v6550_v25  ;;  %v3106_v36 = vmul.f32 %v8302_v3, %v3070_v44  ;;  %v6617_v25 = vld [vmem:[%s7210_s24 + $0x15a] sm:$0xff] }
 0x255   : > { %v2944_v24 = vadd.f32 %v2912_v45, %v8426_v62  ;;  %v8447_v58 = vadd.f32 %v8209_v31, %v2749_v56  ;;  %v8460_v56 = vpop.f32.mrf.mxu1 }
 0x256   : > { %v2114_v54 = vpop.f32.mrf.mxu2  ;;  %v3142_v5 = vadd.f32 %v8327_v37, %v3106_v36 }
 0x257   : > { %v6986_v23 = vpop.eup %6985  ;;  %v2976_v38 = vmul.f32 0.7978846, %v2944_v24  ;;  %v2849_v19 = vmul.f32 0.044715, %v8447_v58  ;;  %v2392_v43 = vpop.f32.mrf.mxu3  ;;  %v3297_v20 = vld [vmem:[#allocation2 + $0x39] sm:$0xff]  ;;  %v2194_v49 = vadd.f32 %v2114_v54, %v1915_v13  ;;  %v1916_v13 = vadd.f32 %v8063_v14, %v7937_v50 }
 0x258   : > { %v3039_v12 = vadd.f32 1.0, %v6986_v23  ;;  %v2673_v22 = vpop.f32.mrf.mxu0  ;;  %3231 = vst.msk [vmem:[#allocation2 + $0x49] sm:$0xff] %vm3170_vm2, %v3142_v5  ;;  %6664 = vmatmul.msk.f32.gmra.mxu1 %vm3170_vm2, %v3297_v20 }
 0x259   : > { %6987 = vtanh.f32 %v2976_v38  ;;  %v2881_v46 = vmul.f32 %v2849_v19, %v8447_v58  ;;  %v2472_v45 = vadd.f32 %v2392_v43, %v2194_v49  ;;  %v2816_v49 = vmul.f32 0.5, %v8426_v62 }
 0x25a   : > { %v3071_v44 = vmul.f32 %v3039_v12, %v2815_v21  ;;  %6651 = vmatmul.msk.f32.gmra.mxu0 %vm400_vm1, %v6617_v25  ;;  %v6486_v12 = vld [vmem:[%s7210_s24 + $0x168] sm:$0xff] }
 0x25b   : > { %v2913_v2 = vmul.f32 %v2881_v46, %v8447_v58  ;;  %6519 = vmatmul.msk.f32.gmra.mxu2 %vm400_vm1, %v6485_v55  ;;  %v2750_v24 = vadd.f32 %v2670_v57, %v2472_v45  ;;  %v6618_v57 = vld [vmem:[%s7210_s24 + $0x16a] sm:$0xff] }
 0x25c   : > { %v3107_v36 = vmul.f32 %v8302_v3, %v3071_v44  ;;  %6585 = vmatmul.msk.f32.gmra.mxu3 %vm400_vm1, %v6551_v16  ;;  %v6552_v16 = vld [vmem:[%s7210_s24 + $0x169] sm:$0xff] }
 0x25d   : > { %v2945_v54 = vadd.f32 %v2913_v2, %v8447_v58  ;;  %v8472_v5 = vadd.f32 %v8209_v31, %v2750_v24  ;;  %v1917_v24 = vadd.f32 %v8074_v53, %v7948_v10  ;;  %v2817_v10 = vmul.f32 0.5, %v8447_v58 }
 0x25e   : > { %v3143_v23 = vadd.f32 %v8327_v37, %v3107_v36  ;;  %v2117_v38 = vpop.f32.mrf.mxu2 }
 0x25f   : > { %v6988_v19 = vpop.eup %6987  ;;  %v2977_v43 = vmul.f32 0.7978846, %v2945_v54  ;;  %v2195_v20 = vadd.f32 %v2117_v38, %v1916_v13  ;;  %v2395_v21 = vpop.f32.mrf.mxu3  ;;  %v2850_v14 = vmul.f32 0.044715, %v8472_v5  ;;  %v3298_v25 = vld [vmem:[#allocation2 + $0x49] sm:$0xff] }
 0x260   : > { %3232 = vst.msk [vmem:[#allocation2 + $0x51] sm:$0xff] %vm3170_vm2, %v3143_v23  ;;  %v3040_v50 = vadd.f32 1.0, %v6988_v19  ;;  %v2676_v55 = vpop.f32.mrf.mxu0  ;;  %6665 = vmatmul.msk.f32.gmra.mxu1 %vm3170_vm2, %v3298_v25  ;;  %v8489_v13 = vpop.f32.mrf.mxu1 }
 0x261   : > { %6989 = vtanh.f32 %v2977_v43  ;;  %v2473_v46 = vadd.f32 %v2395_v21, %v2195_v20  ;;  %v2882_v45 = vmul.f32 %v2850_v14, %v8472_v5  ;;  %v6619_v14 = vld [vmem:[%s7210_s24 + $0x172] sm:$0xff] }
 0x262   : > { %v3072_v44 = vmul.f32 %v3040_v50, %v2816_v49  ;;  %6652 = vmatmul.msk.f32.gmra.mxu0 %vm400_vm1, %v6618_v57  ;;  %v6487_v57 = vld [vmem:[%s7210_s24 + $0x170] sm:$0xff] }
 0x263   : > { %v2751_v2 = vadd.f32 %v2673_v22, %v2473_v46  ;;  %6520 = vmatmul.msk.f32.gmra.mxu2 %vm400_vm1, %v6486_v12  ;;  %v2914_v36 = vmul.f32 %v2882_v45, %v8472_v5 }
 0x264   : > { %v3108_v62 = vmul.f32 %v8302_v3, %v3072_v44  ;;  %6586 = vmatmul.msk.f32.gmra.mxu3 %vm400_vm1, %v6552_v16  ;;  %v6553_v16 = vld [vmem:[%s7210_s24 + $0x171] sm:$0xff] }
 0x265   : > { %v8492_v54 = vadd.f32 %v8209_v31, %v2751_v2  ;;  %v2946_v23 = vadd.f32 %v2914_v36, %v8472_v5 }
 0x266   : > { %v3144_v22 = vadd.f32 %v8327_v37, %v3108_v62  ;;  %v2120_v38 = vpop.f32.mrf.mxu2  ;;  %v1918_v62 = vadd.f32 %v8087_v0, %v7959_v8  ;;  %v2818_v8 = vmul.f32 0.5, %v8472_v5 }
 0x267   : > { %v6990_v19 = vpop.eup %6989  ;;  %v2851_v43 = vmul.f32 0.044715, %v8492_v54  ;;  %v2196_v20 = vadd.f32 %v2120_v38, %v1917_v24  ;;  %v2398_v21 = vpop.f32.mrf.mxu3  ;;  %v3299_v12 = vld [vmem:[#allocation2 + $0x51] sm:$0xff]  ;;  %v2978_v49 = vmul.f32 0.7978846, %v2946_v23 }
 0x268   : > { %3233 = vst.msk [vmem:[#allocation2 + $0x61] sm:$0xff] %vm3170_vm2, %v3144_v22  ;;  %v3041_v53 = vadd.f32 1.0, %v6990_v19  ;;  %v2679_v50 = vpop.f32.mrf.mxu0  ;;  %6666 = vmatmul.msk.f32.gmra.mxu1 %vm3170_vm2, %v3299_v12  ;;  %v8516_v23 = vpop.f32.mrf.mxu1 }
 0x269   : > { %v2883_v25 = vmul.f32 %v2851_v43, %v8492_v54  ;;  %v2474_v46 = vadd.f32 %v2398_v21, %v2196_v20  ;;  %6991 = vtanh.f32 %v2978_v49 }
 0x26a   : > { %v3073_v44 = vmul.f32 %v3041_v53, %v2817_v10  ;;  %6653 = vmatmul.msk.f32.gmra.mxu0 %vm400_vm1, %v6619_v14  ;;  %v6620_v10 = vld [vmem:[%s7210_s24 + $0x182] sm:$0xff] }
 0x26b   : > { %v2915_v45 = vmul.f32 %v2883_v25, %v8492_v54  ;;  %v2752_v2 = vadd.f32 %v2676_v55, %v2474_v46  ;;  %6521 = vmatmul.msk.f32.gmra.mxu2 %vm400_vm1, %v6487_v57  ;;  %v6488_v57 = vld [vmem:[%s7210_s24 + $0x180] sm:$0xff] }
 0x26c   : > { %v3109_v58 = vmul.f32 %v8302_v3, %v3073_v44  ;;  %6587 = vmatmul.msk.f32.gmra.mxu3 %vm400_vm1, %v6553_v16  ;;  %v6554_v25 = vld [vmem:[%s7210_s24 + $0x181] sm:$0xff] }
 0x26d   : > { %v2947_v36 = vadd.f32 %v2915_v45, %v8492_v54  ;;  %v8513_v24 = vadd.f32 %v8209_v31, %v2752_v2 }
 0x26e   : > { %v3145_v55 = vadd.f32 %v8327_v37, %v3109_v58  ;;  %v2123_v22 = vpop.f32.mrf.mxu2  ;;  %v1919_v58 = vadd.f32 %v8099_v63, %v7970_v32  ;;  %v6555_v63 = vld [vmem:[%s7210_s24 + $0x189] sm:$0xff] }
 0x26f   : > { %v2979_v38 = vmul.f32 0.7978846, %v2947_v36  ;;  %v2852_v19 = vmul.f32 0.044715, %v8513_v24  ;;  %v2197_v43 = vadd.f32 %v2123_v22, %v1918_v62  ;;  %v2401_v20 = vpop.f32.mrf.mxu3  ;;  %v3300_v21 = vld [vmem:[#allocation2 + $0x61] sm:$0xff]  ;;  %v6992_v12 = vpop.eup %6991 }
 0x270   : > { %3234 = vst.msk [vmem:[#allocation2 + $0x69] sm:$0xff] %vm3170_vm2, %v3145_v55  ;;  %v2682_v0 = vpop.f32.mrf.mxu0  ;;  %v3042_v53 = vadd.f32 1.0, %v6992_v12  ;;  %6667 = vmatmul.msk.f32.gmra.mxu1 %vm3170_vm2, %v3300_v21 }
 0x271   : > { %6993 = vtanh.f32 %v2979_v38  ;;  %v2884_v49 = vmul.f32 %v2852_v19, %v8513_v24  ;;  %v2475_v14 = vadd.f32 %v2401_v20, %v2197_v43  ;;  %v2819_v43 = vmul.f32 0.5, %v8492_v54 }
 0x272   : > { %v3074_v46 = vmul.f32 %v3042_v53, %v2818_v8  ;;  %6654 = vmatmul.msk.f32.gmra.mxu0 %vm400_vm1, %v6620_v10  ;;  %v6489_v8 = vld [vmem:[%s7210_s24 + $0x188] sm:$0xff]  ;;  %v8542_v10 = vpop.f32.mrf.mxu1 }
 0x273   : > { %v2916_v16 = vmul.f32 %v2884_v49, %v8513_v24  ;;  %v2753_v44 = vadd.f32 %v2679_v50, %v2475_v14  ;;  %6522 = vmatmul.msk.f32.gmra.mxu2 %vm400_vm1, %v6488_v57  ;;  %v6621_v57 = vld [vmem:[%s7210_s24 + $0x18a] sm:$0xff] }
 0x274   : > { %6588 = vmatmul.msk.f32.gmra.mxu3 %vm400_vm1, %v6554_v25  ;;  %v3110_v5 = vmul.f32 %v8302_v3, %v3074_v46  ;;  %v1920_v46 = vadd.f32 %v8116_v27, %v7982_v15 }
 0x275   : > { %v2948_v45 = vadd.f32 %v2916_v16, %v8513_v24  ;;  %v8533_v2 = vadd.f32 %v8209_v31, %v2753_v44 }
 0x276   : > { %v2126_v62 = vpop.f32.mrf.mxu2  ;;  %v3146_v36 = vadd.f32 %v8327_v37, %v3110_v5 }
 0x277   : > { %v6994_v50 = vpop.eup %6993  ;;  %v2980_v55 = vmul.f32 0.7978846, %v2948_v45  ;;  %v2853_v22 = vmul.f32 0.044715, %v8533_v2  ;;  %v2404_v38 = vpop.f32.mrf.mxu3  ;;  %v3301_v19 = vld [vmem:[#allocation2 + $0x69] sm:$0xff]  ;;  %v2198_v21 = vadd.f32 %v2126_v62, %v1919_v58 }
 0x278   : > { %v3043_v20 = vadd.f32 1.0, %v6994_v50  ;;  %v2685_v12 = vpop.f32.mrf.mxu0  ;;  %3235 = vst.msk [vmem:[#allocation2 + $0x79] sm:$0xff] %vm3170_vm2, %v3146_v36  ;;  %6668 = vmatmul.msk.f32.gmra.mxu1 %vm3170_vm2, %v3301_v19 }
 0x279   : > { %6995 = vtanh.f32 %v2980_v55  ;;  %v2885_v32 = vmul.f32 %v2853_v22, %v8533_v2  ;;  %v2476_v49 = vadd.f32 %v2404_v38, %v2198_v21  ;;  %v6490_v55 = vld [vmem:[%s7210_s24 + $0x198] sm:$0xff]  ;;  %v2820_v22 = vmul.f32 0.5, %v8513_v24 }
 0x27a   : > { %v3075_v53 = vmul.f32 %v3043_v20, %v2819_v43  ;;  %6655 = vmatmul.msk.f32.gmra.mxu0 %vm400_vm1, %v6621_v57  ;;  %v6556_v20 = vld [vmem:[%s7210_s24 + $0x199] sm:$0xff]  ;;  %v8568_v57 = vpop.f32.mrf.mxu1 }
 0x27b   : > { %v2917_v54 = vmul.f32 %v2885_v32, %v8533_v2  ;;  %6523 = vmatmul.msk.f32.gmra.mxu2 %vm400_vm1, %v6489_v8  ;;  %v2754_v25 = vadd.f32 %v2682_v0, %v2476_v49  ;;  %v6622_v0 = vld [vmem:[%s7210_s24 + $0x19a] sm:$0xff] }
 0x27c   : > { %v3111_v14 = vmul.f32 %v8302_v3, %v3075_v53  ;;  %6589 = vmatmul.msk.f32.gmra.mxu3 %vm400_vm1, %v6555_v63  ;;  %v1921_v53 = vadd.f32 %v8127_v47, %v7993_v34  ;;  %v2821_v34 = vmul.f32 0.5, %v8533_v2 }
 0x27d   : > { %v2949_v16 = vadd.f32 %v2917_v54, %v8533_v2  ;;  %v8558_v5 = vadd.f32 %v8209_v31, %v2754_v25 }
 0x27e   : > { %v3147_v44 = vadd.f32 %v8327_v37, %v3111_v14  ;;  %v2129_v45 = vpop.f32.mrf.mxu2 }
 0x27f   : > { %v6996_v58 = vpop.eup %6995  ;;  %v2981_v62 = vmul.f32 0.7978846, %v2949_v16  ;;  %v2199_v50 = vadd.f32 %v2129_v45, %v1920_v46  ;;  %v2407_v36 = vpop.f32.mrf.mxu3  ;;  %v2854_v27 = vmul.f32 0.044715, %v8558_v5  ;;  %v3302_v19 = vld [vmem:[#allocation2 + $0x79] sm:$0xff] }
 0x280   : > { %3236 = vst.msk [vmem:[#allocation2 + $0x81] sm:$0xff] %vm3170_vm2, %v3147_v44  ;;  %v3044_v15 = vadd.f32 1.0, %v6996_v58  ;;  %v2688_v38 = vpop.f32.mrf.mxu0  ;;  %6669 = vmatmul.msk.f32.gmra.mxu1 %vm3170_vm2, %v3302_v19  ;;  %v6491_v58 = vld [vmem:[%s7210_s24 + $0x1a0] sm:$0xff] }
 0x281   : > { %6997 = vtanh.f32 %v2981_v62  ;;  %v2477_v43 = vadd.f32 %v2407_v36, %v2199_v50  ;;  %v2886_v8 = vmul.f32 %v2854_v27, %v8558_v5  ;;  %v6623_v36 = vld [vmem:[%s7210_s24 + $0x1a2] sm:$0xff] }
 0x282   : > { %v3076_v21 = vmul.f32 %v3044_v15, %v2820_v22  ;;  %6656 = vmatmul.msk.f32.gmra.mxu0 %vm400_vm1, %v6622_v0  ;;  %v6557_v22 = vld [vmem:[%s7210_s24 + $0x1a1] sm:$0xff] }
 0x283   : > { %v2755_v32 = vadd.f32 %v2685_v12, %v2477_v43  ;;  %6524 = vmatmul.msk.f32.gmra.mxu2 %vm400_vm1, %v6490_v55  ;;  %v2918_v63 = vmul.f32 %v2886_v8, %v8558_v5  ;;  %v1922_v43 = vadd.f32 %v8140_v39, %v8004_v26  ;;  %v2822_v26 = vmul.f32 0.5, %v8558_v5 }
 0x284   : > { %v3112_v24 = vmul.f32 %v8302_v3, %v3076_v21  ;;  %6590 = vmatmul.msk.f32.gmra.mxu3 %vm400_vm1, %v6556_v20  ;;  %v8597_v20 = vpop.f32.mrf.mxu1 }
 0x285   : > { %v8578_v49 = vadd.f32 %v8209_v31, %v2755_v32  ;;  %v2950_v54 = vadd.f32 %v2918_v63, %v8558_v5 }
 0x286   : > { %v3148_v12 = vadd.f32 %v8327_v37, %v3112_v24  ;;  %v2132_v14 = vpop.f32.mrf.mxu2 }
 0x287   : > { %v6998_v25 = vpop.eup %6997  ;;  %v2855_v46 = vmul.f32 0.044715, %v8578_v49  ;;  %v2200_v16 = vadd.f32 %v2132_v14, %v1921_v53  ;;  %v2410_v44 = vpop.f32.mrf.mxu3  ;;  %v3303_v45 = vld [vmem:[#allocation2 + $0x81] sm:$0xff]  ;;  %v2982_v62 = vmul.f32 0.7978846, %v2950_v54 }
 0x288   : > { %3237 = vst.msk [vmem:[#allocation2 + $0x91] sm:$0xff] %vm3170_vm2, %v3148_v12  ;;  %v3045_v47 = vadd.f32 1.0, %v6998_v25  ;;  %v2691_v50 = vpop.f32.mrf.mxu0  ;;  %6670 = vmatmul.msk.f32.gmra.mxu1 %vm3170_vm2, %v3303_v45  ;;  %v3259_v25 = vld [vmem:[#allocation2] sm:$0xff] }
 0x289   : > { %v2887_v55 = vmul.f32 %v2855_v46, %v8578_v49  ;;  %v2478_v0 = vadd.f32 %v2410_v44, %v2200_v16  ;;  %6999 = vtanh.f32 %v2982_v62  ;;  %v3744_v45 = vld [vmem:[#allocation2 + $0x2] sm:$0xff] }
 0x28a   : > { %v3077_v15 = vmul.f32 %v3045_v47, %v2821_v34  ;;  %6657 = vmatmul.msk.f32.gmra.mxu0 %vm400_vm1, %v6623_v36 }
 0x28b   : > { %v2919_v27 = vmul.f32 %v2887_v55, %v8578_v49  ;;  %v2756_v19 = vadd.f32 %v2688_v38, %v2478_v0  ;;  %6525 = vmatmul.msk.f32.gmra.mxu2 %vm400_vm1, %v6491_v58  ;;  %v4019_v58 = vld [vmem:[#allocation2 + $0x18] sm:$0xff]  ;;  %v1923_v0 = vadd.f32 %v8156_v61, %v8013_v60  ;;  %v3745_v61 = vld [vmem:[#allocation2 + $0xa] sm:$0xff] }
 0x28c   : > { %v3113_v2 = vmul.f32 %v8302_v3, %v3077_v15  ;;  %6591 = vmatmul.msk.f32.gmra.mxu3 %vm400_vm1, %v6557_v22 }
 0x28d   : > { %v2951_v21 = vadd.f32 %v2919_v27, %v8578_v49  ;;  %v8601_v8 = vadd.f32 %v8209_v31, %v2756_v19  ;;  %v8620_v27 = vpop.f32.mrf.mxu1 }
 0x28e   : > { %v3149_v38 = vadd.f32 %v8327_v37, %v3113_v2  ;;  %v2135_v32 = vpop.f32.mrf.mxu2 }
 0x28f   : > { %v2983_v24 = vmul.f32 0.7978846, %v2951_v21  ;;  %v2856_v63 = vmul.f32 0.044715, %v8601_v8  ;;  %v2201_v53 = vadd.f32 %v2135_v32, %v1922_v43  ;;  %v2413_v12 = vpop.f32.mrf.mxu3  ;;  %v3304_v54 = vld [vmem:[#allocation2 + $0x91] sm:$0xff]  ;;  %v7000_v14 = vpop.eup %6999 }
 0x290   : > { %3238 = vst.msk [vmem:[#allocation2 + $0x99] sm:$0xff] %vm3170_vm2, %v3149_v38  ;;  %v2694_v39 = vpop.f32.mrf.mxu0  ;;  %v3046_v46 = vadd.f32 1.0, %v7000_v14  ;;  %6671 = vmatmul.msk.f32.gmra.mxu1 %vm3170_vm2, %v3304_v54  ;;  %v2823_v38 = vmul.f32 0.5, %v8578_v49  ;;  %v4020_v14 = vld [vmem:[#allocation2 + $0x20] sm:$0xff] }
 0x291   : > { %7001 = vtanh.f32 %v2983_v24  ;;  %v2888_v16 = vmul.f32 %v2856_v63, %v8601_v8  ;;  %v2479_v44 = vadd.f32 %v2413_v12, %v2201_v53  ;;  %v3260_v53 = vld [vmem:[#allocation2 + $0x8] sm:$0xff] }
 0x292   : > { %v3078_v34 = vmul.f32 %v3046_v46, %v2822_v26  ;;  %6757 = vmatmul.msk.f32.vlgmr.msrb.gmra.mxu0 %vm3170_vm2, %v4019_v58  ;;  %v1924_v46 = vadd.f32 %v8194_v28, %v8022_v1 }
 0x293   : > { %v2920_v47 = vmul.f32 %v2888_v16, %v8601_v8  ;;  %v2757_v62 = vadd.f32 %v2691_v50, %v2479_v44  ;;  %6691 = vmatmul.msk.f32.vlgmr.msrb.gmra.mxu2 %vm3170_vm2, %v3259_v25 }
 0x294   : > { %6724 = vmatmul.msk.f32.vlgmr.msrb.gmra.mxu3 %vm3170_vm2, %v3744_v45  ;;  %v3114_v5 = vmul.f32 %v8302_v3, %v3078_v34 }
 0x295   : > { %v2952_v36 = vadd.f32 %v2920_v47, %v8601_v8  ;;  %v8616_v55 = vadd.f32 %v8209_v31, %v2757_v62 }
 0x296   : > { %v2138_v22 = vpop.f32.mrf.mxu2  ;;  %v3150_v50 = vadd.f32 %v8327_v37, %v3114_v5 }
 0x297   : > { %v7002_v15 = vpop.eup %7001  ;;  %v2984_v19 = vmul.f32 0.7978846, %v2952_v36  ;;  %v2857_v2 = vmul.f32 0.044715, %v8616_v55  ;;  %v2416_v43 = vpop.f32.mrf.mxu3  ;;  %v3305_v21 = vld [vmem:[#allocation2 + $0x99] sm:$0xff]  ;;  %v2202_v24 = vadd.f32 %v2138_v22, %v1923_v0 }
 0x298   : > { %v3047_v32 = vadd.f32 1.0, %v7002_v15  ;;  %v2697_v63 = vpop.f32.mrf.mxu0  ;;  %3239 = vst.msk [vmem:[#allocation2 + $0xa9] sm:$0xff] %vm3170_vm2, %v3150_v50  ;;  %6672 = vmatmul.msk.f32.gmra.mxu1 %vm3170_vm2, %v3305_v21  ;;  %v8643_v15 = vpop.f32.mrf.mxu1  ;;  %v3746_v21 = vld [vmem:[#allocation2 + $0x1a] sm:$0xff] }
 0x299   : > { %7003 = vtanh.f32 %v2984_v19  ;;  %v2889_v60 = vmul.f32 %v2857_v2, %v8616_v55  ;;  %v2480_v54 = vadd.f32 %v2416_v43, %v2202_v24  ;;  %v4021_v2 = vld [vmem:[#allocation2 + $0x30] sm:$0xff]  ;;  %v8657_v24 = vld [vmem:[%s10097_s2] ss:$0 sm:$0xff] }
 0x29a   : > { %v3079_v12 = vmul.f32 %v3047_v32, %v2823_v38  ;;  %6758 = vmatmul.msk.f32.gmra.mxu0 %vm3170_vm2, %v4020_v14  ;;  %v1925_v32 = vadd.f32 %v8231_v33, %v8031_v51  ;;  %v2825_v51 = vmul.f32 0.5, %v8616_v55 }
 0x29b   : > { %v2921_v26 = vmul.f32 %v2889_v60, %v8616_v55  ;;  %6692 = vmatmul.msk.f32.gmra.mxu2 %vm3170_vm2, %v3260_v53  ;;  %v2758_v25 = vadd.f32 %v2694_v39, %v2480_v54  ;;  %v2824_v39 = vmul.f32 0.5, %v8601_v8 }
 0x29c   : > { %v3115_v49 = vmul.f32 %v8302_v3, %v3079_v12  ;;  %6725 = vmatmul.msk.f32.gmra.mxu3 %vm3170_vm2, %v3745_v61 }
 0x29d   : > { %v2953_v16 = vadd.f32 %v2921_v26, %v8616_v55  ;;  %v8638_v45 = vadd.f32 %v8209_v31, %v2758_v25 }
 0x29e   : > { %v3151_v44 = vadd.f32 %v8327_v37, %v3115_v49  ;;  %v2141_v34 = vpop.f32.mrf.mxu2 }
 0x29f   : > { %v7004_v47 = vpop.eup %7003  ;;  %v2985_v62 = vmul.f32 0.7978846, %v2953_v16  ;;  %v2203_v5 = vadd.f32 %v2141_v34, %v1924_v46  ;;  %v2419_v36 = vpop.f32.mrf.mxu3  ;;  %v2858_v22 = vmul.f32 0.044715, %v8638_v45  ;;  %v3306_v28 = vld [vmem:[#allocation2 + $0xa9] sm:$0xff] }
 0x2a0   : > { %3240 = vst.msk [vmem:[#allocation2 + $0xb1] sm:$0xff] %vm3170_vm2, %v3151_v44  ;;  %v3048_v0 = vadd.f32 1.0, %v7004_v47  ;;  %v2700_v1 = vpop.f32.mrf.mxu0  ;;  %6673 = vmatmul.msk.f32.gmra.mxu1 %vm3170_vm2, %v3306_v28  ;;  %v8669_v34 = vpop.f32.mrf.mxu1 }
 0x2a1   : > { %7005 = vtanh.f32 %v2985_v62  ;;  %v2481_v50 = vadd.f32 %v2419_v36, %v2203_v5  ;;  %v2890_v19 = vmul.f32 %v2858_v22, %v8638_v45  ;;  %v4022_v62 = vld [vmem:[#allocation2 + $0x38] sm:$0xff] }
 0x2a2   : > { %v3080_v31 = vmul.f32 %v3048_v0, %v2824_v39  ;;  %6759 = vmatmul.msk.f32.gmra.mxu0 %vm3170_vm2, %v4021_v2  ;;  %v3747_v39 = vld [vmem:[#allocation2 + $0x22] sm:$0xff]  ;;  %v1926_v0 = vadd.f32 %v8274_v59, %v8040_v11 }
 0x2a3   : > { %v2759_v43 = vadd.f32 %v2697_v63, %v2481_v50  ;;  %6693 = vmatmul.msk.f32.gmra.mxu2 %vm3170_vm2, %v4019_v58  ;;  %v2922_v38 = vmul.f32 %v2890_v19, %v8638_v45 }
 0x2a4   : > { %v3116_v8 = vmul.f32 %v8302_v3, %v3080_v31  ;;  %6726 = vmatmul.msk.f32.gmra.mxu3 %vm3170_vm2, %v3746_v21 }
 0x2a5   : > { %v8660_v63 = vadd.f32 %v8657_v24, %v2759_v43  ;;  %v2954_v53 = vadd.f32 %v2922_v38, %v8638_v45 }
 0x2a6   : > { %v3152_v58 = vadd.f32 %v8327_v37, %v3116_v8  ;;  %v2144_v60 = vpop.f32.mrf.mxu2  ;;  %v2826_v8 = vmul.f32 0.5, %v8638_v45 }
 0x2a7   : > { %v7006_v61 = vpop.eup %7005  ;;  %v2859_v12 = vmul.f32 0.044715, %v8660_v63  ;;  %v2204_v54 = vadd.f32 %v2144_v60, %v1925_v32  ;;  %v2422_v26 = vpop.f32.mrf.mxu3  ;;  %v3307_v49 = vld [vmem:[#allocation2 + $0xb1] sm:$0xff]  ;;  %v2986_v25 = vmul.f32 0.7978846, %v2954_v53 }
 0x2a8   : > { %3241 = vst.msk [vmem:[#allocation2 + $0xc1] sm:$0xff] %vm3170_vm2, %v3152_v58  ;;  %v3049_v33 = vadd.f32 1.0, %v7006_v61  ;;  %v2703_v46 = vpop.f32.mrf.mxu0  ;;  %6674 = vmatmul.msk.f32.gmra.mxu1 %vm3170_vm2, %v3307_v49  ;;  %v8688_v58 = vld [vmem:[#allocation2 + $0x48] sm:$0xff] }
 0x2a9   : > { %v2891_v16 = vmul.f32 %v2859_v12, %v8660_v63  ;;  %v2482_v44 = vadd.f32 %v2422_v26, %v2204_v54  ;;  %7007 = vtanh.f32 %v2986_v25  ;;  %v3748_v12 = vld [vmem:[#allocation2 + $0x32] sm:$0xff]  ;;  %v8700_v54 = vld [vmem:[%s10098_s3] ss:$0 sm:$0xff] }
 0x2aa   : > { %v3081_v47 = vmul.f32 %v3049_v33, %v2825_v51  ;;  %6760 = vmatmul.msk.f32.gmra.mxu0 %vm3170_vm2, %v4022_v62 }
 0x2ab   : > { %v2923_v5 = vmul.f32 %v2891_v16, %v8660_v63  ;;  %v2760_v36 = vadd.f32 %v2700_v1, %v2482_v44  ;;  %6694 = vmatmul.msk.f32.gmra.mxu2 %vm3170_vm2, %v4020_v14 }
 0x2ac   : > { %v3117_v55 = vmul.f32 %v8302_v3, %v3081_v47  ;;  %6727 = vmatmul.msk.f32.gmra.mxu3 %vm3170_vm2, %v3747_v39 }
 0x2ad   : > { %v2955_v22 = vadd.f32 %v2923_v5, %v8660_v63  ;;  %v8680_v28 = vadd.f32 %v8657_v24, %v2760_v36  ;;  %v2827_v36 = vmul.f32 0.5, %v8660_v63 }
 0x2ae   : > { %v3153_v50 = vadd.f32 %v8327_v37, %v3117_v55  ;;  %v2147_v1 = vpop.f32.mrf.mxu2 }
 0x2af   : > { %v2987_v31 = vmul.f32 0.7978846, %v2955_v22  ;;  %v2860_v14 = vmul.f32 0.044715, %v8680_v28  ;;  %v2205_v19 = vadd.f32 %v2147_v1, %v1926_v0  ;;  %v2425_v43 = vpop.f32.mrf.mxu3  ;;  %v3308_v21 = vld [vmem:[#allocation2 + $0xc1] sm:$0xff]  ;;  %v7008_v3 = vpop.eup %7007 }
 0x2b0   : > { %3242 = vst.msk [vmem:[#allocation2 + $0xc9] sm:$0xff] %vm3170_vm2, %v3153_v50  ;;  %v2706_v11 = vpop.f32.mrf.mxu0  ;;  %v3050_v59 = vadd.f32 1.0, %v7008_v3  ;;  %6675 = vmatmul.msk.f32.gmra.mxu1 %vm3170_vm2, %v3308_v21  ;;  %v3749_v1 = vld [vmem:[#allocation2 + $0x3a] sm:$0xff] }
 0x2b1   : > { %7009 = vtanh.f32 %v2987_v31  ;;  %v2892_v38 = vmul.f32 %v2860_v14, %v8680_v28  ;;  %v2483_v32 = vadd.f32 %v2425_v43, %v2205_v19  ;;  %v8694_v45 = vpop.f32.mrf.mxu1  ;;  %v1928_v14 = vadd.f32 %v8376_v29, %v8060_v17  ;;  %v8728_v21 = vld [vmem:[%s10099_s4] ss:$0 sm:$0xff] }
 0x2b2   : > { %v3082_v53 = vmul.f32 %v3050_v59, %v2826_v8  ;;  %6761 = vmatmul.msk.f32.gmra.mxu0 %vm3170_vm2, %v8688_v58  ;;  %v2828_v17 = vmul.f32 0.5, %v8680_v28 }
 0x2b3   : > { %v2924_v60 = vmul.f32 %v2892_v38, %v8680_v28  ;;  %v2761_v61 = vadd.f32 %v2703_v46, %v2483_v32  ;;  %6695 = vmatmul.msk.f32.gmra.mxu2 %vm3170_vm2, %v4021_v2  ;;  %v1927_v2 = vadd.f32 %v8332_v18, %v8051_v48 }
 0x2b4   : > { %6728 = vmatmul.msk.f32.gmra.mxu3 %vm3170_vm2, %v3748_v12  ;;  %v3118_v26 = vmul.f32 %v8700_v54, %v3082_v53 }
 0x2b5   : > { %v2956_v49 = vadd.f32 %v2924_v60, %v8680_v28  ;;  %v8705_v51 = vadd.f32 %v8657_v24, %v2761_v61 }
 0x2b6   : > { %v2150_v33 = vpop.f32.mrf.mxu2  ;;  %v3154_v46 = vadd.f32 %v8327_v37, %v3118_v26  ;;  %v4024_v37 = vld [vmem:[#allocation2 + $0x50] sm:$0xff] }
 0x2b7   : > { %v7010_v25 = vpop.eup %7009  ;;  %v2988_v16 = vmul.f32 0.7978846, %v2956_v49  ;;  %v2861_v44 = vmul.f32 0.044715, %v8705_v51  ;;  %v2428_v47 = vpop.f32.mrf.mxu3  ;;  %v3309_v5 = vld [vmem:[#allocation2 + $0xc9] sm:$0xff]  ;;  %v2206_v55 = vadd.f32 %v2150_v33, %v1927_v2  ;;  %v4025_v2 = vld [vmem:[#allocation2 + $0x60] sm:$0xff] }
 0x2b8   : > { %v3051_v39 = vadd.f32 1.0, %v7010_v25  ;;  %v2709_v0 = vpop.f32.mrf.mxu0  ;;  %3243 = vst.msk [vmem:[#allocation2 + $0xd9] sm:$0xff] %vm3170_vm2, %v3154_v46  ;;  %6676 = vmatmul.msk.f32.gmra.mxu1 %vm3170_vm2, %v3309_v5  ;;  %v3750_v25 = vld [vmem:[#allocation2 + $0x4a] sm:$0xff] }
 0x2b9   : > { %7011 = vtanh.f32 %v2988_v16  ;;  %v2893_v22 = vmul.f32 %v2861_v44, %v8705_v51  ;;  %v2484_v18 = vadd.f32 %v2428_v47, %v2206_v55  ;;  %v1929_v16 = vadd.f32 %v8407_v42, %v8071_v40 }
 0x2ba   : > { %v3083_v48 = vmul.f32 %v3051_v39, %v2827_v36  ;;  %6762 = vmatmul.msk.f32.gmra.mxu0 %vm3170_vm2, %v4024_v37  ;;  %v2829_v40 = vmul.f32 0.5, %v8705_v51 }
 0x2bb   : > { %v2925_v50 = vmul.f32 %v2893_v22, %v8705_v51  ;;  %6696 = vmatmul.msk.f32.gmra.mxu2 %vm3170_vm2, %v4022_v62  ;;  %v2762_v31 = vadd.f32 %v2706_v11, %v2484_v18 }
 0x2bc   : > { %v3119_v63 = vmul.f32 %v8700_v54, %v3083_v48  ;;  %6729 = vmatmul.msk.f32.gmra.mxu3 %vm3170_vm2, %v3749_v1 }
 0x2bd   : > { %v2957_v19 = vadd.f32 %v2925_v50, %v8705_v51  ;;  %v8723_v43 = vpop.f32.mrf.mxu1  ;;  %v8732_v3 = vadd.f32 %v8657_v24, %v2762_v31 }
 0x2be   : > { %v3155_v62 = vadd.f32 %v8728_v21, %v3119_v63  ;;  %v2153_v8 = vpop.f32.mrf.mxu2 }
 0x2bf   : > { %v7012_v11 = vpop.eup %7011  ;;  %v2989_v59 = vmul.f32 0.7978846, %v2957_v19  ;;  %v2207_v38 = vadd.f32 %v2153_v8, %v1928_v14  ;;  %v2431_v32 = vpop.f32.mrf.mxu3  ;;  %v2862_v53 = vmul.f32 0.044715, %v8732_v3  ;;  %v3310_v61 = vld [vmem:[#allocation2 + $0xd9] sm:$0xff]  ;;  %v4026_v14 = vld [vmem:[#allocation2 + $0x68] sm:$0xff] }
 0x2c0   : > { %3244 = vst.msk [vmem:[#allocation2 + $0xe1] sm:$0xff] %vm3170_vm2, %v3155_v62  ;;  %v3052_v29 = vadd.f32 1.0, %v7012_v11  ;;  %v2712_v60 = vpop.f32.mrf.mxu0  ;;  %6677 = vmatmul.msk.f32.gmra.mxu1 %vm3170_vm2, %v3310_v61  ;;  %v3751_v8 = vld [vmem:[#allocation2 + $0x52] sm:$0xff]  ;;  %v1930_v11 = vadd.f32 %v8435_v41, %v8082_v4  ;;  %v2830_v4 = vmul.f32 0.5, %v8732_v3 }
 0x2c1   : > { %7013 = vtanh.f32 %v2989_v59  ;;  %v2485_v12 = vadd.f32 %v2431_v32, %v2207_v38  ;;  %v2894_v49 = vmul.f32 %v2862_v53, %v8732_v3 }
 0x2c2   : > { %v3084_v26 = vmul.f32 %v3052_v29, %v2828_v17  ;;  %6763 = vmatmul.msk.f32.gmra.mxu0 %vm3170_vm2, %v4025_v2 }
 0x2c3   : > { %v2763_v33 = vadd.f32 %v2709_v0, %v2485_v12  ;;  %6697 = vmatmul.msk.f32.gmra.mxu2 %vm3170_vm2, %v8688_v58  ;;  %v2926_v46 = vmul.f32 %v2894_v49, %v8732_v3 }
 0x2c4   : > { %v3120_v28 = vmul.f32 %v8700_v54, %v3084_v26  ;;  %6730 = vmatmul.msk.f32.gmra.mxu3 %vm3170_vm2, %v3750_v25 }
 0x2c5   : > { %v8748_v44 = vadd.f32 %v8657_v24, %v2763_v33  ;;  %v8750_v47 = vpop.f32.mrf.mxu1  ;;  %v2958_v58 = vadd.f32 %v2926_v46, %v8732_v3 }
 0x2c6   : > { %v3156_v5 = vadd.f32 %v8728_v21, %v3120_v28  ;;  %v2156_v36 = vpop.f32.mrf.mxu2  ;;  %v4027_v28 = vld [vmem:[#allocation2 + $0x78] sm:$0xff] }
 0x2c7   : > { %v7014_v39 = vpop.eup %7013  ;;  %v2863_v55 = vmul.f32 0.044715, %v8748_v44  ;;  %v2208_v0 = vadd.f32 %v2156_v36, %v1929_v16  ;;  %v2434_v22 = vpop.f32.mrf.mxu3  ;;  %v3311_v48 = vld [vmem:[#allocation2 + $0xe1] sm:$0xff]  ;;  %v2990_v18 = vmul.f32 0.7978846, %v2958_v58 }
 0x2c8   : > { %3245 = vst.msk [vmem:[#allocation2 + $0xf1] sm:$0xff] %vm3170_vm2, %v3156_v5  ;;  %v3053_v42 = vadd.f32 1.0, %v7014_v39  ;;  %v2715_v50 = vpop.f32.mrf.mxu0  ;;  %6678 = vmatmul.msk.f32.gmra.mxu1 %vm3170_vm2, %v3311_v48  ;;  %v3752_v58 = vld [vmem:[#allocation2 + $0x62] sm:$0xff] }
 0x2c9   : > { %v2895_v1 = vmul.f32 %v2863_v55, %v8748_v44  ;;  %v2486_v63 = vadd.f32 %v2434_v22, %v2208_v0  ;;  %7015 = vtanh.f32 %v2990_v18  ;;  %v1931_v55 = vadd.f32 %v8460_v56, %v8093_v30 }
 0x2ca   : > { %v3085_v31 = vmul.f32 %v3053_v42, %v2829_v40  ;;  %6764 = vmatmul.msk.f32.gmra.mxu0 %vm3170_vm2, %v4026_v14 }
 0x2cb   : > { %v2927_v19 = vmul.f32 %v2895_v1, %v8748_v44  ;;  %v2764_v62 = vadd.f32 %v2712_v60, %v2486_v63  ;;  %6698 = vmatmul.msk.f32.gmra.mxu2 %vm3170_vm2, %v4024_v37  ;;  %v2831_v1 = vmul.f32 0.5, %v8748_v44 }
 0x2cc   : > { %v3121_v51 = vmul.f32 %v8700_v54, %v3085_v31  ;;  %6731 = vmatmul.msk.f32.gmra.mxu3 %vm3170_vm2, %v3751_v8  ;;  %v4028_v8 = vld [vmem:[#allocation2 + $0x80] sm:$0xff] }
 0x2cd   : > { %v2959_v59 = vadd.f32 %v2927_v19, %v8748_v44  ;;  %v8768_v38 = vadd.f32 %v8657_v24, %v2764_v62  ;;  %v8771_v17 = vpop.f32.mrf.mxu1 }
 0x2ce   : > { %v3157_v32 = vadd.f32 %v8728_v21, %v3121_v51  ;;  %v2159_v37 = vpop.f32.mrf.mxu2 }
 0x2cf   : > { %v2991_v29 = vmul.f32 0.7978846, %v2959_v59  ;;  %v2864_v53 = vmul.f32 0.044715, %v8768_v38  ;;  %v2209_v60 = vadd.f32 %v2159_v37, %v1930_v11  ;;  %v2437_v61 = vpop.f32.mrf.mxu3  ;;  %v3312_v12 = vld [vmem:[#allocation2 + $0xf1] sm:$0xff]  ;;  %v7016_v26 = vpop.eup %7015 }
 0x2d0   : > { %3246 = vst.msk [vmem:[#allocation2 + $0xf9] sm:$0xff] %vm3170_vm2, %v3157_v32  ;;  %v2718_v41 = vpop.f32.mrf.mxu0  ;;  %v3054_v49 = vadd.f32 1.0, %v7016_v26  ;;  %6679 = vmatmul.msk.f32.gmra.mxu1 %vm3170_vm2, %v3312_v12  ;;  %v3753_v11 = vld [vmem:[#allocation2 + $0x6a] sm:$0xff]  ;;  %v1932_v32 = vadd.f32 %v8489_v13, %v8104_v9 }
 0x2d1   : > { %7017 = vtanh.f32 %v2991_v29  ;;  %v2896_v33 = vmul.f32 %v2864_v53, %v8768_v38  ;;  %v2487_v25 = vadd.f32 %v2437_v61, %v2209_v60 }
 0x2d2   : > { %v3086_v46 = vmul.f32 %v3054_v49, %v2830_v4  ;;  %6765 = vmatmul.msk.f32.gmra.mxu0 %vm3170_vm2, %v4027_v28 }
 0x2d3   : > { %v2928_v16 = vmul.f32 %v2896_v33, %v8768_v38  ;;  %v2765_v5 = vadd.f32 %v2715_v50, %v2487_v25  ;;  %6699 = vmatmul.msk.f32.gmra.mxu2 %vm3170_vm2, %v4025_v2 }
 0x2d4   : > { %6732 = vmatmul.msk.f32.gmra.mxu3 %vm3170_vm2, %v3752_v58  ;;  %v3122_v3 = vmul.f32 %v8700_v54, %v3086_v46 }
 0x2d5   : > { %v2960_v36 = vadd.f32 %v2928_v16, %v8768_v38  ;;  %v8785_v39 = vadd.f32 %v8657_v24, %v2765_v5  ;;  %v8789_v0 = vpop.f32.mrf.mxu1  ;;  %v4029_v5 = vld [vmem:[#allocation2 + $0x90] sm:$0xff] }
 0x2d6   : > { %v2162_v22 = vpop.f32.mrf.mxu2  ;;  %v3158_v2 = vadd.f32 %v8728_v21, %v3122_v3  ;;  %v3754_v3 = vld [vmem:[#allocation2 + $0x7a] sm:$0xff] }
 0x2d7   : > { %v7018_v48 = vpop.eup %7017  ;;  %v2992_v40 = vmul.f32 0.7978846, %v2960_v36  ;;  %v2865_v42 = vmul.f32 0.044715, %v8785_v39  ;;  %v2440_v18 = vpop.f32.mrf.mxu3  ;;  %v3313_v50 = vld [vmem:[#allocation2 + $0xf9] sm:$0xff]  ;;  %v2210_v31 = vadd.f32 %v2162_v22, %v1931_v55  ;;  %v1933_v55 = vadd.f32 %v8516_v23, %v8113_v7 }
 0x2d8   : > { %v3055_v63 = vadd.f32 1.0, %v7018_v48  ;;  %v2721_v19 = vpop.f32.mrf.mxu0  ;;  %3247 = vst.msk [vmem:[#allocation2 + $0x109] sm:$0xff] %vm3170_vm2, %v3158_v2  ;;  %6680 = vmatmul.msk.f32.gmra.mxu1 %vm3170_vm2, %v3313_v50  ;;  %v2833_v7 = vmul.f32 0.5, %v8785_v39 }
 0x2d9   : > { %7019 = vtanh.f32 %v2992_v40  ;;  %v2897_v30 = vmul.f32 %v2865_v42, %v8785_v39  ;;  %v2488_v62 = vadd.f32 %v2440_v18, %v2210_v31 }
 0x2da   : > { %v3087_v56 = vmul.f32 %v3055_v63, %v2831_v1  ;;  %6766 = vmatmul.msk.f32.gmra.mxu0 %vm3170_vm2, %v4028_v8 }
 0x2db   : > { %v2929_v51 = vmul.f32 %v2897_v30, %v8785_v39  ;;  %6700 = vmatmul.msk.f32.gmra.mxu2 %vm3170_vm2, %v4026_v14  ;;  %v2766_v59 = vadd.f32 %v2718_v41, %v2488_v62  ;;  %v2832_v41 = vmul.f32 0.5, %v8768_v38 }
 0x2dc   : > { %v3123_v44 = vmul.f32 %v8700_v54, %v3087_v56  ;;  %6733 = vmatmul.msk.f32.gmra.mxu3 %vm3170_vm2, %v3753_v11 }
 0x2dd   : > { %v2961_v37 = vadd.f32 %v2929_v51, %v8785_v39  ;;  %v8807_v53 = vadd.f32 %v8657_v24, %v2766_v59  ;;  %v8809_v60 = vpop.f32.mrf.mxu1  ;;  %v4030_v51 = vld [vmem:[#allocation2 + $0x98] sm:$0xff]  ;;  %v3755_v59 = vld [vmem:[#allocation2 + $0x82] sm:$0xff] }
 0x2de   : > { %v3159_v29 = vadd.f32 %v8728_v21, %v3123_v44  ;;  %v2165_v14 = vpop.f32.mrf.mxu2 }
 0x2df   : > { %v7020_v61 = vpop.eup %7019  ;;  %v2993_v12 = vmul.f32 0.7978846, %v2961_v37  ;;  %v2211_v26 = vadd.f32 %v2165_v14, %v1932_v32  ;;  %v2443_v4 = vpop.f32.mrf.mxu3  ;;  %v2866_v9 = vmul.f32 0.044715, %v8807_v53  ;;  %v3314_v33 = vld [vmem:[#allocation2 + $0x109] sm:$0xff]  ;;  %v1934_v32 = vadd.f32 %v8542_v10, %v8124_v52 }
 0x2e0   : > { %3248 = vst.msk [vmem:[#allocation2 + $0x111] sm:$0xff] %vm3170_vm2, %v3159_v29  ;;  %v3056_v49 = vadd.f32 1.0, %v7020_v61  ;;  %v2724_v13 = vpop.f32.mrf.mxu0  ;;  %6681 = vmatmul.msk.f32.gmra.mxu1 %vm3170_vm2, %v3314_v33  ;;  %v2834_v52 = vmul.f32 0.5, %v8807_v53 }
 0x2e1   : > { %7021 = vtanh.f32 %v2993_v12  ;;  %v2489_v25 = vadd.f32 %v2443_v4, %v2211_v26  ;;  %v2898_v16 = vmul.f32 %v2866_v9, %v8807_v53 }
 0x2e2   : > { %v3088_v46 = vmul.f32 %v3056_v49, %v2832_v41  ;;  %6767 = vmatmul.msk.f32.gmra.mxu0 %vm3170_vm2, %v4029_v5 }
 0x2e3   : > { %v2767_v58 = vadd.f32 %v2721_v19, %v2489_v25  ;;  %6701 = vmatmul.msk.f32.gmra.mxu2 %vm3170_vm2, %v4027_v28  ;;  %v2930_v36 = vmul.f32 %v2898_v16, %v8807_v53 }
 0x2e4   : > { %v3124_v38 = vmul.f32 %v8700_v54, %v3088_v46  ;;  %6734 = vmatmul.msk.f32.gmra.mxu3 %vm3170_vm2, %v3754_v3  ;;  %v4031_v46 = vld [vmem:[#allocation2 + $0xa8] sm:$0xff] }
 0x2e5   : > { %v8824_v22 = vadd.f32 %v8657_v24, %v2767_v58  ;;  %v2962_v2 = vadd.f32 %v2930_v36, %v8807_v53  ;;  %v8828_v28 = vpop.f32.mrf.mxu1 }
 0x2e6   : > { %v3160_v48 = vadd.f32 %v8728_v21, %v3124_v38  ;;  %v2168_v40 = vpop.f32.mrf.mxu2  ;;  %v3756_v38 = vld [vmem:[#allocation2 + $0x92] sm:$0xff] }
 0x2e7   : > { %v7022_v42 = vpop.eup %7021  ;;  %v2867_v18 = vmul.f32 0.044715, %v8824_v22  ;;  %v2212_v50 = vadd.f32 %v2168_v40, %v1933_v55  ;;  %v2446_v1 = vpop.f32.mrf.mxu3  ;;  %v3315_v63 = vld [vmem:[#allocation2 + $0x111] sm:$0xff]  ;;  %v2994_v31 = vmul.f32 0.7978846, %v2962_v2 }
 0x2e8   : > { %3249 = vst.msk [vmem:[#allocation2 + $0x121] sm:$0xff] %vm3170_vm2, %v3160_v48  ;;  %v3057_v23 = vadd.f32 1.0, %v7022_v42  ;;  %v2727_v19 = vpop.f32.mrf.mxu0  ;;  %6682 = vmatmul.msk.f32.gmra.mxu1 %vm3170_vm2, %v3315_v63  ;;  %v1935_v48 = vadd.f32 %v8568_v57, %v8135_v35 }
 0x2e9   : > { %v2899_v30 = vmul.f32 %v2867_v18, %v8824_v22  ;;  %v2490_v56 = vadd.f32 %v2446_v1, %v2212_v50  ;;  %7023 = vtanh.f32 %v2994_v31 }
 0x2ea   : > { %v3089_v62 = vmul.f32 %v3057_v23, %v2833_v7  ;;  %6768 = vmatmul.msk.f32.gmra.mxu0 %vm3170_vm2, %v4030_v51  ;;  %v2835_v7 = vmul.f32 0.5, %v8824_v22 }
 0x2eb   : > { %v2931_v11 = vmul.f32 %v2899_v30, %v8824_v22  ;;  %v2768_v44 = vadd.f32 %v2724_v13, %v2490_v56  ;;  %6702 = vmatmul.msk.f32.gmra.mxu2 %vm3170_vm2, %v4028_v8  ;;  %v8876_v56 = vld [vmem:[#allocation2 + $0xb0] sm:$0xff] }
 0x2ec   : > { %v3125_v39 = vmul.f32 %v8700_v54, %v3089_v62  ;;  %6735 = vmatmul.msk.f32.gmra.mxu3 %vm3170_vm2, %v3755_v59  ;;  %v1936_v59 = vadd.f32 %v8597_v20, %v8146_v6 }
 0x2ed   : > { %v2963_v37 = vadd.f32 %v2931_v11, %v8824_v22  ;;  %v8844_v29 = vadd.f32 %v8657_v24, %v2768_v44  ;;  %v8847_v61 = vpop.f32.mrf.mxu1  ;;  %v8880_v22 = vld [vmem:[#allocation2 + $0x9a] sm:$0xff] }
 0x2ee   : > { %v3161_v14 = vadd.f32 %v8728_v21, %v3125_v39  ;;  %v2171_v8 = vpop.f32.mrf.mxu2 }
 0x2ef   : > { %v2995_v12 = vmul.f32 0.7978846, %v2963_v37  ;;  %v2868_v26 = vmul.f32 0.044715, %v8844_v29  ;;  %v2213_v4 = vadd.f32 %v2171_v8, %v1934_v32  ;;  %v2449_v41 = vpop.f32.mrf.mxu3  ;;  %v3316_v49 = vld [vmem:[#allocation2 + $0x121] sm:$0xff]  ;;  %v7024_v9 = vpop.eup %7023 }
 0x2f0   : > { %3250 = vst.msk [vmem:[#allocation2 + $0x129] sm:$0xff] %vm3170_vm2, %v3161_v14  ;;  %v2730_v10 = vpop.f32.mrf.mxu0  ;;  %v3058_v13 = vadd.f32 1.0, %v7024_v9  ;;  %6683 = vmatmul.msk.f32.gmra.mxu1 %vm3170_vm2, %v3316_v49 }
 0x2f1   : > { %7025 = vtanh.f32 %v2995_v12  ;;  %v2900_v33 = vmul.f32 %v2868_v26, %v8844_v29  ;;  %v2491_v25 = vadd.f32 %v2449_v41, %v2213_v4  ;;  %v2836_v41 = vmul.f32 0.5, %v8844_v29 }
 0x2f2   : > { %v3090_v16 = vmul.f32 %v3058_v13, %v2834_v52  ;;  %6769 = vmatmul.msk.f32.gmra.mxu0 %vm3170_vm2, %v4031_v46 }
 0x2f3   : > { %v2932_v58 = vmul.f32 %v2900_v33, %v8844_v29  ;;  %v2769_v3 = vadd.f32 %v2727_v19, %v2491_v25  ;;  %6703 = vmatmul.msk.f32.gmra.mxu2 %vm3170_vm2, %v4029_v5  ;;  %v8904_v33 = vld [vmem:[#allocation2 + $0xc0] sm:$0xff] }
 0x2f4   : > { %6736 = vmatmul.msk.f32.gmra.mxu3 %vm3170_vm2, %v3756_v38  ;;  %v3126_v53 = vmul.f32 %v8700_v54, %v3090_v16 }
 0x2f5   : > { %v2964_v36 = vadd.f32 %v2932_v58, %v8844_v29  ;;  %v8861_v55 = vadd.f32 %v8657_v24, %v2769_v3  ;;  %v8865_v2 = vpop.f32.mrf.mxu1  ;;  %v8907_v29 = vld [vmem:[#allocation2 + $0xaa] sm:$0xff] }
 0x2f6   : > { %v2174_v40 = vpop.f32.mrf.mxu2  ;;  %v3162_v5 = vadd.f32 %v8728_v21, %v3126_v53  ;;  %v10232_v3 = vld [vmem:[#allocation3_spill] sm:$0xff] }
 0x2f7   : > { %v7026_v42 = vpop.eup %7025  ;;  %v2996_v18 = vmul.f32 0.7978846, %v2964_v36  ;;  %v2869_v50 = vmul.f32 0.044715, %v8861_v55  ;;  %v2452_v1 = vpop.f32.mrf.mxu3  ;;  %v8869_v63 = vld [vmem:[#allocation2 + $0x129] sm:$0xff]  ;;  %v2214_v31 = vadd.f32 %v2174_v40, %v1935_v48  ;;  %v1937_v38 = vadd.f32 %v8620_v27, %v10232_v3 }
 0x2f8   : > { %v3059_v23 = vadd.f32 1.0, %v7026_v42  ;;  %v2733_v19 = vpop.f32.mrf.mxu0  ;;  %3251 = vst.msk [vmem:[#allocation2 + $0x139] sm:$0xff] %vm3170_vm2, %v3162_v5  ;;  %6684 = vmatmul.msk.f32.gmra.mxu1 %vm3170_vm2, %v8869_v63  ;;  %v2837_v27 = vmul.f32 0.5, %v8861_v55 }
 0x2f9   : > { %7027 = vtanh.f32 %v2996_v18  ;;  %v2901_v35 = vmul.f32 %v2869_v50, %v8861_v55  ;;  %v2492_v30 = vadd.f32 %v2452_v1, %v2214_v31 }
 0x2fa   : > { %v3091_v57 = vmul.f32 %v3059_v23, %v2835_v7  ;;  %6770 = vmatmul.msk.f32.gmra.mxu0 %vm3170_vm2, %v8876_v56 }
 0x2fb   : > { %v2933_v62 = vmul.f32 %v2901_v35, %v8861_v55  ;;  %6704 = vmatmul.msk.f32.gmra.mxu2 %vm3170_vm2, %v4030_v51  ;;  %v2770_v44 = vadd.f32 %v2730_v10, %v2492_v30  ;;  %v8932_v30 = vld [vmem:[#allocation2 + $0xc8] sm:$0xff] }
 0x2fc   : > { %v3127_v11 = vmul.f32 %v8700_v54, %v3091_v57  ;;  %6737 = vmatmul.msk.f32.gmra.mxu3 %vm3170_vm2, %v8880_v22 }
 0x2fd   : > { %v2965_v39 = vadd.f32 %v2933_v62, %v8861_v55  ;;  %v8892_v51 = vadd.f32 %v8657_v24, %v2770_v44  ;;  %v8894_v37 = vpop.f32.mrf.mxu1  ;;  %v8937_v55 = vld [vmem:[#allocation2 + $0xb2] sm:$0xff] }
 0x2fe   : > { %v3163_v32 = vadd.f32 %v8728_v21, %v3127_v11  ;;  %v2177_v14 = vpop.f32.mrf.mxu2 }
 0x2ff   : > { %v7028_v8 = vpop.eup %7027  ;;  %v2997_v12 = vmul.f32 0.7978846, %v2965_v39  ;;  %v2215_v26 = vadd.f32 %v2177_v14, %v1936_v59  ;;  %v2455_v4 = vpop.f32.mrf.mxu3  ;;  %v2870_v6 = vmul.f32 0.044715, %v8892_v51  ;;  %v8899_v9 = vld [vmem:[#allocation2 + $0x139] sm:$0xff] }
 0x300   : > { %3252 = vst.msk [vmem:[#allocation2 + $0x141] sm:$0xff] %vm3170_vm2, %v3163_v32  ;;  %v3060_v49 = vadd.f32 1.0, %v7028_v8  ;;  %v2736_v20 = vpop.f32.mrf.mxu0  ;;  %6685 = vmatmul.msk.f32.gmra.mxu1 %vm3170_vm2, %v8899_v9  ;;  %v10233_v59 = vld [vmem:[#allocation4_spill] sm:$0xff] }
 0x301   : > { %7029 = vtanh.f32 %v2997_v12  ;;  %v2493_v52 = vadd.f32 %v2455_v4, %v2215_v26  ;;  %v2902_v13 = vmul.f32 %v2870_v6, %v8892_v51  ;;  %v1938_v39 = vadd.f32 %v8643_v15, %v10233_v59 }
 0x302   : > { %v3092_v10 = vmul.f32 %v3060_v49, %v2836_v41  ;;  %6771 = vmatmul.msk.f32.gmra.mxu0 %vm3170_vm2, %v8904_v33  ;;  %v2838_v15 = vmul.f32 0.5, %v8892_v51 }
 0x303   : > { %v2771_v25 = vadd.f32 %v2733_v19, %v2493_v52  ;;  %6705 = vmatmul.msk.f32.gmra.mxu2 %vm3170_vm2, %v4031_v46  ;;  %v2934_v58 = vmul.f32 %v2902_v13, %v8892_v51  ;;  %v6822_v13 = vld [vmem:[%s10100_s5 + $0x28] sm:$0xff] }
 0x304   : > { %v3128_v16 = vmul.f32 %v8700_v54, %v3092_v10  ;;  %6738 = vmatmul.msk.f32.gmra.mxu3 %vm3170_vm2, %v8907_v29  ;;  %4714 = vmatpush.msra.mxu2 %v6822_v13 }
 0x305   : > { %v8918_v53 = vadd.f32 %v8657_v24, %v2771_v25  ;;  %v2966_v36 = vadd.f32 %v2934_v58, %v8892_v51  ;;  %v8922_v48 = vpop.f32.mrf.mxu1  ;;  %v6855_v25 = vld [vmem:[%s10100_s5 + $0x30] sm:$0xff]  ;;  %v6888_v51 = vld [vmem:[%s10100_s5 + $0x38] sm:$0xff] }
 0x306   : > { %v3164_v46 = vadd.f32 %v8728_v21, %v3128_v16  ;;  %v2180_v40 = vpop.f32.mrf.mxu2  ;;  %4990 = vmatpush.msra.mxu3 %v6855_v25  ;;  %5265 = vmatpush.msra.mxu0 %v6888_v51 }
 0x307   : > { %v7030_v42 = vpop.eup %7029  ;;  %v2871_v5 = vmul.f32 0.044715, %v8918_v53  ;;  %v2216_v18 = vadd.f32 %v2180_v40, %v1937_v38  ;;  %v2458_v50 = vpop.f32.mrf.mxu3  ;;  %v8925_v1 = vld [vmem:[#allocation2 + $0x141] sm:$0xff]  ;;  %v2998_v23 = vmul.f32 0.7978846, %v2966_v36 }
 0x308   : > { %3253 = vst.msk [vmem:[#allocation2 + $0x151] sm:$0xff] %vm3170_vm2, %v3164_v46  ;;  %v3061_v7 = vadd.f32 1.0, %v7030_v42  ;;  %v2739_v31 = vpop.f32.mrf.mxu0  ;;  %6686 = vmatmul.msk.f32.gmra.mxu1 %vm3170_vm2, %v8925_v1  ;;  %v6921_v38 = vld [vmem:[%s10100_s5 + $0x40] sm:$0xff]  ;;  %v8973_v46 = vld [vmem:[#allocation2 + $0xd8] sm:$0xff] }
 0x309   : > { %v2903_v19 = vmul.f32 %v2871_v5, %v8918_v53  ;;  %v2494_v35 = vadd.f32 %v2458_v50, %v2216_v18  ;;  %7031 = vtanh.f32 %v2998_v23  ;;  %v8978_v5 = vld [vmem:[#allocation2 + $0xc2] sm:$0xff]  ;;  %5540 = vmatpush.msra.mxu1 %v6921_v38 }
 0x30a   : > { %v3093_v57 = vmul.f32 %v3061_v7, %v2837_v27  ;;  %6772 = vmatmul.msk.f32.gmra.mxu0 %vm3170_vm2, %v8932_v30 }
 0x30b   : > { %v2935_v62 = vmul.f32 %v2903_v19, %v8918_v53  ;;  %v2772_v11 = vadd.f32 %v2736_v20, %v2494_v35  ;;  %6706 = vmatmul.msk.f32.gmra.mxu2 %vm3170_vm2, %v8876_v56 }
 0x30c   : > { %v3129_v44 = vmul.f32 %v8700_v54, %v3093_v57  ;;  %6739 = vmatmul.msk.f32.gmra.mxu3 %vm3170_vm2, %v8937_v55 }
 0x30d   : > { %v2967_v32 = vadd.f32 %v2935_v62, %v8918_v53  ;;  %v8948_v14 = vadd.f32 %v8657_v24, %v2772_v11  ;;  %v8951_v12 = vpop.f32.mrf.mxu1 }
 0x30e   : > { %v3165_v8 = vadd.f32 %v8728_v21, %v3129_v44  ;;  %v2183_v26 = vpop.f32.mrf.mxu2  ;;  %v2839_v44 = vmul.f32 0.5, %v8918_v53  ;;  %v9001_v53 = vld [vmem:[#allocation2 + $0xca] sm:$0xff] }
 0x30f   : > { %v2999_v4 = vmul.f32 0.7978846, %v2967_v32  ;;  %v2872_v41 = vmul.f32 0.044715, %v8948_v14  ;;  %v2217_v49 = vadd.f32 %v2183_v26, %v1938_v39  ;;  %v2461_v6 = vpop.f32.mrf.mxu3  ;;  %v8954_v20 = vld [vmem:[#allocation2 + $0x151] sm:$0xff]  ;;  %v7032_v52 = vpop.eup %7031  ;;  %v2840_v51 = vmul.f32 0.5, %v8948_v14 }
 0x310   : > { %3254 = vst.msk [vmem:[#allocation2 + $0x159] sm:$0xff] %vm3170_vm2, %v3165_v8  ;;  %v4166_v10 = vpop.f32.mrf.mxu0  ;;  %v3062_v16 = vadd.f32 1.0, %v7032_v52  ;;  %6687 = vmatmul.msk.f32.gmra.mxu1 %vm3170_vm2, %v8954_v20 }
 0x311   : > { %7033 = vtanh.f32 %v2999_v4  ;;  %v2904_v58 = vmul.f32 %v2872_v41, %v8948_v14  ;;  %v2495_v3 = vadd.f32 %v2461_v6, %v2217_v49  ;;  %v8997_v4 = vld [vmem:[#allocation2 + $0xe0] sm:$0xff] }
 0x312   : > { %v3094_v36 = vmul.f32 %v3062_v16, %v2838_v15  ;;  %6773 = vmatmul.msk.f32.gmra.mxu0 %vm3170_vm2, %v8973_v46 }
 0x313   : > { %v2936_v40 = vmul.f32 %v2904_v58, %v8948_v14  ;;  %v2773_v42 = vadd.f32 %v2739_v31, %v2495_v3  ;;  %6707 = vmatmul.msk.f32.gmra.mxu2 %vm3170_vm2, %v8904_v33 }
 0x314   : > { %6740 = vmatmul.msk.f32.gmra.mxu3 %vm3170_vm2, %v8978_v5  ;;  %v3130_v18 = vmul.f32 %v8700_v54, %v3094_v36 }
 0x315   : > { %v2968_v50 = vadd.f32 %v2936_v40, %v8948_v14  ;;  %v2809_v27 = vadd.f32 %v8657_v24, %v2773_v42  ;;  %v8987_v7 = vpop.f32.mrf.mxu1 }
 0x316   : > { %v3648_v23 = vpop.f32.mrf.mxu2  ;;  %v3166_v19 = vadd.f32 %v8728_v21, %v3130_v18  ;;  %v9020_v18 = vld [vmem:[#allocation2 + $0xf0] sm:$0xff] }
 0x317   : > { %v7034_v31 = vpop.eup %7033  ;;  %v3000_v35 = vmul.f32 0.7978846, %v2968_v50  ;;  %v2873_v57 = vmul.f32 0.044715, %v2809_v27  ;;  %v3891_v62 = vpop.f32.mrf.mxu3  ;;  %v8990_v11 = vld [vmem:[#allocation2 + $0x159] sm:$0xff]  ;;  %v3649_v39 = vadd.f32 %v3648_v23, %v8669_v34 }
 0x318   : > { %v3063_v59 = vadd.f32 1.0, %v7034_v31  ;;  %v4169_v32 = vpop.f32.mrf.mxu0  ;;  %3255 = vst.msk [vmem:[#allocation2 + $0x169] sm:$0xff] %vm3170_vm2, %v3166_v19  ;;  %6688 = vmatmul.msk.f32.gmra.mxu1 %vm3170_vm2, %v8990_v11 }
 0x319   : > { %7035 = vtanh.f32 %v3000_v35  ;;  %v2905_v24 = vmul.f32 %v2873_v57, %v2809_v27  ;;  %v3987_v26 = vadd.f32 %v3891_v62, %v3649_v39 }
 0x31a   : > { %v3095_v8 = vmul.f32 %v3063_v59, %v2839_v44  ;;  %6774 = vmatmul.msk.f32.gmra.mxu0 %vm3170_vm2, %v8997_v4  ;;  %v2841_v59 = vmul.f32 0.5, %v2809_v27 }
 0x31b   : > { %v2937_v41 = vmul.f32 %v2905_v24, %v2809_v27  ;;  %6708 = vmatmul.msk.f32.gmra.mxu2 %vm3170_vm2, %v8932_v30  ;;  %v9008_v49 = vadd.f32 %v4166_v10, %v3987_v26  ;;  %v9042_v26 = vld [vmem:[#allocation2 + $0xf8] sm:$0xff] }
 0x31c   : > { %v3131_v34 = vmul.f32 %v8700_v54, %v3095_v8  ;;  %6741 = vmatmul.msk.f32.gmra.mxu3 %vm3170_vm2, %v9001_v53 }
 0x31d   : > { %v2969_v6 = vadd.f32 %v2937_v41, %v2809_v27  ;;  %v9011_v15 = vpop.f32.mrf.mxu1  ;;  %v9046_v41 = vld [vmem:[#allocation2 + $0xe2] sm:$0xff] }
 0x31e   : > { %v3167_v52 = vadd.f32 %v8728_v21, %v3131_v34  ;;  %v3651_v13 = vpop.f32.mrf.mxu2 }
 0x31f   : > { %v7036_v25 = vpop.eup %7035  ;;  %v3001_v16 = vmul.f32 0.7978846, %v2969_v6  ;;  %v3652_v58 = vadd.f32 %v3651_v13, %v8694_v45  ;;  %v3894_v3 = vpop.f32.mrf.mxu3  ;;  %v9016_v36 = vld [vmem:[#allocation2 + $0x169] sm:$0xff]  ;;  %v9024_v45 = vld [vmem:[#allocation2 + $0xda] sm:$0xff] }
 0x320   : > { %3256 = vst.msk [vmem:[#allocation2 + $0x171] sm:$0xff] %vm3170_vm2, %v3167_v52  ;;  %v3064_v38 = vadd.f32 1.0, %v7036_v25  ;;  %v4172_v10 = vpop.f32.mrf.mxu0  ;;  %6689 = vmatmul.msk.f32.gmra.mxu1 %vm3170_vm2, %v9016_v36 }
 0x321   : > { %7037 = vtanh.f32 %v3001_v16  ;;  %v3988_v40 = vadd.f32 %v3894_v3, %v3652_v58  ;;  %v4294_v58 = vld [vmem:[#allocation2 + $0x19] sm:$0xff] }
 0x322   : > { %v3096_v42 = vmul.f32 %v3064_v38, %v2840_v51  ;;  %6775 = vmatmul.msk.f32.gmra.mxu0 %vm3170_vm2, %v9020_v18  ;;  %v9061_v51 = vld [vmem:[#allocation2 + $0x108] sm:$0xff] }
 0x323   : > { %6709 = vmatmul.msk.f32.gmra.mxu2 %vm3170_vm2, %v8973_v46  ;;  %v9028_v14 = vadd.f32 %v4169_v32, %v3988_v40 }
 0x324   : > { %v3132_v50 = vmul.f32 %v8700_v54, %v3096_v42  ;;  %6742 = vmatmul.msk.f32.gmra.mxu3 %vm3170_vm2, %v9024_v45 }
 0x325   : > { %v9034_v31 = vpop.f32.mrf.mxu1 }
 0x326   : > { %v3168_v23 = vadd.f32 %v8728_v21, %v3132_v50  ;;  %v3654_v19 = vpop.f32.mrf.mxu2  ;;  %v4295_v50 = vld [vmem:[#allocation2 + $0x21] sm:$0xff] }
 0x327   : > { %v7038_v35 = vpop.eup %7037  ;;  %v3655_v57 = vadd.f32 %v3654_v19, %v8723_v43  ;;  %v3897_v62 = vpop.f32.mrf.mxu3  ;;  %v9037_v44 = vld [vmem:[#allocation2 + $0x171] sm:$0xff] }
 0x328   : > { %3257 = vst.msk [vmem:[#allocation2 + $0x181] sm:$0xff] %vm3170_vm2, %v3168_v23  ;;  %v3065_v39 = vadd.f32 1.0, %v7038_v35  ;;  %v4175_v32 = vpop.f32.mrf.mxu0  ;;  %6690 = vmatmul.msk.f32.gmra.mxu1 %vm3170_vm2, %v9037_v44  ;;  %v9077_v19 = vld [vmem:[#allocation2 + $0x110] sm:$0xff]  ;;  %v9081_v35 = vld [vmem:[#allocation2 + $0xfa] sm:$0xff] }
 0x329   : > { %v3989_v24 = vadd.f32 %v3897_v62, %v3655_v57  ;;  %10235 = vst [vmem:[#allocation6_spill] sm:$0xff] %v9077_v19 }
 0x32a   : > { %v3097_v8 = vmul.f32 %v3065_v39, %v2841_v59  ;;  %6776 = vmatmul.msk.f32.gmra.mxu0 %vm3170_vm2, %v9042_v26 }
 0x32b   : > { %6710 = vmatmul.msk.f32.gmra.mxu2 %vm3170_vm2, %v8997_v4  ;;  %v9050_v43 = vadd.f32 %v4172_v10, %v3989_v24  ;;  %v9092_v24 = vld [vmem:[#allocation2 + $0x31] sm:$0xff] }
 0x32c   : > { %v3133_v27 = vmul.f32 %v8700_v54, %v3097_v8  ;;  %6743 = vmatmul.msk.f32.gmra.mxu3 %vm3170_vm2, %v9046_v41  ;;  %v9065_v54 = vld [vmem:[#allocation2 + $0xf2] sm:$0xff] }
 0x32d   : > { %v9056_v6 = vpop.f32.mrf.mxu1 }
 0x32e   : > { %v3169_v34 = vadd.f32 %v8728_v21, %v3133_v27  ;;  %v3657_v52 = vpop.f32.mrf.mxu2  ;;  %v9096_v27 = vld [vmem:[#allocation2 + $0x120] sm:$0xff] }
 0x32f   : > { %v3658_v13 = vadd.f32 %v3657_v52, %v8750_v47  ;;  %v3900_v25 = vpop.f32.mrf.mxu3  ;;  %10237 = vst [vmem:[#allocation8_spill] sm:$0xff] %v9096_v27 }
 0x330   : > { %3258 = vst.msk [vmem:[#allocation2 + $0x189] sm:$0xff] %vm3170_vm2, %v3169_v34  ;;  %v4178_v16 = vpop.f32.mrf.mxu0  ;;  %6790 = vmatmul.msk.f32.vlgmr.msrb.gmra.mxu1 %vm3170_vm2, %v4294_v58  ;;  %v9100_v34 = vld [vmem:[#allocation2 + $0x10a] sm:$0xff] }
 0x331   : > { %v3990_v3 = vadd.f32 %v3900_v25, %v3658_v13  ;;  %10238 = vst [vmem:[#allocation9_spill] sm:$0xff] %v9100_v34 }
 0x332   : > { %6777 = vmatmul.msk.f32.gmra.mxu0 %vm3170_vm2, %v9061_v51 }
 0x333   : > { %6711 = vmatmul.msk.f32.gmra.mxu2 %vm3170_vm2, %v9020_v18  ;;  %v9069_v21 = vadd.f32 %v4175_v32, %v3990_v3  ;;  %v9111_v3 = vld [vmem:[#allocation2 + $0x39] sm:$0xff] }
 0x334   : > { %6744 = vmatmul.msk.f32.gmra.mxu3 %vm3170_vm2, %v9065_v54 }
 0x335   : > { %10234 = vst [vmem:[#allocation5_spill] sm:$0xff] %v9069_v21  ;;  %v9073_v47 = vpop.f32.mrf.mxu1  ;;  %v9248_v21 = vld [vmem:[#allocation2 + $0x180] sm:$0xff] }
 0x336   : > { %v3660_v38 = vpop.f32.mrf.mxu2  ;;  %10261 = vst [vmem:[#allocation29_spill] sm:$0xff] %v9248_v21 }
 0x337   : > { %v3661_v10 = vadd.f32 %v3660_v38, %v8771_v17  ;;  %v3903_v40 = vpop.f32.mrf.mxu3 }
 0x338   : > { %v4181_v42 = vpop.f32.mrf.mxu0  ;;  %6791 = vmatmul.msk.f32.gmra.mxu1 %vm3170_vm2, %v4295_v50 }
 0x339   : > { %v3991_v23 = vadd.f32 %v3903_v40, %v3661_v10  ;;  %v9115_v10 = vld [vmem:[#allocation2 + $0x128] sm:$0xff]  ;;  %v9119_v40 = vld [vmem:[#allocation2 + $0x112] sm:$0xff] }
 0x33a   : > { %6778 = vmatmul.msk.f32.gmra.mxu0 %vm3170_vm2, %v9077_v19  ;;  %10240 = vst [vmem:[#allocation12_spill] sm:$0xff] %v9115_v10 }
 0x33b   : > { %6712 = vmatmul.msk.f32.gmra.mxu2 %vm3170_vm2, %v9042_v26  ;;  %v9085_v57 = vadd.f32 %v4178_v16, %v3991_v23  ;;  %10241 = vst [vmem:[#allocation10_spill] sm:$0xff] %v9119_v40 }
 0x33c   : > { %6745 = vmatmul.msk.f32.gmra.mxu3 %vm3170_vm2, %v9081_v35 }
 0x33d   : > { %10236 = vst [vmem:[#allocation7_spill] sm:$0xff] %v9085_v57  ;;  %v9089_v17 = vpop.f32.mrf.mxu1  ;;  %v9191_v57 = vld [vmem:[#allocation2 + $0x158] sm:$0xff] }
 0x33e   : > { %v3663_v62 = vpop.f32.mrf.mxu2  ;;  %10252 = vst [vmem:[#allocation24_spill] sm:$0xff] %v9191_v57 }
 0x33f   : > { %v3664_v59 = vadd.f32 %v3663_v62, %v8789_v0  ;;  %v3906_v39 = vpop.f32.mrf.mxu3 }
 0x340   : > { %v4184_v32 = vpop.f32.mrf.mxu0  ;;  %6792 = vmatmul.msk.f32.gmra.mxu1 %vm3170_vm2, %v9092_v24 }
 0x341   : > { %v3992_v8 = vadd.f32 %v3906_v39, %v3664_v59  ;;  %v9130_v39 = vld [vmem:[#allocation2 + $0x49] sm:$0xff] }
 0x342   : > { %6779 = vmatmul.msk.f32.gmra.mxu0 %vm3170_vm2, %v9096_v27 }
 0x343   : > { %6713 = vmatmul.msk.f32.gmra.mxu2 %vm3170_vm2, %v9061_v51  ;;  %v9104_v52 = vadd.f32 %v4181_v42, %v3992_v8 }
 0x344   : > { %6746 = vmatmul.msk.f32.gmra.mxu3 %vm3170_vm2, %v9100_v34  ;;  %v9229_v34 = vld [vmem:[#allocation2 + $0x170] sm:$0xff] }
 0x345   : > { %10239 = vst [vmem:[#allocation38_spill] sm:$0xff] %v9104_v52  ;;  %v9108_v0 = vpop.f32.mrf.mxu1  ;;  %v9153_v52 = vld [vmem:[#allocation2 + $0x140] sm:$0xff] }
 0x346   : > { %v3666_v13 = vpop.f32.mrf.mxu2  ;;  %10246 = vst [vmem:[#allocation18_spill] sm:$0xff] %v9153_v52 }
 0x347   : > { %v3667_v25 = vadd.f32 %v3666_v13, %v8809_v60  ;;  %v3909_v16 = vpop.f32.mrf.mxu3  ;;  %v9134_v13 = vld [vmem:[#allocation2 + $0x138] sm:$0xff]  ;;  %10258 = vst [vmem:[#allocation30_spill] sm:$0xff] %v9229_v34 }
 0x348   : > { %v4187_v58 = vpop.f32.mrf.mxu0  ;;  %6793 = vmatmul.msk.f32.gmra.mxu1 %vm3170_vm2, %v9111_v3  ;;  %10243 = vst [vmem:[#allocation11_spill] sm:$0xff] %v9134_v13 }
 0x349   : > { %v3993_v38 = vadd.f32 %v3909_v16, %v3667_v25 }
 0x34a   : > { %6780 = vmatmul.msk.f32.gmra.mxu0 %vm3170_vm2, %v9115_v10 }
 0x34b   : > { %6714 = vmatmul.msk.f32.gmra.mxu2 %vm3170_vm2, %v9077_v19  ;;  %v9123_v42 = vadd.f32 %v4184_v32, %v3993_v38  ;;  %v9138_v32 = vld [vmem:[#allocation2 + $0x122] sm:$0xff] }
 0x34c   : > { %6747 = vmatmul.msk.f32.gmra.mxu3 %vm3170_vm2, %v9119_v40  ;;  %10244 = vst [vmem:[#allocation16_spill] sm:$0xff] %v9138_v32  ;;  %v9172_v40 = vld [vmem:[#allocation2 + $0x150] sm:$0xff]  ;;  %v9267_v19 = vld [vmem:[#allocation2 + $0x188] sm:$0xff] }
 0x34d   : > { %10242 = vst [vmem:[#allocation14_spill] sm:$0xff] %v9123_v42  ;;  %v9127_v60 = vpop.f32.mrf.mxu1 }
 0x34e   : > { %v3669_v50 = vpop.f32.mrf.mxu2  ;;  %10249 = vst [vmem:[#allocation17_spill] sm:$0xff] %v9172_v40 }
 0x34f   : > { %v3670_v23 = vadd.f32 %v3669_v50, %v8828_v28  ;;  %v3912_v62 = vpop.f32.mrf.mxu3  ;;  %10264 = vst [vmem:[#allocation36_spill] sm:$0xff] %v9267_v19 }
 0x350   : > { %v4190_v59 = vpop.f32.mrf.mxu0  ;;  %6794 = vmatmul.msk.f32.gmra.mxu1 %vm3170_vm2, %v9130_v39 }
 0x351   : > { %v3994_v8 = vadd.f32 %v3912_v62, %v3670_v23  ;;  %v9149_v62 = vld [vmem:[#allocation2 + $0x51] sm:$0xff] }
 0x352   : > { %6781 = vmatmul.msk.f32.gmra.mxu0 %vm3170_vm2, %v9134_v13 }
 0x353   : > { %6715 = vmatmul.msk.f32.gmra.mxu2 %vm3170_vm2, %v9096_v27  ;;  %v9142_v25 = vadd.f32 %v4187_v58, %v3994_v8  ;;  %v9157_v58 = vld [vmem:[#allocation2 + $0x12a] sm:$0xff] }
 0x354   : > { %6748 = vmatmul.msk.f32.gmra.mxu3 %vm3170_vm2, %v9138_v32  ;;  %10247 = vst [vmem:[#allocation15_spill] sm:$0xff] %v9157_v58  ;;  %v9168_v32 = vld [vmem:[#allocation2 + $0x61] sm:$0xff] }
 0x355   : > { %10245 = vst [vmem:[#allocation13_spill] sm:$0xff] %v9142_v25  ;;  %v9146_v28 = vpop.f32.mrf.mxu1  ;;  %v9210_v27 = vld [vmem:[#allocation2 + $0x168] sm:$0xff] }
 0x356   : > { %v3672_v16 = vpop.f32.mrf.mxu2  ;;  %10255 = vst [vmem:[#allocation23_spill] sm:$0xff] %v9210_v27 }
 0x357   : > { %v3673_v38 = vadd.f32 %v3672_v16, %v8847_v61  ;;  %v3915_v50 = vpop.f32.mrf.mxu3 }
 0x358   : > { %v4193_v23 = vpop.f32.mrf.mxu0  ;;  %6795 = vmatmul.msk.f32.gmra.mxu1 %vm3170_vm2, %v9149_v62 }
 0x359   : > { %v3995_v42 = vadd.f32 %v3915_v50, %v3673_v38 }
 0x35a   : > { %6782 = vmatmul.msk.f32.gmra.mxu0 %vm3170_vm2, %v9153_v52 }
 0x35b   : > { %6716 = vmatmul.msk.f32.gmra.mxu2 %vm3170_vm2, %v9115_v10  ;;  %v9161_v8 = vadd.f32 %v4190_v59, %v3995_v42  ;;  %v9176_v42 = vld [vmem:[#allocation2 + $0x13a] sm:$0xff] }
 0x35c   : > { %6749 = vmatmul.msk.f32.gmra.mxu3 %vm3170_vm2, %v9157_v58  ;;  %10250 = vst [vmem:[#allocation22_spill] sm:$0xff] %v9176_v42  ;;  %v9187_v58 = vld [vmem:[#allocation2 + $0x69] sm:$0xff] }
 0x35d   : > { %10248 = vst [vmem:[#allocation20_spill] sm:$0xff] %v9161_v8  ;;  %v9165_v61 = vpop.f32.mrf.mxu1 }
 0x35e   : > { %v3675_v16 = vpop.f32.mrf.mxu2 }
 0x35f   : > { %v3676_v38 = vadd.f32 %v3675_v16, %v8865_v2  ;;  %v3918_v50 = vpop.f32.mrf.mxu3 }
 0x360   : > { %v4196_v25 = vpop.f32.mrf.mxu0  ;;  %6796 = vmatmul.msk.f32.gmra.mxu1 %vm3170_vm2, %v9168_v32 }
 0x361   : > { %v3996_v10 = vadd.f32 %v3918_v50, %v3676_v38 }
 0x362   : > { %6783 = vmatmul.msk.f32.gmra.mxu0 %vm3170_vm2, %v9172_v40 }
 0x363   : > { %6717 = vmatmul.msk.f32.gmra.mxu2 %vm3170_vm2, %v9134_v13  ;;  %v9180_v59 = vadd.f32 %v4193_v23, %v3996_v10  ;;  %v9195_v10 = vld [vmem:[#allocation2 + $0x142] sm:$0xff] }
 0x364   : > { %6750 = vmatmul.msk.f32.gmra.mxu3 %vm3170_vm2, %v9176_v42  ;;  %10253 = vst [vmem:[#allocation21_spill] sm:$0xff] %v9195_v10  ;;  %v9206_v42 = vld [vmem:[#allocation2 + $0x79] sm:$0xff] }
 0x365   : > { %10251 = vst [vmem:[#allocation19_spill] sm:$0xff] %v9180_v59  ;;  %v9184_v2 = vpop.f32.mrf.mxu1 }
 0x366   : > { %v3678_v16 = vpop.f32.mrf.mxu2 }
 0x367   : > { %v3679_v38 = vadd.f32 %v3678_v16, %v8894_v37  ;;  %v3921_v50 = vpop.f32.mrf.mxu3 }
 0x368   : > { %v4199_v8 = vpop.f32.mrf.mxu0  ;;  %6797 = vmatmul.msk.f32.gmra.mxu1 %vm3170_vm2, %v9187_v58 }
 0x369   : > { %v3997_v13 = vadd.f32 %v3921_v50, %v3679_v38 }
 0x36a   : > { %6784 = vmatmul.msk.f32.gmra.mxu0 %vm3170_vm2, %v9191_v57 }
 0x36b   : > { %6718 = vmatmul.msk.f32.gmra.mxu2 %vm3170_vm2, %v9153_v52  ;;  %v9199_v23 = vadd.f32 %v4196_v25, %v3997_v13  ;;  %v9214_v13 = vld [vmem:[#allocation2 + $0x152] sm:$0xff] }
 0x36c   : > { %6751 = vmatmul.msk.f32.gmra.mxu3 %vm3170_vm2, %v9195_v10  ;;  %10256 = vst [vmem:[#allocation28_spill] sm:$0xff] %v9214_v13  ;;  %v9225_v10 = vld [vmem:[#allocation2 + $0x81] sm:$0xff] }
 0x36d   : > { %10254 = vst [vmem:[#allocation26_spill] sm:$0xff] %v9199_v23  ;;  %v9203_v37 = vpop.f32.mrf.mxu1 }
 0x36e   : > { %v3681_v16 = vpop.f32.mrf.mxu2 }
 0x36f   : > { %v3682_v38 = vadd.f32 %v3681_v16, %v8922_v48  ;;  %v3924_v50 = vpop.f32.mrf.mxu3 }
 0x370   : > { %v4202_v59 = vpop.f32.mrf.mxu0  ;;  %6798 = vmatmul.msk.f32.gmra.mxu1 %vm3170_vm2, %v9206_v42 }
 0x371   : > { %v3998_v52 = vadd.f32 %v3924_v50, %v3682_v38 }
 0x372   : > { %6785 = vmatmul.msk.f32.gmra.mxu0 %vm3170_vm2, %v9210_v27 }
 0x373   : > { %6719 = vmatmul.msk.f32.gmra.mxu2 %vm3170_vm2, %v9172_v40  ;;  %v9218_v25 = vadd.f32 %v4199_v8, %v3998_v52  ;;  %v9233_v52 = vld [vmem:[#allocation2 + $0x15a] sm:$0xff] }
 0x374   : > { %6752 = vmatmul.msk.f32.gmra.mxu3 %vm3170_vm2, %v9214_v13  ;;  %10259 = vst [vmem:[#allocation27_spill] sm:$0xff] %v9233_v52  ;;  %v9244_v13 = vld [vmem:[#allocation2 + $0x91] sm:$0xff] }
 0x375   : > { %10257 = vst [vmem:[#allocation25_spill] sm:$0xff] %v9218_v25  ;;  %v9222_v48 = vpop.f32.mrf.mxu1 }
 0x376   : > { %v3684_v16 = vpop.f32.mrf.mxu2 }
 0x377   : > { %v3685_v38 = vadd.f32 %v3684_v16, %v8951_v12  ;;  %v3927_v50 = vpop.f32.mrf.mxu3 }
 0x378   : > { %v4205_v23 = vpop.f32.mrf.mxu0  ;;  %6799 = vmatmul.msk.f32.gmra.mxu1 %vm3170_vm2, %v9225_v10 }
 0x379   : > { %v3999_v40 = vadd.f32 %v3927_v50, %v3685_v38 }
 0x37a   : > { %6786 = vmatmul.msk.f32.gmra.mxu0 %vm3170_vm2, %v9229_v34 }
 0x37b   : > { %6720 = vmatmul.msk.f32.gmra.mxu2 %vm3170_vm2, %v9191_v57  ;;  %v9237_v8 = vadd.f32 %v4202_v59, %v3999_v40  ;;  %v9252_v40 = vld [vmem:[#allocation2 + $0x16a] sm:$0xff] }
 0x37c   : > { %6753 = vmatmul.msk.f32.gmra.mxu3 %vm3170_vm2, %v9233_v52  ;;  %10262 = vst [vmem:[#allocation34_spill] sm:$0xff] %v9252_v40  ;;  %v9263_v52 = vld [vmem:[#allocation2 + $0x99] sm:$0xff] }
 0x37d   : > { %10260 = vst [vmem:[#allocation32_spill] sm:$0xff] %v9237_v8  ;;  %v9241_v12 = vpop.f32.mrf.mxu1 }
 0x37e   : > { %v3687_v16 = vpop.f32.mrf.mxu2 }
 0x37f   : > { %v3688_v38 = vadd.f32 %v3687_v16, %v8987_v7  ;;  %v3930_v50 = vpop.f32.mrf.mxu3 }
 0x380   : > { %v4208_v25 = vpop.f32.mrf.mxu0  ;;  %6800 = vmatmul.msk.f32.gmra.mxu1 %vm3170_vm2, %v9244_v13 }
 0x381   : > { %v4000_v57 = vadd.f32 %v3930_v50, %v3688_v38 }
 0x382   : > { %6787 = vmatmul.msk.f32.gmra.mxu0 %vm3170_vm2, %v9248_v21  ;;  %v9282_v21 = vld [vmem:[#allocation2 + $0xa9] sm:$0xff] }
 0x383   : > { %6721 = vmatmul.msk.f32.gmra.mxu2 %vm3170_vm2, %v9210_v27  ;;  %v9256_v59 = vadd.f32 %v4205_v23, %v4000_v57  ;;  %v9271_v57 = vld [vmem:[#allocation2 + $0x172] sm:$0xff] }
 0x384   : > { %6754 = vmatmul.msk.f32.gmra.mxu3 %vm3170_vm2, %v9252_v40  ;;  %10265 = vst [vmem:[#allocation33_spill] sm:$0xff] %v9271_v57 }
 0x385   : > { %10263 = vst [vmem:[#allocation31_spill] sm:$0xff] %v9256_v59  ;;  %v9260_v7 = vpop.f32.mrf.mxu1 }
 0x386   : > { %v3690_v16 = vpop.f32.mrf.mxu2 }
 0x387   : > { %v3691_v38 = vadd.f32 %v3690_v16, %v9011_v15  ;;  %v3933_v50 = vpop.f32.mrf.mxu3 }
 0x388   : > { %v4211_v8 = vpop.f32.mrf.mxu0  ;;  %6801 = vmatmul.msk.f32.gmra.mxu1 %vm3170_vm2, %v9263_v52 }
 0x389   : > { %v4001_v27 = vadd.f32 %v3933_v50, %v3691_v38 }
 0x38a   : > { %6788 = vmatmul.msk.f32.gmra.mxu0 %vm3170_vm2, %v9267_v19  ;;  %v9295_v19 = vld [vmem:[#allocation2 + $0xb1] sm:$0xff] }
 0x38b   : > { %6722 = vmatmul.msk.f32.gmra.mxu2 %vm3170_vm2, %v9229_v34  ;;  %v9275_v23 = vadd.f32 %v4208_v25, %v4001_v27  ;;  %v4569_v34 = vld [vmem:[#allocation2 + $0x1a] sm:$0xff]  ;;  %v4845_v27 = vld [vmem:[#allocation2 + $0x30] sm:$0xff] }
 0x38c   : > { %6755 = vmatmul.msk.f32.gmra.mxu3 %vm3170_vm2, %v9271_v57 }
 0x38d   : > { %10266 = vst [vmem:[#allocation39_spill] sm:$0xff] %v9275_v23  ;;  %v9279_v15 = vpop.f32.mrf.mxu1 }
 0x38e   : > { %v3693_v16 = vpop.f32.mrf.mxu2 }
 0x38f   : > { %v3694_v38 = vadd.f32 %v3693_v16, %v9034_v31  ;;  %v3936_v50 = vpop.f32.mrf.mxu3 }
 0x390   : > { %v4214_v59 = vpop.f32.mrf.mxu0  ;;  %6802 = vmatmul.msk.f32.gmra.mxu1 %vm3170_vm2, %v9282_v21 }
 0x391   : > { %v4002_v40 = vadd.f32 %v3936_v50, %v3694_v38 }
 0x392   : > { %6889 = vmatmul.msk.f32.vlgmr.msra.gmra.mxu0 %vm3170_vm2, %v9092_v24  ;;  %v4846_v24 = vld [vmem:[#allocation2 + $0x38] sm:$0xff] }
 0x393   : > { %6823 = vmatmul.msk.f32.vlgmr.msra.gmra.mxu2 %vm3170_vm2, %v4569_v34  ;;  %v9289_v25 = vadd.f32 %v4211_v8, %v4002_v40  ;;  %v4570_v34 = vld [vmem:[#allocation2 + $0x22] sm:$0xff] }
 0x394   : > { %6856 = vmatmul.msk.f32.vlgmr.msra.gmra.mxu3 %vm3170_vm2, %v4845_v27 }
 0x395   : > { %10267 = vst [vmem:[#allocation35_spill] sm:$0xff] %v9289_v25  ;;  %v9292_v31 = vpop.f32.mrf.mxu1 }
 0x396   : > { %v3696_v16 = vpop.f32.mrf.mxu2 }
 0x397   : > { %v3697_v23 = vadd.f32 %v3696_v16, %v9056_v6  ;;  %v3939_v38 = vpop.f32.mrf.mxu3 }
 0x398   : > { %v4217_v50 = vpop.f32.mrf.mxu0  ;;  %6803 = vmatmul.msk.f32.gmra.mxu1 %vm3170_vm2, %v9295_v19 }
 0x399   : > { %v4003_v57 = vadd.f32 %v3939_v38, %v3697_v23  ;;  %v9308_v38 = vld [vmem:[#allocation2 + $0xc1] sm:$0xff] }
 0x39a   : > { %6890 = vmatmul.msk.f32.gmra.mxu0 %vm3170_vm2, %v9111_v3  ;;  %v4847_v3 = vld [vmem:[#allocation2 + $0x48] sm:$0xff] }
 0x39b   : > { %6824 = vmatmul.msk.f32.gmra.mxu2 %vm3170_vm2, %v4570_v34  ;;  %v9302_v8 = vadd.f32 %v4214_v59, %v4003_v57  ;;  %v9312_v34 = vld [vmem:[#allocation2 + $0x32] sm:$0xff] }
 0x39c   : > { %6857 = vmatmul.msk.f32.gmra.mxu3 %vm3170_vm2, %v4846_v24  ;;  %10269 = vst [vmem:[#allocation40_spill] sm:$0xff] %v9312_v34 }
 0x39d   : > { %10268 = vst [vmem:[#allocation37_spill] sm:$0xff] %v9302_v8  ;;  %v9305_v6 = vpop.f32.mrf.mxu1 }
 0x39e   : > { %v3699_v40 = vpop.f32.mrf.mxu2 }
 0x39f   : > { %v3700_v27 = vadd.f32 %v3699_v40, %v9073_v47  ;;  %v3942_v23 = vpop.f32.mrf.mxu3 }
 0x3a0   : > { %v4220_v16 = vpop.f32.mrf.mxu0  ;;  %6804 = vmatmul.msk.f32.gmra.mxu1 %vm3170_vm2, %v9308_v38 }
 0x3a1   : > { %v4004_v25 = vadd.f32 %v3942_v23, %v3700_v27  ;;  %v9324_v23 = vld [vmem:[#allocation2 + $0xc9] sm:$0xff] }
 0x3a2   : > { %6891 = vmatmul.msk.f32.gmra.mxu0 %vm3170_vm2, %v9130_v39  ;;  %v4848_v39 = vld [vmem:[#allocation2 + $0x50] sm:$0xff] }
 0x3a3   : > { %6825 = vmatmul.msk.f32.gmra.mxu2 %vm3170_vm2, %v9312_v34  ;;  %v9318_v59 = vadd.f32 %v4217_v50, %v4004_v25  ;;  %v9328_v34 = vld [vmem:[#allocation2 + $0x3a] sm:$0xff] }
 0x3a4   : > { %6858 = vmatmul.msk.f32.gmra.mxu3 %vm3170_vm2, %v4847_v3  ;;  %10271 = vst [vmem:[#allocation4_spill] sm:$0xff] %v9328_v34 }
 0x3a5   : > { %10270 = vst [vmem:[#allocation3_spill] sm:$0xff] %v9318_v59  ;;  %v9321_v47 = vpop.f32.mrf.mxu1 }
 0x3a6   : > { %v3702_v57 = vpop.f32.mrf.mxu2 }
 0x3a7   : > { %v3703_v24 = vadd.f32 %v3702_v57, %v9089_v17  ;;  %v3945_v40 = vpop.f32.mrf.mxu3 }
 0x3a8   : > { %v4223_v27 = vpop.f32.mrf.mxu0  ;;  %6805 = vmatmul.msk.f32.gmra.mxu1 %vm3170_vm2, %v9324_v23 }
 0x3a9   : > { %v4005_v8 = vadd.f32 %v3945_v40, %v3703_v24  ;;  %v9340_v40 = vld [vmem:[#allocation2 + $0xd9] sm:$0xff] }
 0x3aa   : > { %6892 = vmatmul.msk.f32.gmra.mxu0 %vm3170_vm2, %v9149_v62  ;;  %v4849_v62 = vld [vmem:[#allocation2 + $0x60] sm:$0xff] }
 0x3ab   : > { %6826 = vmatmul.msk.f32.gmra.mxu2 %vm3170_vm2, %v9328_v34  ;;  %v9334_v25 = vadd.f32 %v4220_v16, %v4005_v8  ;;  %v9344_v34 = vld [vmem:[#allocation2 + $0x4a] sm:$0xff] }
 0x3ac   : > { %6859 = vmatmul.msk.f32.gmra.mxu3 %vm3170_vm2, %v4848_v39  ;;  %10273 = vst [vmem:[#allocation42_spill] sm:$0xff] %v9344_v34 }
 0x3ad   : > { %10272 = vst [vmem:[#allocation41_spill] sm:$0xff] %v9334_v25  ;;  %v9337_v17 = vpop.f32.mrf.mxu1 }
 0x3ae   : > { %v3705_v50 = vpop.f32.mrf.mxu2 }
 0x3af   : > { %v3706_v3 = vadd.f32 %v3705_v50, %v9108_v0  ;;  %v3948_v57 = vpop.f32.mrf.mxu3 }
 0x3b0   : > { %v4226_v24 = vpop.f32.mrf.mxu0  ;;  %6806 = vmatmul.msk.f32.gmra.mxu1 %vm3170_vm2, %v9340_v40 }
 0x3b1   : > { %v4006_v59 = vadd.f32 %v3948_v57, %v3706_v3  ;;  %v9356_v57 = vld [vmem:[#allocation2 + $0xe1] sm:$0xff] }
 0x3b2   : > { %6893 = vmatmul.msk.f32.gmra.mxu0 %vm3170_vm2, %v9168_v32  ;;  %v4850_v32 = vld [vmem:[#allocation2 + $0x68] sm:$0xff] }
 0x3b3   : > { %6827 = vmatmul.msk.f32.gmra.mxu2 %vm3170_vm2, %v9344_v34  ;;  %v9350_v8 = vadd.f32 %v4223_v27, %v4006_v59  ;;  %v9360_v34 = vld [vmem:[#allocation2 + $0x52] sm:$0xff] }
 0x3b4   : > { %6860 = vmatmul.msk.f32.gmra.mxu3 %vm3170_vm2, %v4849_v62  ;;  %10275 = vst [vmem:[#allocation44_spill] sm:$0xff] %v9360_v34 }
 0x3b5   : > { %10274 = vst [vmem:[#allocation43_spill] sm:$0xff] %v9350_v8  ;;  %v9353_v0 = vpop.f32.mrf.mxu1 }
 0x3b6   : > { %v3708_v16 = vpop.f32.mrf.mxu2 }
 0x3b7   : > { %v3709_v39 = vadd.f32 %v3708_v16, %v9127_v60  ;;  %v3951_v50 = vpop.f32.mrf.mxu3 }
 0x3b8   : > { %v4229_v3 = vpop.f32.mrf.mxu0  ;;  %6807 = vmatmul.msk.f32.gmra.mxu1 %vm3170_vm2, %v9356_v57 }
 0x3b9   : > { %v4007_v25 = vadd.f32 %v3951_v50, %v3709_v39  ;;  %v9372_v50 = vld [vmem:[#allocation2 + $0xf1] sm:$0xff] }
 0x3ba   : > { %6894 = vmatmul.msk.f32.gmra.mxu0 %vm3170_vm2, %v9187_v58  ;;  %v4851_v58 = vld [vmem:[#allocation2 + $0x78] sm:$0xff] }
 0x3bb   : > { %6828 = vmatmul.msk.f32.gmra.mxu2 %vm3170_vm2, %v9360_v34  ;;  %v9366_v59 = vadd.f32 %v4226_v24, %v4007_v25  ;;  %v9376_v34 = vld [vmem:[#allocation2 + $0x62] sm:$0xff] }
 0x3bc   : > { %6861 = vmatmul.msk.f32.gmra.mxu3 %vm3170_vm2, %v4850_v32  ;;  %10277 = vst [vmem:[#allocation46_spill] sm:$0xff] %v9376_v34 }
 0x3bd   : > { %10276 = vst [vmem:[#allocation45_spill] sm:$0xff] %v9366_v59  ;;  %v9369_v60 = vpop.f32.mrf.mxu1 }
 0x3be   : > { %v3711_v27 = vpop.f32.mrf.mxu2 }
 0x3bf   : > { %v3712_v62 = vadd.f32 %v3711_v27, %v9146_v28  ;;  %v3954_v16 = vpop.f32.mrf.mxu3 }
 0x3c0   : > { %v4232_v39 = vpop.f32.mrf.mxu0  ;;  %6808 = vmatmul.msk.f32.gmra.mxu1 %vm3170_vm2, %v9372_v50 }
 0x3c1   : > { %v4008_v8 = vadd.f32 %v3954_v16, %v3712_v62  ;;  %v9388_v16 = vld [vmem:[#allocation2 + $0xf9] sm:$0xff] }
 0x3c2   : > { %6895 = vmatmul.msk.f32.gmra.mxu0 %vm3170_vm2, %v9206_v42  ;;  %v4852_v42 = vld [vmem:[#allocation2 + $0x80] sm:$0xff] }
 0x3c3   : > { %6829 = vmatmul.msk.f32.gmra.mxu2 %vm3170_vm2, %v9376_v34  ;;  %v9382_v25 = vadd.f32 %v4229_v3, %v4008_v8  ;;  %v9392_v34 = vld [vmem:[#allocation2 + $0x6a] sm:$0xff] }
 0x3c4   : > { %6862 = vmatmul.msk.f32.gmra.mxu3 %vm3170_vm2, %v4851_v58  ;;  %10279 = vst [vmem:[#allocation48_spill] sm:$0xff] %v9392_v34 }
 0x3c5   : > { %10278 = vst [vmem:[#allocation47_spill] sm:$0xff] %v9382_v25  ;;  %v9385_v28 = vpop.f32.mrf.mxu1 }
 0x3c6   : > { %v3714_v24 = vpop.f32.mrf.mxu2 }
 0x3c7   : > { %v3715_v32 = vadd.f32 %v3714_v24, %v9165_v61  ;;  %v3957_v27 = vpop.f32.mrf.mxu3 }
 0x3c8   : > { %v4235_v62 = vpop.f32.mrf.mxu0  ;;  %6809 = vmatmul.msk.f32.gmra.mxu1 %vm3170_vm2, %v9388_v16 }
 0x3c9   : > { %v4009_v59 = vadd.f32 %v3957_v27, %v3715_v32  ;;  %v9404_v27 = vld [vmem:[#allocation2 + $0x109] sm:$0xff] }
 0x3ca   : > { %6896 = vmatmul.msk.f32.gmra.mxu0 %vm3170_vm2, %v9225_v10  ;;  %v4853_v10 = vld [vmem:[#allocation2 + $0x90] sm:$0xff] }
 0x3cb   : > { %6830 = vmatmul.msk.f32.gmra.mxu2 %vm3170_vm2, %v9392_v34  ;;  %v9398_v8 = vadd.f32 %v4232_v39, %v4009_v59  ;;  %v9408_v34 = vld [vmem:[#allocation2 + $0x7a] sm:$0xff] }
 0x3cc   : > { %6863 = vmatmul.msk.f32.gmra.mxu3 %vm3170_vm2, %v4852_v42  ;;  %10281 = vst [vmem:[#allocation50_spill] sm:$0xff] %v9408_v34 }
 0x3cd   : > { %10280 = vst [vmem:[#allocation49_spill] sm:$0xff] %v9398_v8  ;;  %v9401_v61 = vpop.f32.mrf.mxu1  ;;  %v7106_v8 = vld [vmem:[#allocation2 + $0x111] sm:$0xff] }
 0x3ce   : > { %v3717_v3 = vpop.f32.mrf.mxu2 }
 0x3cf   : > { %v3718_v58 = vadd.f32 %v3717_v3, %v9184_v2  ;;  %v3960_v24 = vpop.f32.mrf.mxu3 }
 0x3d0   : > { %v4238_v32 = vpop.f32.mrf.mxu0  ;;  %6810 = vmatmul.msk.f32.gmra.mxu1 %vm3170_vm2, %v9404_v27 }
 0x3d1   : > { %v4010_v25 = vadd.f32 %v3960_v24, %v3718_v58 }
 0x3d2   : > { %6897 = vmatmul.msk.f32.gmra.mxu0 %vm3170_vm2, %v9244_v13 }
 0x3d3   : > { %6831 = vmatmul.msk.f32.gmra.mxu2 %vm3170_vm2, %v9408_v34  ;;  %v9414_v59 = vadd.f32 %v4235_v62, %v4010_v25  ;;  %v7107_v34 = vld [vmem:[#allocation2 + $0x82] sm:$0xff]  ;;  %v7108_v25 = vld [vmem:[#allocation2 + $0x98] sm:$0xff] }
 0x3d4   : > { %6864 = vmatmul.msk.f32.gmra.mxu3 %vm3170_vm2, %v4853_v10 }
 0x3d5   : > { %v9417_v2 = vpop.f32.mrf.mxu1 }
 0x3d6   : > { %v3720_v39 = vpop.f32.mrf.mxu2 }
 0x3d7   : > { %v3721_v42 = vadd.f32 %v3720_v39, %v9203_v37  ;;  %v3963_v3 = vpop.f32.mrf.mxu3 }
 0x3d8   : > { %v4241_v58 = vpop.f32.mrf.mxu0  ;;  %6811 = vmatmul.msk.f32.gmra.mxu1 %vm3170_vm2, %v7106_v8  ;;  %v7109_v8 = vld [vmem:[#allocation2 + $0x121] sm:$0xff] }
 0x3d9   : > { %v4011_v24 = vadd.f32 %v3963_v3, %v3721_v42 }
 0x3da   : > { %6898 = vmatmul.msk.f32.gmra.mxu0 %vm3170_vm2, %v9263_v52 }
 0x3db   : > { %6832 = vmatmul.msk.f32.gmra.mxu2 %vm3170_vm2, %v7107_v34  ;;  %v9424_v13 = vadd.f32 %v4238_v32, %v4011_v24  ;;  %v7110_v34 = vld [vmem:[#allocation2 + $0x92] sm:$0xff]  ;;  %v7111_v32 = vld [vmem:[#allocation2 + $0xa8] sm:$0xff] }
 0x3dc   : > { %6865 = vmatmul.msk.f32.gmra.mxu3 %vm3170_vm2, %v7108_v25 }
 0x3dd   : > { %v9427_v62 = vpop.f32.mrf.mxu1 }
 0x3de   : > { %v3723_v37 = vpop.f32.mrf.mxu2 }
 0x3df   : > { %v3724_v10 = vadd.f32 %v3723_v37, %v9222_v48  ;;  %v3966_v39 = vpop.f32.mrf.mxu3 }
 0x3e0   : > { %v4244_v42 = vpop.f32.mrf.mxu0  ;;  %6812 = vmatmul.msk.f32.gmra.mxu1 %vm3170_vm2, %v7109_v8 }
 0x3e1   : > { %v4012_v3 = vadd.f32 %v3966_v39, %v3724_v10 }
 0x3e2   : > { %6899 = vmatmul.msk.f32.gmra.mxu0 %vm3170_vm2, %v9282_v21 }
 0x3e3   : > { %6833 = vmatmul.msk.f32.gmra.mxu2 %vm3170_vm2, %v7110_v34  ;;  %v9434_v52 = vadd.f32 %v4241_v58, %v4012_v3 }
 0x3e4   : > { %6866 = vmatmul.msk.f32.gmra.mxu3 %vm3170_vm2, %v7111_v32 }
 0x3e5   : > { %v9437_v24 = vpop.f32.mrf.mxu1 }
 0x3e6   : > { %v3726_v48 = vpop.f32.mrf.mxu2 }
 0x3e7   : > { %v3727_v25 = vadd.f32 %v3726_v48, %v9241_v12  ;;  %v3969_v37 = vpop.f32.mrf.mxu3 }
 0x3e8   : > { %v4247_v10 = vpop.f32.mrf.mxu0  ;;  %6813 = vmatmul.msk.f32.gmra.mxu1 %vm3170_vm2, %v8869_v63 }
 0x3e9   : > { %v4013_v39 = vadd.f32 %v3969_v37, %v3727_v25 }
 0x3ea   : > { %6900 = vmatmul.msk.f32.gmra.mxu0 %vm3170_vm2, %v9295_v19 }
 0x3eb   : > { %6834 = vmatmul.msk.f32.gmra.mxu2 %vm3170_vm2, %v8880_v22  ;;  %v9446_v21 = vadd.f32 %v4244_v42, %v4013_v39 }
 0x3ec   : > { %6867 = vmatmul.msk.f32.gmra.mxu3 %vm3170_vm2, %v8876_v56 }
 0x3ed   : > { %v9450_v58 = vpop.f32.mrf.mxu1 }
 0x3ee   : > { %v3729_v12 = vpop.f32.mrf.mxu2 }
 0x3ef   : > { %v3730_v3 = vadd.f32 %v3729_v12, %v9260_v7  ;;  %v3972_v8 = vpop.f32.mrf.mxu3 }
 0x3f0   : > { %v4250_v34 = vpop.f32.mrf.mxu0  ;;  %6814 = vmatmul.msk.f32.gmra.mxu1 %vm3170_vm2, %v8899_v9 }
 0x3f1   : > { %v4014_v32 = vadd.f32 %v3972_v8, %v3730_v3 }
 0x3f2   : > { %6901 = vmatmul.msk.f32.gmra.mxu0 %vm3170_vm2, %v9308_v38 }
 0x3f3   : > { %6835 = vmatmul.msk.f32.gmra.mxu2 %vm3170_vm2, %v8907_v29  ;;  %v9459_v63 = vadd.f32 %v4247_v10, %v4014_v32 }
 0x3f4   : > { %6868 = vmatmul.msk.f32.gmra.mxu3 %vm3170_vm2, %v8904_v33 }
 0x3f5   : > { %v9463_v56 = vpop.f32.mrf.mxu1 }
 0x3f6   : > { %v3732_v22 = vpop.f32.mrf.mxu2 }
 0x3f7   : > { %v3733_v19 = vadd.f32 %v3732_v22, %v9279_v15  ;;  %v3975_v7 = vpop.f32.mrf.mxu3 }
 0x3f8   : > { %v4253_v42 = vpop.f32.mrf.mxu0  ;;  %6815 = vmatmul.msk.f32.gmra.mxu1 %vm3170_vm2, %v8925_v1 }
 0x3f9   : > { %v4015_v48 = vadd.f32 %v3975_v7, %v3733_v19 }
 0x3fa   : > { %6902 = vmatmul.msk.f32.gmra.mxu0 %vm3170_vm2, %v9324_v23 }
 0x3fb   : > { %6836 = vmatmul.msk.f32.gmra.mxu2 %vm3170_vm2, %v8937_v55  ;;  %v9472_v9 = vadd.f32 %v4250_v34, %v4015_v48 }
 0x3fc   : > { %6869 = vmatmul.msk.f32.gmra.mxu3 %vm3170_vm2, %v8932_v30 }
 0x3fd   : > { %10282 = vst [vmem:[#allocation51_spill] sm:$0xff] %v9472_v9  ;;  %v9476_v33 = vpop.f32.mrf.mxu1 }
 0x3fe   : > { %v3735_v29 = vpop.f32.mrf.mxu2 }
 0x3ff   : > { %v3736_v15 = vadd.f32 %v3735_v29, %v9292_v31  ;;  %v3978_v38 = vpop.f32.mrf.mxu3 }
 0x400   : > { %v4256_v25 = vpop.f32.mrf.mxu0  ;;  %6816 = vmatmul.msk.f32.gmra.mxu1 %vm3170_vm2, %v8954_v20 }
 0x401   : > { %v4016_v37 = vadd.f32 %v3978_v38, %v3736_v15 }
 0x402   : > { %6903 = vmatmul.msk.f32.gmra.mxu0 %vm3170_vm2, %v9340_v40 }
 0x403   : > { %6837 = vmatmul.msk.f32.gmra.mxu2 %vm3170_vm2, %v8978_v5  ;;  %v9485_v1 = vadd.f32 %v4253_v42, %v4016_v37  ;;  %v9549_v42 = vld [vmem:[#allocation2 + $0x189] sm:$0xff] }
 0x404   : > { %6870 = vmatmul.msk.f32.gmra.mxu3 %vm3170_vm2, %v8973_v46 }
 0x405   : > { %10283 = vst [vmem:[#allocation52_spill] sm:$0xff] %v9485_v1  ;;  %v9489_v30 = vpop.f32.mrf.mxu1 }
 0x406   : > { %v3738_v55 = vpop.f32.mrf.mxu2 }
 0x407   : > { %v3739_v31 = vadd.f32 %v3738_v55, %v9305_v6  ;;  %v3981_v23 = vpop.f32.mrf.mxu3 }
 0x408   : > { %v4259_v10 = vpop.f32.mrf.mxu0  ;;  %6817 = vmatmul.msk.f32.gmra.mxu1 %vm3170_vm2, %v8990_v11 }
 0x409   : > { %v4017_v39 = vadd.f32 %v3981_v23, %v3739_v31  ;;  %v10288_v31 = vld [vmem:[#allocation40_spill] sm:$0xff] }
 0x40a   : > { %6904 = vmatmul.msk.f32.gmra.mxu0 %vm3170_vm2, %v9356_v57 }
 0x40b   : > { %6838 = vmatmul.msk.f32.gmra.mxu2 %vm3170_vm2, %v9001_v53  ;;  %v9498_v20 = vadd.f32 %v4256_v25, %v4017_v39 }
 0x40c   : > { %6871 = vmatmul.msk.f32.gmra.mxu3 %vm3170_vm2, %v8997_v4  ;;  %v4537_v4 = vadd.f32 %v9337_v17, %v9008_v49  ;;  %v4538_v49 = vadd.f32 %v9353_v0, %v9028_v14  ;;  %v4539_v14 = vadd.f32 %v9369_v60, %v9050_v43  ;;  %v10286_v43 = vld [vmem:[#allocation6_spill] sm:$0xff]  ;;  %v10287_v60 = vld [vmem:[#allocation5_spill] sm:$0xff] }
 0x40d   : > { %10284 = vst [vmem:[#allocation53_spill] sm:$0xff] %v9498_v20  ;;  %v9502_v46 = vpop.f32.mrf.mxu1  ;;  %v4540_v29 = vadd.f32 %v9385_v28, %v10287_v60  ;;  %v10291_v28 = vld [vmem:[#allocation7_spill] sm:$0xff] }
 0x40e   : > { %v3741_v5 = vpop.f32.mrf.mxu2 }
 0x40f   : > { %v3742_v6 = vadd.f32 %v3741_v5, %v9321_v47  ;;  %v3984_v40 = vpop.f32.mrf.mxu3  ;;  %v10290_v5 = vld [vmem:[#allocation8_spill] sm:$0xff] }
 0x410   : > { %v5267_v12 = vpop.f32.mrf.mxu0  ;;  %6818 = vmatmul.msk.f32.gmra.mxu1 %vm3170_vm2, %v9016_v36 }
 0x411   : > { %v4018_v3 = vadd.f32 %v3984_v40, %v3742_v6  ;;  %v4541_v6 = vadd.f32 %v9401_v61, %v10291_v28  ;;  %v10295_v61 = vld [vmem:[#allocation38_spill] sm:$0xff] }
 0x412   : > { %6905 = vmatmul.msk.f32.gmra.mxu0 %vm3170_vm2, %v9372_v50 }
 0x413   : > { %6839 = vmatmul.msk.f32.gmra.mxu2 %vm3170_vm2, %v9024_v45  ;;  %v9511_v11 = vadd.f32 %v4259_v10, %v4018_v3  ;;  %v10289_v10 = vld [vmem:[#allocation9_spill] sm:$0xff] }
 0x414   : > { %6872 = vmatmul.msk.f32.gmra.mxu3 %vm3170_vm2, %v9020_v18 }
 0x415   : > { %10285 = vst [vmem:[#allocation54_spill] sm:$0xff] %v9511_v11  ;;  %v9517_v53 = vpop.f32.mrf.mxu1 }
 0x416   : > { %v4716_v47 = vpop.f32.mrf.mxu2 }
 0x417   : > { %v4812_v57 = vadd.f32 %v4716_v47, %v4537_v4  ;;  %v4992_v8 = vpop.f32.mrf.mxu3 }
 0x418   : > { %v5270_v36 = vpop.f32.mrf.mxu0  ;;  %6819 = vmatmul.msk.f32.gmra.mxu1 %vm3170_vm2, %v9037_v44  ;;  %v9533_v44 = vld [vmem:[#allocation2 + $0x181] sm:$0xff] }
 0x419   : > { %v5088_v34 = vadd.f32 %v4992_v8, %v4812_v57  ;;  %v10292_v57 = vld [vmem:[#allocation4_spill] sm:$0xff]  ;;  %v5141_v8 = vld [vmem:[#allocation2 + $0x129] sm:$0xff] }
 0x41a   : > { %6906 = vmatmul.msk.f32.gmra.mxu0 %vm3170_vm2, %v9388_v16 }
 0x41b   : > { %6840 = vmatmul.msk.f32.gmra.mxu2 %vm3170_vm2, %v9046_v41  ;;  %v9525_v18 = vadd.f32 %v5267_v12, %v5088_v34 }
 0x41c   : > { %6873 = vmatmul.msk.f32.gmra.mxu3 %vm3170_vm2, %v9042_v26 }
 0x41d   : > { %v9531_v45 = vpop.f32.mrf.mxu1 }
 0x41e   : > { %v4719_v17 = vpop.f32.mrf.mxu2 }
 0x41f   : > { %v4813_v50 = vadd.f32 %v4719_v17, %v4538_v49  ;;  %v4995_v32 = vpop.f32.mrf.mxu3  ;;  %v10294_v49 = vld [vmem:[#allocation12_spill] sm:$0xff]  ;;  %v4542_v17 = vadd.f32 %v9417_v2, %v10295_v61  ;;  %v10299_v2 = vld [vmem:[#allocation14_spill] sm:$0xff] }
 0x420   : > { %v5273_v22 = vpop.f32.mrf.mxu0  ;;  %6820 = vmatmul.msk.f32.gmra.mxu1 %vm3170_vm2, %v9533_v44 }
 0x421   : > { %v5089_v41 = vadd.f32 %v4995_v32, %v4813_v50 }
 0x422   : > { %6907 = vmatmul.msk.f32.gmra.mxu0 %vm3170_vm2, %v9404_v27  ;;  %v5139_v27 = vld [vmem:[#allocation2 + $0x111] sm:$0xff] }
 0x423   : > { %6841 = vmatmul.msk.f32.gmra.mxu2 %vm3170_vm2, %v9065_v54  ;;  %v9541_v26 = vadd.f32 %v5270_v36, %v5089_v41  ;;  %v10293_v36 = vld [vmem:[#allocation10_spill] sm:$0xff] }
 0x424   : > { %6874 = vmatmul.msk.f32.gmra.mxu3 %vm3170_vm2, %v9061_v51 }
 0x425   : > { %v9547_v0 = vpop.f32.mrf.mxu1 }
 0x426   : > { %v4722_v16 = vpop.f32.mrf.mxu2 }
 0x427   : > { %v4814_v19 = vadd.f32 %v4722_v16, %v4539_v14  ;;  %v4998_v7 = vpop.f32.mrf.mxu3 }
 0x428   : > { %6821 = vmatmul.msk.f32.gmra.mxu1 %vm3170_vm2, %v9549_v42  ;;  %v5276_v54 = vpop.f32.mrf.mxu0 }
 0x429   : > { %v5090_v48 = vadd.f32 %v4998_v7, %v4814_v19  ;;  %v10296_v19 = vld [vmem:[#allocation42_spill] sm:$0xff]  ;;  %v5142_v7 = vld [vmem:[#allocation2 + $0x139] sm:$0xff] }
 0x42a   : > { %6908 = vmatmul.msk.f32.gmra.mxu0 %vm3170_vm2, %v5139_v27  ;;  %v10298_v27 = vld [vmem:[#allocation11_spill] sm:$0xff] }
 0x42b   : > { %6842 = vmatmul.msk.f32.gmra.mxu2 %vm3170_vm2, %v9081_v35  ;;  %v9556_v51 = vadd.f32 %v5273_v22, %v5090_v48  ;;  %v5140_v35 = vld [vmem:[#allocation2 + $0x121] sm:$0xff]  ;;  %v10297_v48 = vld [vmem:[#allocation16_spill] sm:$0xff] }
 0x42c   : > { %6875 = vmatmul.msk.f32.gmra.mxu3 %vm3170_vm2, %v10286_v43  ;;  %v4543_v43 = vadd.f32 %v9427_v62, %v10299_v2  ;;  %v10303_v62 = vld [vmem:[#allocation13_spill] sm:$0xff] }
 0x42d   : > { %v9562_v15 = vpop.f32.mrf.mxu1  ;;  %v4544_v28 = vadd.f32 %v9437_v24, %v10303_v62  ;;  %v10317_v62 = vld [vmem:[#allocation33_spill] sm:$0xff] }
 0x42e   : > { %v4725_v38 = vpop.f32.mrf.mxu2 }
 0x42f   : > { %v4815_v25 = vadd.f32 %v4725_v38, %v4540_v29  ;;  %v5001_v37 = vpop.f32.mrf.mxu3 }
 0x430   : > { %6922 = vmatmul.msk.f32.vlgmr.msra.gmra.mxu1 %vm3170_vm2, %v10288_v31  ;;  %v5279_v23 = vpop.f32.mrf.mxu0  ;;  %v10300_v31 = vld [vmem:[#allocation44_spill] sm:$0xff] }
 0x431   : > { %v5091_v55 = vadd.f32 %v5001_v37, %v4815_v25 }
 0x432   : > { %6909 = vmatmul.msk.f32.gmra.mxu0 %vm3170_vm2, %v5140_v35  ;;  %v5143_v35 = vld [vmem:[#allocation2 + $0x141] sm:$0xff] }
 0x433   : > { %6843 = vmatmul.msk.f32.gmra.mxu2 %vm3170_vm2, %v10289_v10  ;;  %v9569_v39 = vadd.f32 %v5276_v54, %v5091_v55 }
 0x434   : > { %6876 = vmatmul.msk.f32.gmra.mxu3 %vm3170_vm2, %v10290_v5  ;;  %v10302_v5 = vld [vmem:[#allocation18_spill] sm:$0xff] }
 0x435   : > { %v9575_v40 = vpop.f32.mrf.mxu1 }
 0x436   : > { %v4728_v12 = vpop.f32.mrf.mxu2 }
 0x437   : > { %v4816_v3 = vadd.f32 %v4728_v12, %v4541_v6  ;;  %v5004_v4 = vpop.f32.mrf.mxu3 }
 0x438   : > { %6923 = vmatmul.msk.f32.gmra.mxu1 %vm3170_vm2, %v10292_v57  ;;  %v5282_v50 = vpop.f32.mrf.mxu0  ;;  %v10304_v57 = vld [vmem:[#allocation46_spill] sm:$0xff] }
 0x439   : > { %v5092_v47 = vadd.f32 %v5004_v4, %v4816_v3 }
 0x43a   : > { %6910 = vmatmul.msk.f32.gmra.mxu0 %vm3170_vm2, %v5141_v8 }
 0x43b   : > { %6844 = vmatmul.msk.f32.gmra.mxu2 %vm3170_vm2, %v10293_v36  ;;  %v9582_v34 = vadd.f32 %v5279_v23, %v5092_v47  ;;  %v10301_v23 = vld [vmem:[#allocation15_spill] sm:$0xff] }
 0x43c   : > { %6877 = vmatmul.msk.f32.gmra.mxu3 %vm3170_vm2, %v10294_v49  ;;  %v5144_v36 = vld [vmem:[#allocation2 + $0x151] sm:$0xff]  ;;  %v10305_v49 = vld [vmem:[#allocation22_spill] sm:$0xff] }
 0x43d   : > { %v9588_v32 = vpop.f32.mrf.mxu1 }
 0x43e   : > { %v4731_v22 = vpop.f32.mrf.mxu2 }
 0x43f   : > { %v4817_v41 = vadd.f32 %v4731_v22, %v4542_v17  ;;  %v5007_v14 = vpop.f32.mrf.mxu3  ;;  %v10306_v17 = vld [vmem:[#allocation17_spill] sm:$0xff] }
 0x440   : > { %6924 = vmatmul.msk.f32.gmra.mxu1 %vm3170_vm2, %v10296_v19  ;;  %v5285_v37 = vpop.f32.mrf.mxu0  ;;  %v5145_v22 = vld [vmem:[#allocation2 + $0x159] sm:$0xff]  ;;  %v10310_v19 = vld [vmem:[#allocation50_spill] sm:$0xff] }
 0x441   : > { %v5093_v16 = vadd.f32 %v5007_v14, %v4817_v41  ;;  %v10308_v41 = vld [vmem:[#allocation21_spill] sm:$0xff]  ;;  %v10309_v14 = vld [vmem:[#allocation24_spill] sm:$0xff] }
 0x442   : > { %6911 = vmatmul.msk.f32.gmra.mxu0 %vm3170_vm2, %v5142_v7  ;;  %v5146_v7 = vld [vmem:[#allocation2 + $0x169] sm:$0xff] }
 0x443   : > { %6845 = vmatmul.msk.f32.gmra.mxu2 %vm3170_vm2, %v10297_v48  ;;  %v9595_v54 = vadd.f32 %v5282_v50, %v5093_v16  ;;  %v10307_v50 = vld [vmem:[#allocation48_spill] sm:$0xff] }
 0x444   : > { %6878 = vmatmul.msk.f32.gmra.mxu3 %vm3170_vm2, %v10298_v27  ;;  %v10311_v48 = vld [vmem:[#allocation28_spill] sm:$0xff]  ;;  %v10312_v27 = vld [vmem:[#allocation23_spill] sm:$0xff] }
 0x445   : > { %v9601_v60 = vpop.f32.mrf.mxu1 }
 0x446   : > { %v4734_v29 = vpop.f32.mrf.mxu2 }
 0x447   : > { %v4818_v38 = vadd.f32 %v4734_v29, %v4543_v43  ;;  %v5010_v25 = vpop.f32.mrf.mxu3  ;;  %v5402_v43 = vld [vmem:[#allocation2 + $0x82] sm:$0xff]  ;;  %v5147_v29 = vld [vmem:[#allocation2 + $0x171] sm:$0xff] }
 0x448   : > { %6925 = vmatmul.msk.f32.gmra.mxu1 %vm3170_vm2, %v10300_v31  ;;  %v5288_v8 = vpop.f32.mrf.mxu0  ;;  %v10315_v31 = vld [vmem:[#allocation34_spill] sm:$0xff] }
 0x449   : > { %v5094_v55 = vadd.f32 %v5010_v25, %v4818_v38  ;;  %v10313_v38 = vld [vmem:[#allocation27_spill] sm:$0xff]  ;;  %v10314_v25 = vld [vmem:[#allocation30_spill] sm:$0xff] }
 0x44a   : > { %6912 = vmatmul.msk.f32.gmra.mxu0 %vm3170_vm2, %v5143_v35  ;;  %v10316_v35 = vld [vmem:[#allocation29_spill] sm:$0xff] }
 0x44b   : > { %6846 = vmatmul.msk.f32.gmra.mxu2 %vm3170_vm2, %v10301_v23  ;;  %v9608_v10 = vadd.f32 %v5285_v37, %v5094_v55  ;;  %v5403_v55 = vld [vmem:[#allocation2 + $0x92] sm:$0xff] }
 0x44c   : > { %6879 = vmatmul.msk.f32.gmra.mxu3 %vm3170_vm2, %v10302_v5  ;;  %v5404_v5 = vld [vmem:[#allocation2 + $0x9a] sm:$0xff] }
 0x44d   : > { %v9614_v6 = vpop.f32.mrf.mxu1 }
 0x44e   : > { %v4737_v12 = vpop.f32.mrf.mxu2 }
 0x44f   : > { %v4819_v3 = vadd.f32 %v4737_v12, %v4544_v28  ;;  %v5013_v4 = vpop.f32.mrf.mxu3  ;;  %v10318_v28 = vld [vmem:[#allocation36_spill] sm:$0xff] }
 0x450   : > { %6926 = vmatmul.msk.f32.gmra.mxu1 %vm3170_vm2, %v10304_v57  ;;  %v5406_v57 = vld [vmem:[#allocation2 + $0xb2] sm:$0xff] }
 0x451   : > { %v5095_v47 = vadd.f32 %v5013_v4, %v4819_v3  ;;  %v5150_v3 = vld [vmem:[#allocation2 + $0x199] sm:$0xff] }
 0x452   : > { %6913 = vmatmul.msk.f32.gmra.mxu0 %vm3170_vm2, %v5144_v36  ;;  %v4875_v4 = vld [vmem:[#allocation2 + $0x198] sm:$0xff]  ;;  %v4876_v36 = vld [vmem:[#allocation2 + $0x1a0] sm:$0xff] }
 0x453   : > { %6847 = vmatmul.msk.f32.gmra.mxu2 %vm3170_vm2, %v10305_v49  ;;  %v9621_v61 = vadd.f32 %v5288_v8, %v5095_v47  ;;  %v9672_v47 = vld [vmem:[#allocation2 + $0x182] sm:$0xff]  ;;  %v9681_v49 = vld [vmem:[#allocation2 + $0x18a] sm:$0xff] }
 0x454   : > { %6880 = vmatmul.msk.f32.gmra.mxu3 %vm3170_vm2, %v10306_v17  ;;  %v5151_v8 = vld [vmem:[#allocation2 + $0x1a1] sm:$0xff] }
 0x455   : > { %v9625_v24 = vpop.f32.mrf.mxu1 }
 0x458   : > { %6927 = vmatmul.msk.f32.gmra.mxu1 %vm3170_vm2, %v10307_v50  ;;  %v5407_v50 = vld [vmem:[#allocation2 + $0xc2] sm:$0xff] }
 0x45a   : > { %6914 = vmatmul.msk.f32.gmra.mxu0 %vm3170_vm2, %v5145_v22 }
 0x45b   : > { %6848 = vmatmul.msk.f32.gmra.mxu2 %vm3170_vm2, %v10308_v41  ;;  %v5408_v41 = vld [vmem:[#allocation2 + $0xca] sm:$0xff] }
 0x45c   : > { %6881 = vmatmul.msk.f32.gmra.mxu3 %vm3170_vm2, %v10309_v14 }
 0x45d   : > { %v9634_v16 = vpop.f32.mrf.mxu1 }
 0x460   : > { %6928 = vmatmul.msk.f32.gmra.mxu1 %vm3170_vm2, %v10310_v19  ;;  %v5409_v19 = vld [vmem:[#allocation2 + $0xda] sm:$0xff] }
 0x462   : > { %6915 = vmatmul.msk.f32.gmra.mxu0 %vm3170_vm2, %v5146_v7 }
 0x463   : > { %6849 = vmatmul.msk.f32.gmra.mxu2 %vm3170_vm2, %v10311_v48  ;;  %v5410_v48 = vld [vmem:[#allocation2 + $0xe2] sm:$0xff] }
 0x464   : > { %6882 = vmatmul.msk.f32.gmra.mxu3 %vm3170_vm2, %v10312_v27  ;;  %v9702_v27 = vld [vmem:[%s10101_s6] ss:$0 sm:$0xff] }
 0x465   : > { %v9643_v2 = vpop.f32.mrf.mxu1 }
 0x468   : > { %6929 = vmatmul.msk.f32.gmra.mxu1 %vm3170_vm2, %v5402_v43 }
 0x46a   : > { %6916 = vmatmul.msk.f32.gmra.mxu0 %vm3170_vm2, %v5147_v29 }
 0x46b   : > { %6850 = vmatmul.msk.f32.gmra.mxu2 %vm3170_vm2, %v10313_v38  ;;  %v5411_v38 = vld [vmem:[#allocation2 + $0xf2] sm:$0xff] }
 0x46c   : > { %6883 = vmatmul.msk.f32.gmra.mxu3 %vm3170_vm2, %v10314_v25 }
 0x46d   : > { %v9651_v37 = vpop.f32.mrf.mxu1 }
 0x470   : > { %6930 = vmatmul.msk.f32.gmra.mxu1 %vm3170_vm2, %v5403_v55 }
 0x472   : > { %6917 = vmatmul.msk.f32.gmra.mxu0 %vm3170_vm2, %v9533_v44  ;;  %v5405_v44 = vld [vmem:[#allocation2 + $0xaa] sm:$0xff] }
 0x473   : > { %6851 = vmatmul.msk.f32.gmra.mxu2 %vm3170_vm2, %v10315_v31  ;;  %v9707_v31 = vpop.f32.mrf.mxu2 }
 0x474   : > { %6884 = vmatmul.msk.f32.gmra.mxu3 %vm3170_vm2, %v10316_v35 }
 0x475   : > { %v9660_v23 = vpop.f32.mrf.mxu1 }
 0x478   : > { %6931 = vmatmul.msk.f32.gmra.mxu1 %vm3170_vm2, %v5404_v5 }
 0x47a   : > { %6918 = vmatmul.msk.f32.gmra.mxu0 %vm3170_vm2, %v9549_v42 }
 0x47b   : > { %6852 = vmatmul.msk.f32.gmra.mxu2 %vm3170_vm2, %v10317_v62 }
 0x47c   : > { %6885 = vmatmul.msk.f32.gmra.mxu3 %vm3170_vm2, %v10318_v28 }
 0x47d   : > { %v9669_v12 = vpop.f32.mrf.mxu1 }
 0x480   : > { %6932 = vmatmul.msk.f32.gmra.mxu1 %vm3170_vm2, %v5405_v44  ;;  %v5412_v44 = vld [vmem:[#allocation2 + $0xfa] sm:$0xff] }
 0x482   : > { %6919 = vmatmul.msk.f32.gmra.mxu0 %vm3170_vm2, %v5150_v3 }
 0x483   : > { %6853 = vmatmul.msk.f32.gmra.mxu2 %vm3170_vm2, %v9672_v47 }
 0x484   : > { %6886 = vmatmul.msk.f32.gmra.mxu3 %vm3170_vm2, %v4875_v4 }
 0x485   : > { %v9678_v42 = vpop.f32.mrf.mxu1 }
 0x488   : > { %6933 = vmatmul.msk.f32.gmra.mxu1 %vm3170_vm2, %v5406_v57 }
 0x48a   : > { %6920 = vmatmul.msk.f32.gmra.mxu0 %vm3170_vm2, %v5151_v8 }
 0x48b   : > { %6854 = vmatmul.msk.f32.gmra.mxu2 %vm3170_vm2, %v9681_v49 }
 0x48c   : > { %6887 = vmatmul.msk.f32.gmra.mxu3 %vm3170_vm2, %v4876_v36  ;;  %v9714_v36 = vpop.f32.mrf.mxu0 }
 0x48d   : > { %v9687_v17 = vpop.f32.mrf.mxu1 }
 0x48e   : > { %10319 = vst [vmem:[#allocation6_spill] sm:$0xff] %v9687_v17 }
 0x490   : > { %6934 = vmatmul.msk.f32.gmra.mxu1 %vm3170_vm2, %v5407_v50 }
 0x495   : > { %v9690_v22 = vpop.f32.mrf.mxu1 }
 0x496   : > { %10320 = vst [vmem:[#allocation5_spill] sm:$0xff] %v9690_v22 }
 0x498   : > { %6935 = vmatmul.msk.f32.gmra.mxu1 %vm3170_vm2, %v5408_v41  ;;  %v9716_v41 = vpop.f32.mrf.mxu2 }
 0x49d   : > { %v9693_v14 = vpop.f32.mrf.mxu1 }
 0x49e   : > { %10321 = vst [vmem:[#allocation40_spill] sm:$0xff] %v9693_v14 }
 0x4a0   : > { %6936 = vmatmul.msk.f32.gmra.mxu1 %vm3170_vm2, %v5409_v19 }
 0x4a5   : > { %v9696_v7 = vpop.f32.mrf.mxu1 }
 0x4a6   : > { %10322 = vst [vmem:[#allocation9_spill] sm:$0xff] %v9696_v7 }
 0x4a8   : > { %6937 = vmatmul.msk.f32.gmra.mxu1 %vm3170_vm2, %v5410_v48 }
 0x4ad   : > { %v5542_v43 = vpop.f32.mrf.mxu1 }
 0x4ae   : > { %v5638_v29 = vadd.f32 %v5542_v43, %v9525_v18  ;;  %v9712_v18 = vpop.f32.mrf.mxu3  ;;  %v5413_v43 = vld [vmem:[#allocation2 + $0x10a] sm:$0xff] }
 0x4b0   : > { %v5674_v25 = vadd.f32 %v9702_v27, %v5638_v29  ;;  %6938 = vmatmul.msk.f32.gmra.mxu1 %vm3170_vm2, %v5411_v38 }
 0x4b2   : > { %v5738_v55 = vmul.f32 0.044715, %v5674_v25 }
 0x4b4   : > { %v5770_v35 = vmul.f32 %v5738_v55, %v5674_v25 }
 0x4b5   : > { %v5545_v5 = vpop.f32.mrf.mxu1 }
 0x4b6   : > { %v5802_v62 = vmul.f32 %v5770_v35, %v5674_v25  ;;  %v5639_v28 = vadd.f32 %v5545_v5, %v9541_v26 }
 0x4b8   : > { %v5834_v3 = vadd.f32 %v5802_v62, %v5674_v25  ;;  %v5675_v4 = vadd.f32 %v9702_v27, %v5639_v28  ;;  %6939 = vmatmul.msk.f32.gmra.mxu1 %vm3170_vm2, %v5412_v44  ;;  %v9721_v62 = vpop.f32.mrf.mxu3  ;;  %v5706_v28 = vmul.f32 0.5, %v5674_v25 }
 0x4ba   : > { %v5866_v57 = vmul.f32 0.7978846, %v5834_v3  ;;  %v5739_v8 = vmul.f32 0.044715, %v5675_v4  ;;  %v9726_v3 = vld [vmem:[%s10102_s7] ss:$0 sm:$0xff] }
 0x4bc   : > { %7039 = vtanh.f32 %v5866_v57  ;;  %v5771_v50 = vmul.f32 %v5739_v8, %v5675_v4  ;;  %v9732_v8 = vld [vmem:[%s10103_s8] ss:$0 sm:$0xff] }
 0x4bd   : > { %v5548_v19 = vpop.f32.mrf.mxu1 }
 0x4be   : > { %v5803_v48 = vmul.f32 %v5771_v50, %v5675_v4  ;;  %v5640_v26 = vadd.f32 %v5548_v19, %v9556_v51  ;;  %v9734_v19 = vpop.f32.mrf.mxu0 }
 0x4c0   : > { %v5835_v29 = vadd.f32 %v5803_v48, %v5675_v4  ;;  %v5676_v38 = vadd.f32 %v9702_v27, %v5640_v26  ;;  %6940 = vmatmul.msk.f32.gmra.mxu1 %vm3170_vm2, %v5413_v43  ;;  %v9737_v26 = vpop.f32.mrf.mxu2  ;;  %v9750_v7 = vpop.f32.mrf.mxu3 }
 0x4c2   : > { %v7040_v55 = vpop.eup %7039  ;;  %v5867_v35 = vmul.f32 0.7978846, %v5835_v29  ;;  %v5740_v5 = vmul.f32 0.044715, %v5676_v38  ;;  %v5414_v29 = vld [vmem:[#allocation2 + $0x112] sm:$0xff] }
 0x4c3   : > { %v5930_v44 = vadd.f32 1.0, %v7040_v55 }
 0x4c4   : > { %7041 = vtanh.f32 %v5867_v35  ;;  %v5772_v51 = vmul.f32 %v5740_v5, %v5676_v38 }
 0x4c5   : > { %v5962_v57 = vmul.f32 %v5930_v44, %v5706_v28  ;;  %v5551_v50 = vpop.f32.mrf.mxu1 }
 0x4c6   : > { %v5804_v48 = vmul.f32 %v5772_v51, %v5676_v38  ;;  %v5641_v25 = vadd.f32 %v5551_v50, %v9569_v39  ;;  %v5707_v51 = vmul.f32 0.5, %v5675_v4  ;;  %v9754_v20 = vpop.f32.mrf.mxu0 }
 0x4c7   : > { %v5998_v43 = vmul.f32 %v9726_v3, %v5962_v57 }
 0x4c8   : > { %v5836_v55 = vadd.f32 %v5804_v48, %v5676_v38  ;;  %v5677_v35 = vadd.f32 %v9702_v27, %v5641_v25  ;;  %6941 = vmatmul.msk.f32.gmra.mxu1 %vm3170_vm2, %v5414_v29  ;;  %v9758_v4 = vpop.f32.mrf.mxu2 }
 0x4c9   : > { %v6034_v5 = vadd.f32 %v9732_v8, %v5998_v43  ;;  %v5415_v43 = vld [vmem:[#allocation2 + $0x122] sm:$0xff] }
 0x4ca   : > { %v7042_v28 = vpop.eup %7041  ;;  %v5868_v39 = vmul.f32 0.7978846, %v5836_v55  ;;  %v5741_v44 = vmul.f32 0.044715, %v5677_v35 }
 0x4cb   : > { %6066 = vst.msk [vmem:[%s9743_s10] sm:$0xff] %vm3170_vm2, %v6034_v5  ;;  %v5931_v57 = vadd.f32 1.0, %v7042_v28 }
 0x4cc   : > { %7043 = vtanh.f32 %v5868_v39  ;;  %v5773_v50 = vmul.f32 %v5741_v44, %v5677_v35 }
 0x4cd   : > { %v5963_v11 = vmul.f32 %v5931_v57, %v5707_v51  ;;  %v5554_v48 = vpop.f32.mrf.mxu1 }
 0x4ce   : > { %v5805_v14 = vmul.f32 %v5773_v50, %v5677_v35  ;;  %v5642_v25 = vadd.f32 %v5554_v48, %v9582_v34  ;;  %v5708_v34 = vmul.f32 0.5, %v5676_v38 }
 0x4cf   : > { %v5999_v29 = vmul.f32 %v9726_v3, %v5963_v11 }
 0x4d0   : > { %v5837_v55 = vadd.f32 %v5805_v14, %v5677_v35  ;;  %v5678_v5 = vadd.f32 %v9702_v27, %v5642_v25  ;;  %6942 = vmatmul.msk.f32.gmra.mxu1 %vm3170_vm2, %v5415_v43  ;;  %v9764_v43 = vpop.f32.mrf.mxu3 }
 0x4d1   : > { %v6035_v28 = vadd.f32 %v9732_v8, %v5999_v29  ;;  %v5416_v29 = vld [vmem:[#allocation2 + $0x12a] sm:$0xff] }
 0x4d2   : > { %v7044_v39 = vpop.eup %7043  ;;  %v5869_v44 = vmul.f32 0.7978846, %v5837_v55  ;;  %v5742_v51 = vmul.f32 0.044715, %v5678_v5 }
 0x4d3   : > { %6067 = vst.msk [vmem:[%s9743_s10 + $0x8] sm:$0xff] %vm3170_vm2, %v6035_v28  ;;  %v5932_v57 = vadd.f32 1.0, %v7044_v39  ;;  %v9770_v39 = vpop.f32.mrf.mxu0 }
 0x4d4   : > { %7045 = vtanh.f32 %v5869_v44  ;;  %v5774_v11 = vmul.f32 %v5742_v51, %v5678_v5 }
 0x4d5   : > { %v5964_v50 = vmul.f32 %v5932_v57, %v5708_v34  ;;  %v5557_v14 = vpop.f32.mrf.mxu1  ;;  %v9772_v34 = vpop.f32.mrf.mxu2 }
 0x4d6   : > { %v5806_v48 = vmul.f32 %v5774_v11, %v5678_v5  ;;  %v5643_v25 = vadd.f32 %v5557_v14, %v9595_v54  ;;  %v5709_v54 = vmul.f32 0.5, %v5677_v35 }
 0x4d7   : > { %v6000_v22 = vmul.f32 %v9726_v3, %v5964_v50 }
 0x4d8   : > { %v5838_v1 = vadd.f32 %v5806_v48, %v5678_v5  ;;  %v5679_v55 = vadd.f32 %v9702_v27, %v5643_v25  ;;  %6943 = vmatmul.msk.f32.gmra.mxu1 %vm3170_vm2, %v5416_v29  ;;  %v5417_v29 = vld [vmem:[#allocation2 + $0x13a] sm:$0xff]  ;;  %v9780_v9 = vpop.f32.mrf.mxu3 }
 0x4d9   : > { %v6036_v38 = vadd.f32 %v9732_v8, %v6000_v22 }
 0x4da   : > { %v7046_v28 = vpop.eup %7045  ;;  %v5870_v44 = vmul.f32 0.7978846, %v5838_v1  ;;  %v5743_v51 = vmul.f32 0.044715, %v5679_v55 }
 0x4db   : > { %6068 = vst.msk [vmem:[%s9743_s10 + $0x10] sm:$0xff] %vm3170_vm2, %v6036_v38  ;;  %v5933_v57 = vadd.f32 1.0, %v7046_v28  ;;  %v10323_v28 = vld [vmem:[#allocation20_spill] sm:$0xff] }
 0x4dc   : > { %7047 = vtanh.f32 %v5870_v44  ;;  %v5775_v11 = vmul.f32 %v5743_v51, %v5679_v55  ;;  %v4545_v44 = vadd.f32 %v9450_v58, %v10323_v28  ;;  %v5418_v28 = vld [vmem:[#allocation2 + $0x142] sm:$0xff] }
 0x4dd   : > { %v5965_v50 = vmul.f32 %v5933_v57, %v5709_v54  ;;  %v5560_v14 = vpop.f32.mrf.mxu1 }
 0x4de   : > { %v5807_v48 = vmul.f32 %v5775_v11, %v5679_v55  ;;  %v5644_v25 = vadd.f32 %v5560_v14, %v9608_v10  ;;  %v5710_v10 = vmul.f32 0.5, %v5678_v5  ;;  %v4820_v11 = vadd.f32 %v9707_v31, %v4545_v44 }
 0x4df   : > { %v6001_v22 = vmul.f32 %v9726_v3, %v5965_v50  ;;  %v9788_v50 = vpop.f32.mrf.mxu0 }
 0x4e0   : > { %v5839_v17 = vadd.f32 %v5807_v48, %v5679_v55  ;;  %v5680_v1 = vadd.f32 %v9702_v27, %v5644_v25  ;;  %6944 = vmatmul.msk.f32.gmra.mxu1 %vm3170_vm2, %v5417_v29  ;;  %v9790_v48 = vpop.f32.mrf.mxu2  ;;  %v5096_v5 = vadd.f32 %v9712_v18, %v4820_v11 }
 0x4e1   : > { %v6037_v35 = vadd.f32 %v9732_v8, %v6001_v22 }
 0x4e2   : > { %v7048_v38 = vpop.eup %7047  ;;  %v5871_v51 = vmul.f32 0.7978846, %v5839_v17  ;;  %v5744_v54 = vmul.f32 0.044715, %v5680_v1 }
 0x4e3   : > { %6069 = vst.msk [vmem:[%s9743_s10 + $0x18] sm:$0xff] %vm3170_vm2, %v6037_v35  ;;  %v5934_v57 = vadd.f32 1.0, %v7048_v38 }
 0x4e4   : > { %7049 = vtanh.f32 %v5871_v51  ;;  %v5776_v14 = vmul.f32 %v5744_v54, %v5680_v1  ;;  %v10324_v51 = vld [vmem:[#allocation19_spill] sm:$0xff] }
 0x4e5   : > { %v5966_v25 = vmul.f32 %v5934_v57, %v5710_v10  ;;  %v5563_v22 = vpop.f32.mrf.mxu1  ;;  %v4546_v54 = vadd.f32 %v9463_v56, %v10324_v51 }
 0x4e6   : > { %v5808_v29 = vmul.f32 %v5776_v14, %v5680_v1  ;;  %v5645_v58 = vadd.f32 %v5563_v22, %v9621_v61  ;;  %v9800_v14 = vpop.f32.mrf.mxu3  ;;  %v5711_v61 = vmul.f32 0.5, %v5679_v55  ;;  %v5371_v22 = vadd.f32 %v9714_v36, %v5096_v5 }
 0x4e7   : > { %v6002_v17 = vmul.f32 %v9726_v3, %v5966_v25  ;;  %v4821_v18 = vadd.f32 %v9716_v41, %v4546_v54  ;;  %v10325_v54 = vld [vmem:[#allocation26_spill] sm:$0xff] }
 0x4e8   : > { %v5840_v35 = vadd.f32 %v5808_v29, %v5680_v1  ;;  %v5681_v31 = vadd.f32 %v9702_v27, %v5645_v58  ;;  %6945 = vmatmul.msk.f32.gmra.mxu1 %vm3170_vm2, %v5418_v28 }
 0x4e9   : > { %v6038_v38 = vadd.f32 %v9732_v8, %v6002_v17  ;;  %v9806_v17 = vpop.f32.mrf.mxu0  ;;  %v5097_v55 = vadd.f32 %v9721_v62, %v4821_v18 }
 0x4ea   : > { %v7050_v44 = vpop.eup %7049  ;;  %v5872_v10 = vmul.f32 0.7978846, %v5840_v35  ;;  %v5745_v57 = vmul.f32 0.044715, %v5681_v31  ;;  %v9808_v35 = vpop.f32.mrf.mxu2 }
 0x4eb   : > { %6070 = vst.msk [vmem:[%s9743_s10 + $0x20] sm:$0xff] %vm3170_vm2, %v6038_v38  ;;  %v5935_v25 = vadd.f32 1.0, %v7050_v44  ;;  %v5419_v38 = vld [vmem:[#allocation2 + $0x152] sm:$0xff]  ;;  %v5372_v18 = vadd.f32 %v9734_v19, %v5097_v55 }
 0x4ec   : > { %7051 = vtanh.f32 %v5872_v10  ;;  %v5777_v11 = vmul.f32 %v5745_v57, %v5681_v31  ;;  %v4547_v10 = vadd.f32 %v9476_v33, %v10325_v54  ;;  %v10326_v54 = vld [vmem:[#allocation25_spill] sm:$0xff] }
 0x4ed   : > { %v5967_v29 = vmul.f32 %v5935_v25, %v5711_v61  ;;  %v5566_v58 = vpop.f32.mrf.mxu1  ;;  %v5712_v25 = vmul.f32 0.5, %v5680_v1 }
 0x4ee   : > { %v5809_v56 = vmul.f32 %v5777_v11, %v5681_v31  ;;  %v5646_v28 = vadd.f32 %v5566_v58, %v5371_v22  ;;  %v4822_v22 = vadd.f32 %v9737_v26, %v4547_v10  ;;  %v4548_v10 = vadd.f32 %v9489_v30, %v10326_v54 }
 0x4ef   : > { %v6003_v51 = vmul.f32 %v9726_v3, %v5967_v29  ;;  %v9821_v29 = vpop.f32.mrf.mxu3 }
 0x4f0   : > { %v5841_v44 = vadd.f32 %v5809_v56, %v5681_v31  ;;  %v5682_v41 = vadd.f32 %v9702_v27, %v5646_v28  ;;  %6946 = vmatmul.msk.f32.gmra.mxu1 %vm3170_vm2, %v5419_v38  ;;  %v5420_v38 = vld [vmem:[#allocation2 + $0x15a] sm:$0xff] }
 0x4f1   : > { %v6039_v36 = vadd.f32 %v9732_v8, %v6003_v51  ;;  %v9825_v1 = vpop.f32.mrf.mxu0 }
 0x4f2   : > { %v7052_v5 = vpop.eup %7051  ;;  %v5873_v57 = vmul.f32 0.7978846, %v5841_v44  ;;  %v5746_v61 = vmul.f32 0.044715, %v5682_v41  ;;  %v5098_v44 = vadd.f32 %v9750_v7, %v4822_v22  ;;  %v9829_v19 = vpop.f32.mrf.mxu2  ;;  %v5713_v7 = vmul.f32 0.5, %v5681_v31 }
 0x4f3   : > { %6071 = vst.msk [vmem:[%s9743_s10 + $0x28] sm:$0xff] %vm3170_vm2, %v6039_v36  ;;  %v5936_v11 = vadd.f32 1.0, %v7052_v5 }
 0x4f4   : > { %7053 = vtanh.f32 %v5873_v57  ;;  %v5778_v62 = vmul.f32 %v5746_v61, %v5682_v41 }
 0x4f5   : > { %v5968_v58 = vmul.f32 %v5936_v11, %v5712_v25  ;;  %v5569_v56 = vpop.f32.mrf.mxu1  ;;  %v4823_v11 = vadd.f32 %v9758_v4, %v4548_v10 }
 0x4f6   : > { %v5810_v28 = vmul.f32 %v5778_v62, %v5682_v41  ;;  %v5647_v51 = vadd.f32 %v5569_v56, %v5372_v18  ;;  %v5373_v62 = vadd.f32 %v9754_v20, %v5098_v44  ;;  %v10327_v44 = vld [vmem:[#allocation32_spill] sm:$0xff] }
 0x4f7   : > { %v6004_v33 = vmul.f32 %v9726_v3, %v5968_v58 }
 0x4f8   : > { %v5842_v36 = vadd.f32 %v5810_v28, %v5682_v41  ;;  %v5683_v26 = vadd.f32 %v9702_v27, %v5647_v51  ;;  %6947 = vmatmul.msk.f32.gmra.mxu1 %vm3170_vm2, %v5420_v38  ;;  %v9838_v51 = vpop.f32.mrf.mxu3  ;;  %v5099_v38 = vadd.f32 %v9764_v43, %v4823_v11  ;;  %v5714_v43 = vmul.f32 0.5, %v5682_v41 }
 0x4f9   : > { %v6040_v55 = vadd.f32 %v9732_v8, %v6004_v33  ;;  %v5421_v33 = vld [vmem:[#allocation2 + $0x16a] sm:$0xff] }
 0x4fa   : > { %v7054_v5 = vpop.eup %7053  ;;  %v5874_v57 = vmul.f32 0.7978846, %v5842_v36  ;;  %v5747_v61 = vmul.f32 0.044715, %v5683_v26  ;;  %v5374_v11 = vadd.f32 %v9770_v39, %v5099_v38  ;;  %v10328_v38 = vld [vmem:[#allocation31_spill] sm:$0xff] }
 0x4fb   : > { %6072 = vst.msk [vmem:[%s9743_s10 + $0x30] sm:$0xff] %vm3170_vm2, %v6040_v55  ;;  %v5937_v25 = vadd.f32 1.0, %v7054_v5  ;;  %v4549_v55 = vadd.f32 %v9502_v46, %v10327_v44  ;;  %v9847_v5 = vpop.f32.mrf.mxu0  ;;  %v5715_v44 = vmul.f32 0.5, %v5683_v26 }
 0x4fc   : > { %7055 = vtanh.f32 %v5874_v57  ;;  %v5779_v22 = vmul.f32 %v5747_v61, %v5683_v26  ;;  %v9849_v57 = vpop.f32.mrf.mxu2 }
 0x4fd   : > { %v5969_v18 = vmul.f32 %v5937_v25, %v5713_v7  ;;  %v5572_v58 = vpop.f32.mrf.mxu1  ;;  %v4824_v7 = vadd.f32 %v9772_v34, %v4549_v55 }
 0x4fe   : > { %v5811_v56 = vmul.f32 %v5779_v22, %v5683_v26  ;;  %v5648_v28 = vadd.f32 %v5572_v58, %v5373_v62 }
 0x4ff   : > { %v6005_v30 = vmul.f32 %v9726_v3, %v5969_v18 }
 0x500   : > { %v5843_v31 = vadd.f32 %v5811_v56, %v5683_v26  ;;  %v5684_v36 = vadd.f32 %v9702_v27, %v5648_v28  ;;  %6948 = vmatmul.msk.f32.gmra.mxu1 %vm3170_vm2, %v5421_v33  ;;  %v5422_v56 = vld [vmem:[#allocation2 + $0x172] sm:$0xff]  ;;  %v5100_v28 = vadd.f32 %v9780_v9, %v4824_v7  ;;  %v9859_v34 = vpop.f32.mrf.mxu3 }
 0x501   : > { %v6041_v4 = vadd.f32 %v9732_v8, %v6005_v30 }
 0x502   : > { %v7056_v20 = vpop.eup %7055  ;;  %v5875_v54 = vmul.f32 0.7978846, %v5843_v31  ;;  %v5748_v10 = vmul.f32 0.044715, %v5684_v36  ;;  %v4550_v31 = vadd.f32 %v9517_v53, %v10328_v38 }
 0x503   : > { %6073 = vst.msk [vmem:[%s9743_s10 + $0x38] sm:$0xff] %vm3170_vm2, %v6041_v4  ;;  %v5938_v61 = vadd.f32 1.0, %v7056_v20 }
 0x504   : > { %7057 = vtanh.f32 %v5875_v54  ;;  %v5780_v25 = vmul.f32 %v5748_v10, %v5684_v36  ;;  %v4825_v9 = vadd.f32 %v9790_v48, %v4550_v31  ;;  %v9867_v54 = vpop.f32.mrf.mxu0 }
 0x505   : > { %v5970_v22 = vmul.f32 %v5938_v61, %v5714_v43  ;;  %v5575_v62 = vpop.f32.mrf.mxu1  ;;  %v5375_v43 = vadd.f32 %v9788_v50, %v5100_v28  ;;  %v9870_v61 = vpop.f32.mrf.mxu2 }
 0x506   : > { %v5812_v46 = vmul.f32 %v5780_v25, %v5684_v36  ;;  %v5649_v18 = vadd.f32 %v5575_v62, %v5374_v11  ;;  %v5101_v26 = vadd.f32 %v9800_v14, %v4825_v9 }
 0x507   : > { %v6006_v58 = vmul.f32 %v9726_v3, %v5970_v22 }
 0x508   : > { %v5844_v30 = vadd.f32 %v5812_v46, %v5684_v36  ;;  %v5685_v41 = vadd.f32 %v9702_v27, %v5649_v18  ;;  %6949 = vmatmul.msk.f32.gmra.mxu1 %vm3170_vm2, %v5422_v56  ;;  %v10329_v18 = vld [vmem:[#allocation39_spill] sm:$0xff] }
 0x509   : > { %v6042_v33 = vadd.f32 %v9732_v8, %v6006_v58  ;;  %v4551_v58 = vadd.f32 %v9531_v45, %v10329_v18 }
 0x50a   : > { %v7058_v39 = vpop.eup %7057  ;;  %v5876_v4 = vmul.f32 0.7978846, %v5844_v30  ;;  %v5749_v20 = vmul.f32 0.044715, %v5685_v41  ;;  %v9880_v30 = vpop.f32.mrf.mxu3 }
 0x50b   : > { %6074 = vst.msk [vmem:[%s9743_s10 + $0x40] sm:$0xff] %vm3170_vm2, %v6042_v33  ;;  %v5939_v55 = vadd.f32 1.0, %v7058_v39  ;;  %v5716_v33 = vmul.f32 0.5, %v5684_v36  ;;  %v4826_v39 = vadd.f32 %v9808_v35, %v4551_v58  ;;  %v5425_v58 = vld [vmem:[#allocation2 + $0x19a] sm:$0xff] }
 0x50c   : > { %7059 = vtanh.f32 %v5876_v4  ;;  %v5781_v10 = vmul.f32 %v5749_v20, %v5685_v41  ;;  %v9886_v20 = vpop.f32.mrf.mxu0 }
 0x50d   : > { %v5971_v7 = vmul.f32 %v5939_v55, %v5715_v44  ;;  %v5578_v25 = vpop.f32.mrf.mxu1  ;;  %v9888_v55 = vpop.f32.mrf.mxu2  ;;  %v5102_v36 = vadd.f32 %v9821_v29, %v4826_v39 }
 0x50e   : > { %v5813_v53 = vmul.f32 %v5781_v10, %v5685_v41  ;;  %v5650_v11 = vadd.f32 %v5578_v25, %v5375_v43 }
 0x50f   : > { %v6007_v22 = vmul.f32 %v9726_v3, %v5971_v7  ;;  %v10330_v7 = vld [vmem:[#allocation35_spill] sm:$0xff] }
 0x510   : > { %v5845_v62 = vadd.f32 %v5813_v53, %v5685_v41  ;;  %v5686_v48 = vadd.f32 %v9702_v27, %v5650_v11  ;;  %6950 = vmatmul.msk.f32.gmra.mxu1 %vm3170_vm2, %v9672_v47  ;;  %v5376_v47 = vadd.f32 %v9806_v17, %v5101_v26  ;;  %v4552_v25 = vadd.f32 %v9547_v0, %v10330_v7  ;;  %v5426_v7 = vld [vmem:[#allocation2 + $0x1a2] sm:$0xff] }
 0x511   : > { %v6043_v46 = vadd.f32 %v9732_v8, %v6007_v22  ;;  %v5717_v22 = vmul.f32 0.5, %v5685_v41 }
 0x512   : > { %v7060_v50 = vpop.eup %7059  ;;  %v5877_v56 = vmul.f32 0.7978846, %v5845_v62  ;;  %v5750_v28 = vmul.f32 0.044715, %v5686_v48  ;;  %v4827_v29 = vadd.f32 %v9829_v19, %v4552_v25 }
 0x513   : > { %6075 = vst.msk [vmem:[%s9743_s10 + $0x48] sm:$0xff] %vm3170_vm2, %v6043_v46  ;;  %v5940_v14 = vadd.f32 1.0, %v7060_v50  ;;  %v5377_v46 = vadd.f32 %v9825_v1, %v5102_v36  ;;  %v9902_v50 = vpop.f32.mrf.mxu3 }
 0x514   : > { %7061 = vtanh.f32 %v5877_v56  ;;  %v5782_v38 = vmul.f32 %v5750_v28, %v5686_v48  ;;  %v9906_v41 = vpop.f32.mrf.mxu0 }
 0x515   : > { %v5972_v31 = vmul.f32 %v5940_v14, %v5716_v33  ;;  %v5581_v4 = vpop.f32.mrf.mxu1  ;;  %v5103_v33 = vadd.f32 %v9838_v51, %v4827_v29  ;;  %v9910_v1 = vpop.f32.mrf.mxu2  ;;  %v5718_v51 = vmul.f32 0.5, %v5686_v48  ;;  %v10332_v29 = vld [vmem:[#allocation3_spill] sm:$0xff] }
 0x516   : > { %v5814_v45 = vmul.f32 %v5782_v38, %v5686_v48  ;;  %v5651_v44 = vadd.f32 %v5581_v4, %v5376_v47  ;;  %v10331_v47 = vld [vmem:[#allocation37_spill] sm:$0xff] }
 0x517   : > { %v6008_v9 = vmul.f32 %v9726_v3, %v5972_v31  ;;  %v4553_v31 = vadd.f32 %v9562_v15, %v10331_v47 }
 0x518   : > { %v5846_v10 = vadd.f32 %v5814_v45, %v5686_v48  ;;  %v5687_v35 = vadd.f32 %v9702_v27, %v5651_v44  ;;  %6951 = vmatmul.msk.f32.gmra.mxu1 %vm3170_vm2, %v9681_v49 }
 0x519   : > { %v6044_v17 = vadd.f32 %v9732_v8, %v6008_v9  ;;  %v4828_v9 = vadd.f32 %v9849_v57, %v4553_v31 }
 0x51a   : > { %v7062_v43 = vpop.eup %7061  ;;  %v5878_v53 = vmul.f32 0.7978846, %v5846_v10  ;;  %v5751_v11 = vmul.f32 0.044715, %v5687_v35  ;;  %v5378_v10 = vadd.f32 %v9847_v5, %v5103_v33 }
 0x51b   : > { %6076 = vst.msk [vmem:[%s9743_s10 + $0x50] sm:$0xff] %vm3170_vm2, %v6044_v17  ;;  %v5941_v26 = vadd.f32 1.0, %v7062_v43 }
 0x51c   : > { %7063 = vtanh.f32 %v5878_v53  ;;  %v5783_v62 = vmul.f32 %v5751_v11, %v5687_v35  ;;  %v9919_v11 = vpop.f32.mrf.mxu3 }
 0x51d   : > { %v5973_v49 = vmul.f32 %v5941_v26, %v5717_v22  ;;  %v5584_v18 = vpop.f32.mrf.mxu1  ;;  %v5104_v22 = vadd.f32 %v9859_v34, %v4828_v9  ;;  %v5719_v34 = vmul.f32 0.5, %v5687_v35 }
 0x51e   : > { %v5815_v56 = vmul.f32 %v5783_v62, %v5687_v35  ;;  %v5652_v0 = vadd.f32 %v5584_v18, %v5377_v46  ;;  %v4554_v62 = vadd.f32 %v9575_v40, %v10332_v29  ;;  %v9928_v46 = vpop.f32.mrf.mxu0 }
 0x51f   : > { %v6009_v28 = vmul.f32 %v9726_v3, %v5973_v49  ;;  %v5379_v33 = vadd.f32 %v9867_v54, %v5104_v22 }
 0x520   : > { %v5847_v14 = vadd.f32 %v5815_v56, %v5687_v35  ;;  %v5688_v19 = vadd.f32 %v9702_v27, %v5652_v0  ;;  %6952 = vmatmul.msk.f32.gmra.mxu1 %vm3170_vm2, %v5425_v58  ;;  %v9930_v58 = vpop.f32.mrf.mxu2  ;;  %v4829_v0 = vadd.f32 %v9870_v61, %v4554_v62 }
 0x521   : > { %v6045_v39 = vadd.f32 %v9732_v8, %v6009_v28 }
 0x522   : > { %v7064_v38 = vpop.eup %7063  ;;  %v5879_v4 = vmul.f32 0.7978846, %v5847_v14  ;;  %v5752_v45 = vmul.f32 0.044715, %v5688_v19  ;;  %v5105_v31 = vadd.f32 %v9880_v30, %v4829_v0 }
 0x523   : > { %6077 = vst.msk [vmem:[%s9743_s10 + $0x58] sm:$0xff] %vm3170_vm2, %v6045_v39  ;;  %v5942_v44 = vadd.f32 1.0, %v7064_v38 }
 0x524   : > { %7065 = vtanh.f32 %v5879_v4  ;;  %v5784_v36 = vmul.f32 %v5752_v45, %v5688_v19  ;;  %v9939_v35 = vpop.f32.mrf.mxu3 }
 0x525   : > { %v5974_v17 = vmul.f32 %v5942_v44, %v5718_v51  ;;  %v5587_v43 = vpop.f32.mrf.mxu1  ;;  %v10333_v44 = vld [vmem:[#allocation41_spill] sm:$0xff] }
 0x526   : > { %v5816_v25 = vmul.f32 %v5784_v36, %v5688_v19  ;;  %v5653_v53 = vadd.f32 %v5587_v43, %v5378_v10  ;;  %v4555_v9 = vadd.f32 %v9588_v32, %v10333_v44  ;;  %v5720_v10 = vmul.f32 0.5, %v5688_v19  ;;  %v9947_v30 = vpop.f32.mrf.mxu0 }
 0x527   : > { %v6010_v15 = vmul.f32 %v9726_v3, %v5974_v17 }
 0x528   : > { %v5848_v48 = vadd.f32 %v5816_v25, %v5688_v19  ;;  %v5689_v26 = vadd.f32 %v9702_v27, %v5653_v53  ;;  %6953 = vmatmul.msk.f32.gmra.mxu1 %vm3170_vm2, %v5426_v7  ;;  %v4830_v43 = vadd.f32 %v9888_v55, %v4555_v9  ;;  %v5380_v25 = vadd.f32 %v9886_v20, %v5105_v31  ;;  %v9950_v53 = vpop.f32.mrf.mxu2  ;;  %v10335_v9 = vld [vmem:[#allocation45_spill] sm:$0xff] }
 0x529   : > { %v6046_v57 = vadd.f32 %v9732_v8, %v6010_v15 }
 0x52a   : > { %v7066_v5 = vpop.eup %7065  ;;  %v5880_v49 = vmul.f32 0.7978846, %v5848_v48  ;;  %v5753_v18 = vmul.f32 0.044715, %v5689_v26  ;;  %v5106_v19 = vadd.f32 %v9902_v50, %v4830_v43  ;;  %v5721_v0 = vmul.f32 0.5, %v5689_v26 }
 0x52b   : > { %6078 = vst.msk [vmem:[%s9743_s10 + $0x60] sm:$0xff] %vm3170_vm2, %v6046_v57  ;;  %v5943_v56 = vadd.f32 1.0, %v7066_v5 }
 0x52c   : > { %7067 = vtanh.f32 %v5880_v49  ;;  %v5785_v28 = vmul.f32 %v5753_v18, %v5689_v26  ;;  %v10334_v49 = vld [vmem:[#allocation43_spill] sm:$0xff] }
 0x52d   : > { %v5975_v14 = vmul.f32 %v5943_v56, %v5719_v34  ;;  %v5590_v39 = vpop.f32.mrf.mxu1  ;;  %v4556_v20 = vadd.f32 %v9601_v60, %v10334_v49  ;;  %v5055_v56 = vpop.f32.mrf.mxu3  ;;  %v10336_v49 = vld [vmem:[#allocation47_spill] sm:$0xff] }
 0x52e   : > { %v5817_v40 = vmul.f32 %v5785_v28, %v5689_v26  ;;  %v5654_v38 = vadd.f32 %v5590_v39, %v5379_v33 }
 0x52f   : > { %v6011_v47 = vmul.f32 %v9726_v3, %v5975_v14  ;;  %v4831_v33 = vadd.f32 %v9910_v1, %v4556_v20  ;;  %v5381_v14 = vadd.f32 %v9906_v41, %v5106_v19  ;;  %v4557_v41 = vadd.f32 %v9614_v6, %v10335_v9 }
 0x530   : > { %v5849_v4 = vadd.f32 %v5817_v40, %v5689_v26  ;;  %v5690_v45 = vadd.f32 %v9702_v27, %v5654_v38  ;;  %v9962_v38 = vpop.f32.mrf.mxu0  ;;  %v4782_v31 = vpop.f32.mrf.mxu2 }
 0x531   : > { %v6047_v61 = vadd.f32 %v9732_v8, %v6011_v47  ;;  %v4832_v43 = vadd.f32 %v9930_v58, %v4557_v41 }
 0x532   : > { %v7068_v51 = vpop.eup %7067  ;;  %v5881_v54 = vmul.f32 0.7978846, %v5849_v4  ;;  %v5754_v36 = vmul.f32 0.044715, %v5690_v45 }
 0x533   : > { %6079 = vst.msk [vmem:[%s9743_s10 + $0x68] sm:$0xff] %vm3170_vm2, %v6047_v61  ;;  %v5944_v17 = vadd.f32 1.0, %v7068_v51  ;;  %v5107_v61 = vadd.f32 %v9919_v11, %v4831_v33 }
 0x534   : > { %7069 = vtanh.f32 %v5881_v54  ;;  %v5786_v7 = vmul.f32 %v5754_v36, %v5690_v45 }
 0x535   : > { %v5976_v15 = vmul.f32 %v5944_v17, %v5720_v10  ;;  %v5593_v22 = vpop.f32.mrf.mxu1  ;;  %v5722_v10 = vmul.f32 0.5, %v5690_v45  ;;  %v5382_v11 = vadd.f32 %v9928_v46, %v5107_v61  ;;  %v4558_v46 = vadd.f32 %v9625_v24, %v10336_v49 }
 0x536   : > { %v5818_v32 = vmul.f32 %v5786_v7, %v5690_v45  ;;  %v5655_v48 = vadd.f32 %v5593_v22, %v5380_v25  ;;  %v5058_v25 = vpop.f32.mrf.mxu3 }
 0x537   : > { %v6012_v57 = vmul.f32 %v9726_v3, %v5976_v15 }
 0x538   : > { %v5850_v5 = vadd.f32 %v5818_v32, %v5690_v45  ;;  %v5691_v55 = vadd.f32 %v9702_v27, %v5655_v48  ;;  %v5333_v19 = vpop.f32.mrf.mxu0 }
 0x539   : > { %v6048_v29 = vadd.f32 %v9732_v8, %v6012_v57  ;;  %v5108_v57 = vadd.f32 %v9939_v35, %v4832_v43 }
 0x53a   : > { %v7070_v62 = vpop.eup %7069  ;;  %v5882_v18 = vmul.f32 0.7978846, %v5850_v5  ;;  %v5755_v34 = vmul.f32 0.044715, %v5691_v55 }
 0x53b   : > { %6080 = vst.msk [vmem:[%s9743_s10 + $0x70] sm:$0xff] %vm3170_vm2, %v6048_v29  ;;  %v5945_v28 = vadd.f32 1.0, %v7070_v62  ;;  %v4785_v29 = vpop.f32.mrf.mxu2  ;;  %v5383_v33 = vadd.f32 %v9947_v30, %v5108_v57 }
 0x53c   : > { %7071 = vtanh.f32 %v5882_v18  ;;  %v5787_v50 = vmul.f32 %v5755_v34, %v5691_v55  ;;  %v5723_v34 = vmul.f32 0.5, %v5691_v55 }
 0x53d   : > { %v5977_v39 = vmul.f32 %v5945_v28, %v5721_v0  ;;  %v5596_v40 = vpop.f32.mrf.mxu1  ;;  %v4833_v28 = vadd.f32 %v9950_v53, %v4558_v46  ;;  %v10337_v53 = vld [vmem:[#allocation49_spill] sm:$0xff] }
 0x53e   : > { %v5819_v47 = vmul.f32 %v5787_v50, %v5691_v55  ;;  %v5656_v60 = vadd.f32 %v5596_v40, %v5381_v14 }
 0x53f   : > { %v6013_v4 = vmul.f32 %v9726_v3, %v5977_v39 }
 0x540   : > { %v5851_v26 = vadd.f32 %v5819_v47, %v5691_v55  ;;  %v5692_v51 = vadd.f32 %v9702_v27, %v5656_v60  ;;  %v5061_v47 = vpop.f32.mrf.mxu3  ;;  %v5109_v60 = vadd.f32 %v5055_v56, %v4833_v28 }
 0x541   : > { %v6049_v1 = vadd.f32 %v9732_v8, %v6013_v4 }
 0x542   : > { %v7072_v44 = vpop.eup %7071  ;;  %v5883_v54 = vmul.f32 0.7978846, %v5851_v26  ;;  %v5756_v36 = vmul.f32 0.044715, %v5692_v51 }
 0x543   : > { %6081 = vst.msk [vmem:[%s9743_s10 + $0x78] sm:$0xff] %vm3170_vm2, %v6049_v1  ;;  %v5946_v17 = vadd.f32 1.0, %v7072_v44  ;;  %v4559_v1 = vadd.f32 %v9634_v16, %v10337_v53  ;;  %v5336_v44 = vpop.f32.mrf.mxu0  ;;  %v4788_v41 = vpop.f32.mrf.mxu2 }
 0x544   : > { %7073 = vtanh.f32 %v5883_v54  ;;  %v5788_v7 = vmul.f32 %v5756_v36, %v5692_v51  ;;  %v5724_v54 = vmul.f32 0.5, %v5692_v51 }
 0x545   : > { %v5978_v15 = vmul.f32 %v5946_v17, %v5722_v10  ;;  %v5599_v22 = vpop.f32.mrf.mxu1  ;;  %v4834_v10 = vadd.f32 %v4782_v31, %v4559_v1  ;;  %v5384_v17 = vadd.f32 %v9962_v38, %v5109_v60  ;;  %v4560_v31 = vadd.f32 %v9643_v2, %v9414_v59 }
 0x546   : > { %v5820_v32 = vmul.f32 %v5788_v7, %v5692_v51  ;;  %v5657_v48 = vadd.f32 %v5599_v22, %v5382_v11 }
 0x547   : > { %v6014_v6 = vmul.f32 %v9726_v3, %v5978_v15  ;;  %v5110_v22 = vadd.f32 %v5058_v25, %v4834_v10  ;;  %v4835_v49 = vadd.f32 %v4785_v29, %v4560_v31  ;;  %v4561_v29 = vadd.f32 %v9651_v37, %v9424_v13 }
 0x548   : > { %v5852_v5 = vadd.f32 %v5820_v32, %v5692_v51  ;;  %v5693_v45 = vadd.f32 %v9702_v27, %v5657_v48 }
 0x549   : > { %v6050_v58 = vadd.f32 %v9732_v8, %v6014_v6  ;;  %v5064_v6 = vpop.f32.mrf.mxu3  ;;  %v5111_v59 = vadd.f32 %v5061_v47, %v4835_v49  ;;  %v4563_v49 = vadd.f32 %v9669_v12, %v9446_v21  ;;  %v10028_v21 = vld [vmem:[%s10102_s7] ss:$0 sm:$0xff] }
 0x54a   : > { %v7074_v62 = vpop.eup %7073  ;;  %v5884_v20 = vmul.f32 0.7978846, %v5852_v5  ;;  %v5757_v18 = vmul.f32 0.044715, %v5693_v45  ;;  %v5725_v38 = vmul.f32 0.5, %v5693_v45 }
 0x54b   : > { %6082 = vst.msk [vmem:[%s9743_s10 + $0x80] sm:$0xff] %vm3170_vm2, %v6050_v58  ;;  %v5947_v0 = vadd.f32 1.0, %v7074_v62  ;;  %v5339_v46 = vpop.f32.mrf.mxu0  ;;  %v5386_v47 = vadd.f32 %v5336_v44, %v5111_v59 }
 0x54c   : > { %7075 = vtanh.f32 %v5884_v20  ;;  %v5789_v35 = vmul.f32 %v5757_v18, %v5693_v45  ;;  %v5385_v20 = vadd.f32 %v5333_v19, %v5110_v22  ;;  %v4791_v18 = vpop.f32.mrf.mxu2 }
 0x54d   : > { %v5979_v50 = vmul.f32 %v5947_v0, %v5723_v34  ;;  %v5602_v14 = vpop.f32.mrf.mxu1 }
 0x54e   : > { %v5821_v39 = vmul.f32 %v5789_v35, %v5693_v45  ;;  %v5658_v40 = vadd.f32 %v5602_v14, %v5383_v33 }
 0x54f   : > { %v6015_v24 = vmul.f32 %v9726_v3, %v5979_v50 }
 0x550   : > { %v5853_v4 = vadd.f32 %v5821_v39, %v5693_v45  ;;  %v5694_v61 = vadd.f32 %v9702_v27, %v5658_v40 }
 0x551   : > { %v6051_v55 = vadd.f32 %v9732_v8, %v6015_v24  ;;  %v5067_v40 = vpop.f32.mrf.mxu3 }
 0x552   : > { %v7076_v26 = vpop.eup %7075  ;;  %v5885_v30 = vmul.f32 0.7978846, %v5853_v4  ;;  %v5758_v9 = vmul.f32 0.044715, %v5694_v61  ;;  %v5726_v24 = vmul.f32 0.5, %v5694_v61  ;;  %v4836_v4 = vadd.f32 %v4788_v41, %v4561_v29 }
 0x553   : > { %6083 = vst.msk [vmem:[%s9743_s10 + $0x88] sm:$0xff] %vm3170_vm2, %v6051_v55  ;;  %v5948_v36 = vadd.f32 1.0, %v7076_v26  ;;  %v5342_v1 = vpop.f32.mrf.mxu0  ;;  %v4562_v41 = vadd.f32 %v9660_v23, %v9434_v52 }
 0x554   : > { %7077 = vtanh.f32 %v5885_v30  ;;  %v5790_v56 = vmul.f32 %v5758_v9, %v5694_v61  ;;  %v5112_v37 = vadd.f32 %v5064_v6, %v4836_v4 }
 0x555   : > { %v5980_v43 = vmul.f32 %v5948_v36, %v5724_v54  ;;  %v5605_v7 = vpop.f32.mrf.mxu1  ;;  %v4794_v54 = vpop.f32.mrf.mxu2 }
 0x556   : > { %v5822_v11 = vmul.f32 %v5790_v56, %v5694_v61  ;;  %v5659_v15 = vadd.f32 %v5605_v7, %v5384_v17 }
 0x557   : > { %v6016_v16 = vmul.f32 %v9726_v3, %v5980_v43 }
 0x558   : > { %v5854_v32 = vadd.f32 %v5822_v11, %v5694_v61  ;;  %v5695_v48 = vadd.f32 %v9702_v27, %v5659_v15  ;;  %v4837_v11 = vadd.f32 %v4791_v18, %v4562_v41  ;;  %v4838_v18 = vadd.f32 %v4794_v54, %v4563_v49  ;;  %v10338_v41 = vld [vmem:[#allocation51_spill] sm:$0xff] }
 0x559   : > { %v6052_v51 = vadd.f32 %v9732_v8, %v6016_v16  ;;  %v5387_v16 = vadd.f32 %v5339_v46, %v5112_v37  ;;  %v5070_v22 = vpop.f32.mrf.mxu3 }
 0x55a   : > { %v7078_v57 = vpop.eup %7077  ;;  %v5886_v5 = vmul.f32 0.7978846, %v5854_v32  ;;  %v5759_v58 = vmul.f32 0.044715, %v5695_v48  ;;  %v5727_v43 = vmul.f32 0.5, %v5695_v48  ;;  %v5113_v31 = vadd.f32 %v5067_v40, %v4837_v11 }
 0x55b   : > { %6084 = vst.msk [vmem:[%s9743_s10 + $0x90] sm:$0xff] %vm3170_vm2, %v6052_v51  ;;  %v5949_v62 = vadd.f32 1.0, %v7078_v57  ;;  %v5345_v52 = vpop.f32.mrf.mxu0 }
 0x55c   : > { %7079 = vtanh.f32 %v5886_v5  ;;  %v5791_v25 = vmul.f32 %v5759_v58, %v5695_v48 }
 0x55d   : > { %v5981_v34 = vmul.f32 %v5949_v62, %v5725_v38  ;;  %v5608_v0 = vpop.f32.mrf.mxu1  ;;  %v4797_v58 = vpop.f32.mrf.mxu2 }
 0x55e   : > { %v5823_v28 = vmul.f32 %v5791_v25, %v5695_v48  ;;  %v5660_v35 = vadd.f32 %v5608_v0, %v5385_v20  ;;  %v5388_v0 = vadd.f32 %v5342_v1, %v5113_v31 }
 0x55f   : > { %v6017_v33 = vmul.f32 %v9726_v3, %v5981_v34 }
 0x560   : > { %v5855_v2 = vadd.f32 %v5823_v28, %v5695_v48  ;;  %v5696_v50 = vadd.f32 %v9702_v27, %v5660_v35  ;;  %v10017_v48 = vld [vmem:[%s10101_s6] ss:$0 sm:$0xff] }
 0x561   : > { %v6053_v45 = vadd.f32 %v9732_v8, %v6017_v33 }
 0x562   : > { %v7080_v14 = vpop.eup %7079  ;;  %v5887_v39 = vmul.f32 0.7978846, %v5855_v2  ;;  %v5760_v19 = vmul.f32 0.044715, %v5696_v50  ;;  %v5114_v2 = vadd.f32 %v5070_v22, %v4838_v18 }
 0x563   : > { %6085 = vst.msk [vmem:[%s9743_s10 + $0x98] sm:$0xff] %vm3170_vm2, %v6053_v45  ;;  %v5950_v60 = vadd.f32 1.0, %v7080_v14  ;;  %v10035_v14 = vld [vmem:[%s10103_s8] ss:$0 sm:$0xff]  ;;  %v5348_v40 = vpop.f32.mrf.mxu0 }
 0x564   : > { %7081 = vtanh.f32 %v5887_v39  ;;  %v5792_v55 = vmul.f32 %v5760_v19, %v5696_v50  ;;  %v4564_v19 = vadd.f32 %v9678_v42, %v9459_v63  ;;  %v5389_v1 = vadd.f32 %v5345_v52, %v5114_v2 }
 0x565   : > { %v5982_v26 = vmul.f32 %v5950_v60, %v5726_v24  ;;  %v5611_v53 = vpop.f32.mrf.mxu1  ;;  %v4800_v4 = vpop.f32.mrf.mxu2 }
 0x566   : > { %v5824_v30 = vmul.f32 %v5792_v55, %v5696_v50  ;;  %v5661_v9 = vadd.f32 %v5611_v53, %v5386_v47 }
 0x567   : > { %v6018_v13 = vmul.f32 %v9726_v3, %v5982_v26  ;;  %v4839_v26 = vadd.f32 %v4797_v58, %v4564_v19 }
 0x568   : > { %v5856_v36 = vadd.f32 %v5824_v30, %v5696_v50  ;;  %v5697_v10 = vadd.f32 %v9702_v27, %v5661_v9 }
 0x569   : > { %v6054_v61 = vadd.f32 %v9732_v8, %v6018_v13 }
 0x56a   : > { %v7082_v56 = vpop.eup %7081  ;;  %v5888_v44 = vmul.f32 0.7978846, %v5856_v36  ;;  %v5761_v17 = vmul.f32 0.044715, %v5697_v10  ;;  %v5729_v55 = vmul.f32 0.5, %v5697_v10 }
 0x56b   : > { %6086 = vst.msk [vmem:[%s9743_s10 + $0xa0] sm:$0xff] %vm3170_vm2, %v6054_v61  ;;  %v5951_v7 = vadd.f32 1.0, %v7082_v56 }
 0x56c   : > { %7083 = vtanh.f32 %v5888_v44  ;;  %v5793_v15 = vmul.f32 %v5761_v17, %v5697_v10  ;;  %v10339_v44 = vld [vmem:[#allocation6_spill] sm:$0xff] }
 0x56d   : > { %v5983_v32 = vmul.f32 %v5951_v7, %v5727_v43  ;;  %v5614_v27 = vpop.f32.mrf.mxu1  ;;  %v4565_v17 = vadd.f32 %v10339_v44, %v10338_v41 }
 0x56e   : > { %v5825_v6 = vmul.f32 %v5793_v15, %v5697_v10  ;;  %v5662_v51 = vadd.f32 %v5614_v27, %v5387_v16  ;;  %v5351_v16 = vpop.f32.mrf.mxu0 }
 0x56f   : > { %v6019_v57 = vmul.f32 %v9726_v3, %v5983_v32  ;;  %v5728_v3 = vmul.f32 0.5, %v5696_v50  ;;  %v4840_v22 = vadd.f32 %v4800_v4, %v4565_v17 }
 0x570   : > { %v5857_v23 = vadd.f32 %v5825_v6, %v5697_v10  ;;  %v5698_v5 = vadd.f32 %v10017_v48, %v5662_v51  ;;  %v4803_v6 = vpop.f32.mrf.mxu2 }
 0x571   : > { %v6055_v38 = vadd.f32 %v9732_v8, %v6019_v57  ;;  %v5073_v8 = vpop.f32.mrf.mxu3 }
 0x572   : > { %v7084_v62 = vpop.eup %7083  ;;  %v5889_v46 = vmul.f32 0.7978846, %v5857_v23  ;;  %v5762_v25 = vmul.f32 0.044715, %v5698_v5  ;;  %v5115_v63 = vadd.f32 %v5073_v8, %v4839_v26  ;;  %v5730_v11 = vmul.f32 0.5, %v5698_v5 }
 0x573   : > { %6087 = vst.msk [vmem:[%s9743_s10 + $0xa8] sm:$0xff] %vm3170_vm2, %v6055_v38  ;;  %v5952_v20 = vadd.f32 1.0, %v7084_v62 }
 0x574   : > { %7085 = vtanh.f32 %v5889_v46  ;;  %v5794_v34 = vmul.f32 %v5762_v25, %v5698_v5  ;;  %v5390_v27 = vadd.f32 %v5348_v40, %v5115_v63  ;;  %v10340_v46 = vld [vmem:[#allocation52_spill] sm:$0xff]  ;;  %v10341_v25 = vld [vmem:[#allocation5_spill] sm:$0xff] }
 0x575   : > { %v5984_v28 = vmul.f32 %v5952_v20, %v5728_v3  ;;  %v5617_v35 = vpop.f32.mrf.mxu1  ;;  %v4566_v3 = vadd.f32 %v10341_v25, %v10340_v46 }
 0x576   : > { %v5826_v33 = vmul.f32 %v5794_v34, %v5698_v5  ;;  %v5663_v59 = vadd.f32 %v5617_v35, %v5388_v0 }
 0x577   : > { %v6020_v12 = vmul.f32 %v10028_v21, %v5984_v28  ;;  %v4841_v35 = vadd.f32 %v4803_v6, %v4566_v3 }
 0x578   : > { %v5858_v50 = vadd.f32 %v5826_v33, %v5698_v5  ;;  %v5699_v45 = vadd.f32 %v10017_v48, %v5663_v59 }
 0x579   : > { %v6056_v29 = vadd.f32 %v10035_v14, %v6020_v12  ;;  %v5076_v61 = vpop.f32.mrf.mxu3 }
 0x57a   : > { %v7086_v39 = vpop.eup %7085  ;;  %v5890_v24 = vmul.f32 0.7978846, %v5858_v50  ;;  %v5763_v60 = vmul.f32 0.044715, %v5699_v45  ;;  %v5116_v58 = vadd.f32 %v5076_v61, %v4840_v22  ;;  %v5731_v0 = vmul.f32 0.5, %v5699_v45  ;;  %v10345_v22 = vld [vmem:[#allocation9_spill] sm:$0xff] }
 0x57b   : > { %6088 = vst.msk [vmem:[%s9743_s10 + $0xb0] sm:$0xff] %vm3170_vm2, %v6056_v29  ;;  %v5953_v47 = vadd.f32 1.0, %v7086_v39  ;;  %v5354_v29 = vpop.f32.mrf.mxu0  ;;  %v4806_v39 = vpop.f32.mrf.mxu2 }
 0x57c   : > { %7087 = vtanh.f32 %v5890_v24  ;;  %v5795_v53 = vmul.f32 %v5763_v60, %v5699_v45  ;;  %v5391_v59 = vadd.f32 %v5351_v16, %v5116_v58  ;;  %v10344_v16 = vld [vmem:[#allocation54_spill] sm:$0xff] }
 0x57d   : > { %v5985_v30 = vmul.f32 %v5953_v47, %v5729_v55  ;;  %v5620_v9 = vpop.f32.mrf.mxu1  ;;  %v10342_v55 = vld [vmem:[#allocation53_spill] sm:$0xff]  ;;  %v10343_v47 = vld [vmem:[#allocation40_spill] sm:$0xff] }
 0x57e   : > { %v5827_v54 = vmul.f32 %v5795_v53, %v5699_v45  ;;  %v5664_v13 = vadd.f32 %v5620_v9, %v5389_v1  ;;  %v4567_v26 = vadd.f32 %v10343_v47, %v10342_v55 }
 0x57f   : > { %v6021_v37 = vmul.f32 %v10028_v21, %v5985_v30 }
 0x580   : > { %v5859_v42 = vadd.f32 %v5827_v54, %v5699_v45  ;;  %v5700_v36 = vadd.f32 %v10017_v48, %v5664_v13  ;;  %v4842_v13 = vadd.f32 %v4806_v39, %v4567_v26 }
 0x581   : > { %v6057_v56 = vadd.f32 %v10035_v14, %v6021_v37  ;;  %v5079_v34 = vpop.f32.mrf.mxu3 }
 0x582   : > { %v7088_v10 = vpop.eup %7087  ;;  %v5891_v43 = vmul.f32 0.7978846, %v5859_v42  ;;  %v5764_v7 = vmul.f32 0.044715, %v5700_v36  ;;  %v5117_v40 = vadd.f32 %v5079_v34, %v4841_v35  ;;  %v5732_v9 = vmul.f32 0.5, %v5700_v36 }
 0x583   : > { %6089 = vst.msk [vmem:[%s9743_s10 + $0xb8] sm:$0xff] %vm3170_vm2, %v6057_v56  ;;  %v5954_v15 = vadd.f32 1.0, %v7088_v10  ;;  %v5357_v41 = vpop.f32.mrf.mxu0 }
 0x584   : > { %7089 = vtanh.f32 %v5891_v43  ;;  %v5796_v32 = vmul.f32 %v5764_v7, %v5700_v36  ;;  %v5392_v63 = vadd.f32 %v5354_v29, %v5117_v40 }
 0x585   : > { %v5986_v51 = vmul.f32 %v5954_v15, %v5730_v11  ;;  %v5623_v57 = vpop.f32.mrf.mxu1  ;;  %v4809_v11 = vpop.f32.mrf.mxu2 }
 0x586   : > { %v5828_v31 = vmul.f32 %v5796_v32, %v5700_v36  ;;  %v5665_v52 = vadd.f32 %v5623_v57, %v5390_v27  ;;  %v4568_v32 = vadd.f32 %v10345_v22, %v10344_v16 }
 0x587   : > { %v6022_v23 = vmul.f32 %v10028_v21, %v5986_v51 }
 0x588   : > { %v5860_v38 = vadd.f32 %v5828_v31, %v5700_v36  ;;  %v5701_v62 = vadd.f32 %v10017_v48, %v5665_v52  ;;  %v4843_v52 = vadd.f32 %v4809_v11, %v4568_v32 }
 0x589   : > { %v6058_v5 = vadd.f32 %v10035_v14, %v6022_v23  ;;  %v5082_v30 = vpop.f32.mrf.mxu3 }
 0x58a   : > { %v7090_v49 = vpop.eup %7089  ;;  %v5892_v20 = vmul.f32 0.7978846, %v5860_v38  ;;  %v5765_v18 = vmul.f32 0.044715, %v5701_v62  ;;  %v5118_v17 = vadd.f32 %v5082_v30, %v4842_v13  ;;  %v5733_v51 = vmul.f32 0.5, %v5701_v62 }
 0x58b   : > { %6090 = vst.msk [vmem:[%s9743_s10 + $0xc0] sm:$0xff] %vm3170_vm2, %v6058_v5  ;;  %v5955_v28 = vadd.f32 1.0, %v7090_v49  ;;  %v5360_v34 = vpop.f32.mrf.mxu0 }
 0x58c   : > { %7091 = vtanh.f32 %v5892_v20  ;;  %v5797_v33 = vmul.f32 %v5765_v18, %v5701_v62  ;;  %v5393_v31 = vadd.f32 %v5357_v41, %v5118_v17 }
 0x58d   : > { %v5987_v8 = vmul.f32 %v5955_v28, %v5731_v0  ;;  %v5626_v12 = vpop.f32.mrf.mxu1 }
 0x58e   : > { %v5829_v2 = vmul.f32 %v5797_v33, %v5701_v62  ;;  %v5666_v50 = vadd.f32 %v5626_v12, %v5391_v59 }
 0x58f   : > { %v6023_v19 = vmul.f32 %v10028_v21, %v5987_v8 }
 0x590   : > { %v5861_v24 = vadd.f32 %v5829_v2, %v5701_v62  ;;  %v5702_v60 = vadd.f32 %v10017_v48, %v5666_v50 }
 0x591   : > { %v6059_v45 = vadd.f32 %v10035_v14, %v6023_v19  ;;  %v5085_v58 = vpop.f32.mrf.mxu3 }
 0x592   : > { %v7092_v4 = vpop.eup %7091  ;;  %v5893_v53 = vmul.f32 0.7978846, %v5861_v24  ;;  %v5766_v1 = vmul.f32 0.044715, %v5702_v60  ;;  %v5119_v3 = vadd.f32 %v5085_v58, %v4843_v52  ;;  %v5734_v33 = vmul.f32 0.5, %v5702_v60 }
 0x593   : > { %6091 = vst.msk [vmem:[%s9743_s10 + $0xc8] sm:$0xff] %vm3170_vm2, %v6059_v45  ;;  %v5956_v54 = vadd.f32 1.0, %v7092_v4 }
 0x594   : > { %7093 = vtanh.f32 %v5893_v53  ;;  %v5798_v37 = vmul.f32 %v5766_v1, %v5702_v60  ;;  %v5394_v8 = vadd.f32 %v5360_v34, %v5119_v3 }
 0x595   : > { %v5988_v42 = vmul.f32 %v5956_v54, %v5732_v9  ;;  %v5629_v61 = vpop.f32.mrf.mxu1 }
 0x596   : > { %v5830_v56 = vmul.f32 %v5798_v37, %v5702_v60  ;;  %v5667_v10 = vadd.f32 %v5629_v61, %v5392_v63 }
 0x597   : > { %v6024_v44 = vmul.f32 %v10028_v21, %v5988_v42 }
 0x598   : > { %v5862_v43 = vadd.f32 %v5830_v56, %v5702_v60  ;;  %v5703_v7 = vadd.f32 %v10017_v48, %v5667_v10 }
 0x599   : > { %v6060_v36 = vadd.f32 %v10035_v14, %v6024_v44 }
 0x59a   : > { %v7094_v15 = vpop.eup %7093  ;;  %v5894_v27 = vmul.f32 0.7978846, %v5862_v43  ;;  %v5767_v6 = vmul.f32 0.044715, %v5703_v7  ;;  %v5735_v47 = vmul.f32 0.5, %v5703_v7 }
 0x59b   : > { %6092 = vst.msk [vmem:[%s9743_s10 + $0xd0] sm:$0xff] %vm3170_vm2, %v6060_v36  ;;  %v5957_v57 = vadd.f32 1.0, %v7094_v15 }
 0x59c   : > { %7095 = vtanh.f32 %v5894_v27  ;;  %v5799_v23 = vmul.f32 %v5767_v6, %v5703_v7 }
 0x59d   : > { %v5989_v38 = vmul.f32 %v5957_v57, %v5733_v51  ;;  %v5632_v5 = vpop.f32.mrf.mxu1 }
 0x59e   : > { %v5831_v49 = vmul.f32 %v5799_v23, %v5703_v7  ;;  %v5668_v46 = vadd.f32 %v5632_v5, %v5393_v31 }
 0x59f   : > { %v6025_v25 = vmul.f32 %v10028_v21, %v5989_v38 }
 0x5a0   : > { %v5863_v20 = vadd.f32 %v5831_v49, %v5703_v7  ;;  %v5704_v18 = vadd.f32 %v10017_v48, %v5668_v46 }
 0x5a1   : > { %v6061_v62 = vadd.f32 %v10035_v14, %v6025_v25 }
 0x5a2   : > { %v7096_v0 = vpop.eup %7095  ;;  %v5895_v28 = vmul.f32 0.7978846, %v5863_v20  ;;  %v5768_v35 = vmul.f32 0.044715, %v5704_v18  ;;  %v5736_v63 = vmul.f32 0.5, %v5704_v18 }
 0x5a3   : > { %6093 = vst.msk [vmem:[%s9743_s10 + $0xd8] sm:$0xff] %vm3170_vm2, %v6061_v62  ;;  %v5958_v59 = vadd.f32 1.0, %v7096_v0 }
 0x5a4   : > { %7097 = vtanh.f32 %v5895_v28  ;;  %v5800_v12 = vmul.f32 %v5768_v35, %v5704_v18 }
 0x5a5   : > { %v5990_v2 = vmul.f32 %v5958_v59, %v5734_v33  ;;  %v5635_v50 = vpop.f32.mrf.mxu1 }
 0x5a6   : > { %v5832_v29 = vmul.f32 %v5800_v12, %v5704_v18  ;;  %v5669_v39 = vadd.f32 %v5635_v50, %v5394_v8 }
 0x5a7   : > { %v6026_v19 = vmul.f32 %v10028_v21, %v5990_v2 }
 0x5a8   : > { %v5864_v40 = vadd.f32 %v5832_v29, %v5704_v18  ;;  %v5705_v24 = vadd.f32 %v10017_v48, %v5669_v39 }
 0x5a9   : > { %v6062_v45 = vadd.f32 %v10035_v14, %v6026_v19 }
 0x5aa   : > { %v7098_v4 = vpop.eup %7097  ;;  %v5896_v55 = vmul.f32 0.7978846, %v5864_v40  ;;  %v5769_v60 = vmul.f32 0.044715, %v5705_v24  ;;  %v5737_v44 = vmul.f32 0.5, %v5705_v24 }
 0x5ab   : > { %6094 = vst.msk [vmem:[%s9743_s10 + $0xe0] sm:$0xff] %vm3170_vm2, %v6062_v45  ;;  %v5959_v26 = vadd.f32 1.0, %v7098_v4 }
 0x5ac   : > { %7099 = vtanh.f32 %v5896_v55  ;;  %v5801_v53 = vmul.f32 %v5769_v60, %v5705_v24 }
 0x5ad   : > { %v5991_v1 = vmul.f32 %v5959_v26, %v5735_v47 }
 0x5ae   : > { %v5833_v30 = vmul.f32 %v5801_v53, %v5705_v24 }
 0x5af   : > { %v6027_v9 = vmul.f32 %v10028_v21, %v5991_v1 }
 0x5b0   : > { %v5865_v54 = vadd.f32 %v5833_v30, %v5705_v24 }
 0x5b1   : > { %v6063_v48 = vadd.f32 %v10035_v14, %v6027_v9 }
 0x5b2   : > { %v7100_v13 = vpop.eup %7099  ;;  %v5897_v37 = vmul.f32 0.7978846, %v5865_v54 }
 0x5b3   : > { %6095 = vst.msk [vmem:[%s9743_s10 + $0xe8] sm:$0xff] %vm3170_vm2, %v6063_v48  ;;  %v5960_v42 = vadd.f32 1.0, %v7100_v13 }
 0x5b4   : > { %7101 = vtanh.f32 %v5897_v37 }
 0x5b5   : > { %v5992_v61 = vmul.f32 %v5960_v42, %v5736_v63 }
 0x5b7   : > { %v6028_v56 = vmul.f32 %v10028_v21, %v5992_v61 }
 0x5b9   : > { %v6064_v10 = vadd.f32 %v10035_v14, %v6028_v56 }
 0x5ba   : > { %v7102_v41 = vpop.eup %7101 }
 0x5bb   : > { %6096 = vst.msk [vmem:[%s9743_s10 + $0xf0] sm:$0xff] %vm3170_vm2, %v6064_v10  ;;  %v5961_v17 = vadd.f32 1.0, %v7102_v41 }
 0x5bd   : > { %v5993_v43 = vmul.f32 %v5961_v17, %v5737_v44 }
 0x5bf   : > { %v6029_v7 = vmul.f32 %v10028_v21, %v5993_v43 }
 0x5c1   : > { %v6065_v11 = vadd.f32 %v10035_v14, %v6029_v7 }
 0x5c3   : > { %6097 = vst.msk [vmem:[%s9743_s10 + $0xf8] sm:$0xff] %vm3170_vm2, %v6065_v11 }
 0x5c4 PF: > { %s19_s30 = sadd.s32 1, %s7121_s30  }
 0x5c5   : > { %p16_p4 = scmp.ge.s32.totalorder %s19_s30, 4  }
 0x5c7   :  { %18 = sbr.rel (!%p16_p4) target bundleno = 1 (0x1), region = 106 }

</bundles_post_ra>
